<compile_context>
chip_gen: v6e
topology: v6e:2x2x1
jax: 0.10.0
libtpu: 0.0.40
codegen_flags: <defaults>
</compile_context>

<pallas_src>
import functools

import jax
import jax.numpy as jnp
from jax.experimental import pallas as pl
from jax.experimental.pallas import tpu as pltpu


def capsules_routing_kernel(x_ref, w_ref, e_ref, et_ref, out_ref, *, n_routing):
    """One-shot dynamic-routing kernel.

    x_ref  : [I, B, K]  f32   x[b,k,i] pre-transposed so primary capsules lead
    w_ref  : [I, K, P]  bf16  routing weights, P = n_unit * unit_size
    e_ref  : [J, P]     f32   0/1 expansion matrix: E[j, j*U+u] = 1
    et_ref : [P, J]     f32   its transpose (per-class pooling)
    out_ref: [B, P]     f32   flattened v_j
    """
    i_caps, batch, _ = x_ref.shape
    n_classes = e_ref.shape[0]

    # u_hat[i, b, p] = sum_k x[i, b, k] * w[i, k, p]
    # Batched (over i) MXU matmul, bf16 inputs, f32 accumulation.
    u_hat = jnp.einsum(
        "ibk,ikp->ibp",
        x_ref[...].astype(jnp.bfloat16),
        w_ref[...],
        preferred_element_type=jnp.float32,
    )                                                                  # [I, B, P]

    e = e_ref[...]                                                     # [J, P]
    et = et_ref[...]                                                   # [P, J]

    b_ij = jnp.zeros((i_caps, n_classes), jnp.float32)                 # routing logits
    v_flat = jnp.zeros(out_ref.shape, jnp.float32)

    for it in range(n_routing):  # small static unroll (n_routing ~ 3)
        # softmax over the class axis (lane reduce over J)
        b_max = jnp.max(b_ij, axis=1, keepdims=True)
        eb = jnp.exp(b_ij - b_max)
        c = eb / jnp.sum(eb, axis=1, keepdims=True)                    # [I, J]
        # expand per-class coefficients to the U lanes of each class (matmul,
        # not repeat/reshape -> no relayout)
        c_rep = jnp.dot(c, e, preferred_element_type=jnp.float32)      # [I, P]
        # s[b, p] = sum_i c_rep[i, p] * u_hat[i, b, p]
        s = jnp.sum(c_rep[:, None, :] * u_hat, axis=0)                 # [B, P]
        # squash, exactly as the module writes it: |s|^2/(1+|s|^2) * s/|s|^2
        mag_sq = jnp.dot(s * s, et, preferred_element_type=jnp.float32)      # [B, J]
        mag_sq_rep = jnp.dot(mag_sq, e, preferred_element_type=jnp.float32)  # [B, P]
        v_flat = (mag_sq_rep / (1.0 + mag_sq_rep)) * (s / mag_sq_rep)        # [B, P]
        if it + 1 < n_routing:
            # agreement update; the final iteration's update never affects the
            # output (b_ij is not returned), so it is skipped.
            m = jnp.sum(u_hat * v_flat[None, :, :], axis=1)            # [I, P]
            b_ij = b_ij + (1.0 / batch) * jnp.dot(
                m, et, preferred_element_type=jnp.float32)             # [I, J]

    out_ref[...] = v_flat.astype(out_ref.dtype)


def capsules_layer_forward(x, weight, *, n_routing):
    """CapsulesLayer.forward for use_routing=True.

    x      : [B, in_unit, in_channels]  f32
    weight : [1, in_channels, n_unit, unit_size, in_unit]  (torch param layout)
    returns: [B, n_unit, unit_size, 1]  f32  (== v_j.squeeze(1))
    """
    batch, in_unit, in_channels = x.shape
    _, _, n_unit, unit_size, _ = weight.shape
    p = n_unit * unit_size

    # ---- layout plumbing kept outside the kernel (plain XLA ops) ----
    x_ibk = jnp.transpose(x, (2, 0, 1)).astype(jnp.float32)            # [I, B, K]
    w_ikp = (
        jnp.transpose(weight[0], (0, 3, 1, 2))                         # [I, K, J, U]
        .reshape(in_channels, in_unit, p)                              # [I, K, P]
        .astype(jnp.bfloat16)                                          # half the HBM bytes
    )
    # 0/1 class-expansion matrix and its transpose: replace in-kernel
    # repeat/reshape relayouts with lane-dense matmuls.
    lane_class = jnp.arange(p, dtype=jnp.int32) // unit_size
    e = (lane_class[None, :]
         == jnp.arange(n_unit, dtype=jnp.int32)[:, None]).astype(jnp.float32)   # [J, P]
    et = e.T                                                                    # [P, J]

    flops = (
        2 * in_channels * batch * in_unit * p
        + n_routing * (2 * in_channels * n_unit * p
                       + 4 * in_channels * batch * p
                       + 4 * batch * n_unit * p)
    )
    bytes_accessed = (x_ibk.size * 4 + w_ikp.size * 2
                      + (e.size + et.size) * 4 + batch * p * 4)

    vmem = pl.BlockSpec(memory_space=pltpu.MemorySpace.VMEM)
    out_flat = pl.pallas_call(
        functools.partial(capsules_routing_kernel, n_routing=n_routing),
        out_shape=jax.ShapeDtypeStruct((batch, p), jnp.float32),
        in_specs=[vmem, vmem, vmem, vmem],
        out_specs=vmem,
        compiler_params=pltpu.CompilerParams(vmem_limit_bytes=32 * 1024 * 1024),
        cost_estimate=pl.CostEstimate(
            flops=int(flops),
            transcendentals=int(n_routing * in_channels * n_unit),
            bytes_accessed=int(bytes_accessed),
        ),
    )(x_ibk, w_ikp, e, et)

    # torch returns v_j.squeeze(1): [B, n_unit, unit_size, 1]
    return out_flat.reshape(batch, n_unit, unit_size, 1)


def capsules_routing_reference(x, weight, *, n_routing):
    """Pure-JAX mirror of the PyTorch routing() (same bf16 weight rounding)."""
    batch, in_unit, in_channels = x.shape
    _, _, n_unit, unit_size, _ = weight.shape
    x_t = jnp.swapaxes(x, 1, 2)                                        # [B, I, K]
    u_hat = jnp.einsum(
        "ijuk,bik->biju",
        weight[0].astype(jnp.bfloat16),
        x_t.astype(jnp.bfloat16),
        preferred_element_type=jnp.float32,
    )                                                                  # [B, I, J, U]
    b_ij = jnp.zeros((in_channels, n_unit), jnp.float32)
    v = jnp.zeros((batch, n_unit, unit_size), jnp.float32)
    for _ in range(n_routing):
        c = jax.nn.softmax(b_ij, axis=1)                               # [I, J]
        s = jnp.einsum("ij,biju->bju", c, u_hat)                       # [B, J, U]
        mag_sq = jnp.sum(s * s, axis=2, keepdims=True)                 # [B, J, 1]
        v = (mag_sq / (1.0 + mag_sq)) * (s / mag_sq)                   # squash (verbatim)
        agreement = jnp.einsum("biju,bju->bij", u_hat, v)              # [B, I, J]
        b_ij = b_ij + jnp.mean(agreement, axis=0)
    return v[..., None]                                                # [B, J, U, 1]


if __name__ == "__main__":
    # Small shapes consistent with the module (paper scale: B=128, in_unit=8,
    # in_channels=1152, n_unit=10, unit_size=16, n_routing=3).
    batch_size = 4
    in_unit = 8
    in_channels = 32
    n_unit = 10
    unit_size = 16
    n_routing = 3

    key = jax.random.PRNGKey(0)
    kx, kw = jax.random.split(key)
    x = jax.random.normal(kx, (batch_size, in_unit, in_channels), jnp.float32)
    weight = jax.random.normal(
        kw, (1, in_channels, n_unit, unit_size, in_unit), jnp.float32)  # torch.randn init

    out = capsules_layer_forward(x, weight, n_routing=n_routing)
    out = jax.block_until_ready(out)

    ref = capsules_routing_reference(x, weight, n_routing=n_routing)
    assert out.shape == (batch_size, n_unit, unit_size, 1)
    # tolerance reflects the bf16 weight/activation path of the u_hat matmul
    assert jnp.allclose(out, ref, atol=1e-3, rtol=1e-3), "mismatch vs pure-JAX reference"

    print("KERNEL_OK")
</pallas_src>

<mosaic_0001>
module attributes {stable_mosaic.version = 11 : i64} {
  func.func @capsules_routing_kernel(%arg0: memref<32x4x8xf32, #tpu.memory_space<vmem>>, %arg1: memref<32x8x160xbf16, #tpu.memory_space<vmem>>, %arg2: memref<10x160xf32, #tpu.memory_space<vmem>>, %arg3: memref<160x10xf32, #tpu.memory_space<vmem>>, %arg4: memref<4x160xf32, #tpu.memory_space<vmem>>) attributes {dimension_semantics = [], scalar_prefetch = 0 : i64, scratch_operands = 0 : i64, tpu.core_type = #tpu.core_type<tc>} {
    %c0 = arith.constant 0 : index
    %c0_0 = arith.constant 0 : index
    %c0_1 = arith.constant 0 : index
    %0 = vector.load %arg0[%c0, %c0_0, %c0_1] : memref<32x4x8xf32, #tpu.memory_space<vmem>>, vector<32x4x8xf32>
    %1 = arith.truncf %0 : vector<32x4x8xf32> to vector<32x4x8xbf16>
    %c0_2 = arith.constant 0 : index
    %c0_3 = arith.constant 0 : index
    %c0_4 = arith.constant 0 : index
    %2 = vector.load %arg1[%c0_2, %c0_3, %c0_4] : memref<32x8x160xbf16, #tpu.memory_space<vmem>>, vector<32x8x160xbf16>
    "tpu.trace_start"() <{level = 10 : i32, message = "ibk,ikp->ibp"}> : () -> ()
    %cst = arith.constant dense<0.000000e+00> : vector<32x4x160xf32>
    %3 = tpu.matmul %1, %2, %cst {dimension_numbers = #tpu.dot_dimension_numbers<[2], [1], [1], [2], [0, 0, 0, 1, 1, 2], [0], [0]>} : vector<32x4x8xbf16>, vector<32x8x160xbf16>, vector<32x4x160xf32> -> vector<32x4x160xf32>
    "tpu.trace_stop"() : () -> ()
    %c0_5 = arith.constant 0 : index
    %c0_6 = arith.constant 0 : index
    %4 = vector.load %arg2[%c0_5, %c0_6] : memref<10x160xf32, #tpu.memory_space<vmem>>, vector<10x160xf32>
    %c0_7 = arith.constant 0 : index
    %c0_8 = arith.constant 0 : index
    %5 = vector.load %arg3[%c0_7, %c0_8] : memref<160x10xf32, #tpu.memory_space<vmem>>, vector<160x10xf32>
    %cst_9 = arith.constant 0.000000e+00 : f32
    %6 = vector.broadcast %cst_9 : f32 to vector<32x10xf32>
    %cst_10 = arith.constant dense<0xFF800000> : vector<32xf32>
    %7 = vector.multi_reduction <maximumf>, %6, %cst_10 [1] : vector<32x10xf32> to vector<32xf32>
    %8 = vector.shape_cast %7 : vector<32xf32> to vector<32x1xf32>
    %9 = vector.broadcast %8 : vector<32x1xf32> to vector<32x10xf32>
    %10 = arith.subf %6, %9 : vector<32x10xf32>
    %11 = math.exp %10 : vector<32x10xf32>
    %cst_11 = arith.constant dense<0.000000e+00> : vector<32xf32>
    %12 = vector.multi_reduction <add>, %11, %cst_11 [1] : vector<32x10xf32> to vector<32xf32>
    %13 = vector.shape_cast %12 : vector<32xf32> to vector<32x1xf32>
    %14 = vector.broadcast %13 : vector<32x1xf32> to vector<32x10xf32>
    %15 = arith.divf %11, %14 : vector<32x10xf32>
    %cst_12 = arith.constant dense<0.000000e+00> : vector<32x160xf32>
    %16 = tpu.matmul %15, %4, %cst_12 {dimension_numbers = #tpu.dot_dimension_numbers<[1], [0], [0], [1], [0, 0, 1, 1], [], []>} : vector<32x10xf32>, vector<10x160xf32>, vector<32x160xf32> -> vector<32x160xf32>
    %17 = vector.shape_cast %16 : vector<32x160xf32> to vector<32x1x160xf32>
    %18 = vector.broadcast %17 : vector<32x1x160xf32> to vector<32x4x160xf32>
    %19 = arith.mulf %18, %3 : vector<32x4x160xf32>
    %cst_13 = arith.constant dense<0.000000e+00> : vector<4x160xf32>
    %20 = vector.multi_reduction <add>, %19, %cst_13 [0] : vector<32x4x160xf32> to vector<4x160xf32>
    %21 = arith.mulf %20, %20 : vector<4x160xf32>
    %cst_14 = arith.constant dense<0.000000e+00> : vector<4x10xf32>
    %22 = tpu.matmul %21, %5, %cst_14 {dimension_numbers = #tpu.dot_dimension_numbers<[1], [0], [0], [1], [0, 0, 1, 1], [], []>} : vector<4x160xf32>, vector<160x10xf32>, vector<4x10xf32> -> vector<4x10xf32>
    %cst_15 = arith.constant dense<0.000000e+00> : vector<4x160xf32>
    %23 = tpu.matmul %22, %4, %cst_15 {dimension_numbers = #tpu.dot_dimension_numbers<[1], [0], [0], [1], [0, 0, 1, 1], [], []>} : vector<4x10xf32>, vector<10x160xf32>, vector<4x160xf32> -> vector<4x160xf32>
    %cst_16 = arith.constant 1.000000e+00 : f32
    %24 = vector.broadcast %cst_16 : f32 to vector<4x160xf32>
    %25 = arith.addf %24, %23 : vector<4x160xf32>
    %26 = arith.divf %23, %25 : vector<4x160xf32>
    %27 = arith.divf %20, %23 : vector<4x160xf32>
    %28 = arith.mulf %26, %27 : vector<4x160xf32>
    %29 = vector.shape_cast %28 : vector<4x160xf32> to vector<1x4x160xf32>
    %30 = vector.broadcast %29 : vector<1x4x160xf32> to vector<32x4x160xf32>
    %31 = arith.mulf %3, %30 : vector<32x4x160xf32>
    %cst_17 = arith.constant dense<0.000000e+00> : vector<32x160xf32>
    %32 = vector.multi_reduction <add>, %31, %cst_17 [1] : vector<32x4x160xf32> to vector<32x160xf32>
    %cst_18 = arith.constant dense<0.000000e+00> : vector<32x10xf32>
    %33 = tpu.matmul %32, %5, %cst_18 {dimension_numbers = #tpu.dot_dimension_numbers<[1], [0], [0], [1], [0, 0, 1, 1], [], []>} : vector<32x160xf32>, vector<160x10xf32>, vector<32x10xf32> -> vector<32x10xf32>
    %cst_19 = arith.constant 2.500000e-01 : f32
    %34 = vector.broadcast %cst_19 : f32 to vector<32x10xf32>
    %35 = arith.mulf %34, %33 : vector<32x10xf32>
    %36 = arith.addf %6, %35 : vector<32x10xf32>
    %cst_20 = arith.constant dense<0xFF800000> : vector<32xf32>
    %37 = vector.multi_reduction <maximumf>, %36, %cst_20 [1] : vector<32x10xf32> to vector<32xf32>
    %38 = vector.shape_cast %37 : vector<32xf32> to vector<32x1xf32>
    %39 = vector.broadcast %38 : vector<32x1xf32> to vector<32x10xf32>
    %40 = arith.subf %36, %39 : vector<32x10xf32>
    %41 = math.exp %40 : vector<32x10xf32>
    %cst_21 = arith.constant dense<0.000000e+00> : vector<32xf32>
    %42 = vector.multi_reduction <add>, %41, %cst_21 [1] : vector<32x10xf32> to vector<32xf32>
    %43 = vector.shape_cast %42 : vector<32xf32> to vector<32x1xf32>
    %44 = vector.broadcast %43 : vector<32x1xf32> to vector<32x10xf32>
    %45 = arith.divf %41, %44 : vector<32x10xf32>
    %cst_22 = arith.constant dense<0.000000e+00> : vector<32x160xf32>
    %46 = tpu.matmul %45, %4, %cst_22 {dimension_numbers = #tpu.dot_dimension_numbers<[1], [0], [0], [1], [0, 0, 1, 1], [], []>} : vector<32x10xf32>, vector<10x160xf32>, vector<32x160xf32> -> vector<32x160xf32>
    %47 = vector.shape_cast %46 : vector<32x160xf32> to vector<32x1x160xf32>
    %48 = vector.broadcast %47 : vector<32x1x160xf32> to vector<32x4x160xf32>
    %49 = arith.mulf %48, %3 : vector<32x4x160xf32>
    %cst_23 = arith.constant dense<0.000000e+00> : vector<4x160xf32>
    %50 = vector.multi_reduction <add>, %49, %cst_23 [0] : vector<32x4x160xf32> to vector<4x160xf32>
    %51 = arith.mulf %50, %50 : vector<4x160xf32>
    %cst_24 = arith.constant dense<0.000000e+00> : vector<4x10xf32>
    %52 = tpu.matmul %51, %5, %cst_24 {dimension_numbers = #tpu.dot_dimension_numbers<[1], [0], [0], [1], [0, 0, 1, 1], [], []>} : vector<4x160xf32>, vector<160x10xf32>, vector<4x10xf32> -> vector<4x10xf32>
    %cst_25 = arith.constant dense<0.000000e+00> : vector<4x160xf32>
    %53 = tpu.matmul %52, %4, %cst_25 {dimension_numbers = #tpu.dot_dimension_numbers<[1], [0], [0], [1], [0, 0, 1, 1], [], []>} : vector<4x10xf32>, vector<10x160xf32>, vector<4x160xf32> -> vector<4x160xf32>
    %cst_26 = arith.constant 1.000000e+00 : f32
    %54 = vector.broadcast %cst_26 : f32 to vector<4x160xf32>
    %55 = arith.addf %54, %53 : vector<4x160xf32>
    %56 = arith.divf %53, %55 : vector<4x160xf32>
    %57 = arith.divf %50, %53 : vector<4x160xf32>
    %58 = arith.mulf %56, %57 : vector<4x160xf32>
    %59 = vector.shape_cast %58 : vector<4x160xf32> to vector<1x4x160xf32>
    %60 = vector.broadcast %59 : vector<1x4x160xf32> to vector<32x4x160xf32>
    %61 = arith.mulf %3, %60 : vector<32x4x160xf32>
    %cst_27 = arith.constant dense<0.000000e+00> : vector<32x160xf32>
    %62 = vector.multi_reduction <add>, %61, %cst_27 [1] : vector<32x4x160xf32> to vector<32x160xf32>
    %cst_28 = arith.constant dense<0.000000e+00> : vector<32x10xf32>
    %63 = tpu.matmul %62, %5, %cst_28 {dimension_numbers = #tpu.dot_dimension_numbers<[1], [0], [0], [1], [0, 0, 1, 1], [], []>} : vector<32x160xf32>, vector<160x10xf32>, vector<32x10xf32> -> vector<32x10xf32>
    %cst_29 = arith.constant 2.500000e-01 : f32
    %64 = vector.broadcast %cst_29 : f32 to vector<32x10xf32>
    %65 = arith.mulf %64, %63 : vector<32x10xf32>
    %66 = arith.addf %36, %65 : vector<32x10xf32>
    %cst_30 = arith.constant dense<0xFF800000> : vector<32xf32>
    %67 = vector.multi_reduction <maximumf>, %66, %cst_30 [1] : vector<32x10xf32> to vector<32xf32>
    %68 = vector.shape_cast %67 : vector<32xf32> to vector<32x1xf32>
    %69 = vector.broadcast %68 : vector<32x1xf32> to vector<32x10xf32>
    %70 = arith.subf %66, %69 : vector<32x10xf32>
    %71 = math.exp %70 : vector<32x10xf32>
    %cst_31 = arith.constant dense<0.000000e+00> : vector<32xf32>
    %72 = vector.multi_reduction <add>, %71, %cst_31 [1] : vector<32x10xf32> to vector<32xf32>
    %73 = vector.shape_cast %72 : vector<32xf32> to vector<32x1xf32>
    %74 = vector.broadcast %73 : vector<32x1xf32> to vector<32x10xf32>
    %75 = arith.divf %71, %74 : vector<32x10xf32>
    %cst_32 = arith.constant dense<0.000000e+00> : vector<32x160xf32>
    %76 = tpu.matmul %75, %4, %cst_32 {dimension_numbers = #tpu.dot_dimension_numbers<[1], [0], [0], [1], [0, 0, 1, 1], [], []>} : vector<32x10xf32>, vector<10x160xf32>, vector<32x160xf32> -> vector<32x160xf32>
    %77 = vector.shape_cast %76 : vector<32x160xf32> to vector<32x1x160xf32>
    %78 = vector.broadcast %77 : vector<32x1x160xf32> to vector<32x4x160xf32>
    %79 = arith.mulf %78, %3 : vector<32x4x160xf32>
    %cst_33 = arith.constant dense<0.000000e+00> : vector<4x160xf32>
    %80 = vector.multi_reduction <add>, %79, %cst_33 [0] : vector<32x4x160xf32> to vector<4x160xf32>
    %81 = arith.mulf %80, %80 : vector<4x160xf32>
    %cst_34 = arith.constant dense<0.000000e+00> : vector<4x10xf32>
    %82 = tpu.matmul %81, %5, %cst_34 {dimension_numbers = #tpu.dot_dimension_numbers<[1], [0], [0], [1], [0, 0, 1, 1], [], []>} : vector<4x160xf32>, vector<160x10xf32>, vector<4x10xf32> -> vector<4x10xf32>
    %cst_35 = arith.constant dense<0.000000e+00> : vector<4x160xf32>
    %83 = tpu.matmul %82, %4, %cst_35 {dimension_numbers = #tpu.dot_dimension_numbers<[1], [0], [0], [1], [0, 0, 1, 1], [], []>} : vector<4x10xf32>, vector<10x160xf32>, vector<4x160xf32> -> vector<4x160xf32>
    %cst_36 = arith.constant 1.000000e+00 : f32
    %84 = vector.broadcast %cst_36 : f32 to vector<4x160xf32>
    %85 = arith.addf %84, %83 : vector<4x160xf32>
    %86 = arith.divf %83, %85 : vector<4x160xf32>
    %87 = arith.divf %80, %83 : vector<4x160xf32>
    %88 = arith.mulf %86, %87 : vector<4x160xf32>
    %c0_37 = arith.constant 0 : index
    %c0_38 = arith.constant 0 : index
    %89 = vector.load %arg4[%c0_37, %c0_38] : memref<4x160xf32, #tpu.memory_space<vmem>>, vector<4x160xf32>
    tpu.vector_store %arg4[%c0_37, %c0_38], %88 {strides = array<i32>} : memref<4x160xf32, #tpu.memory_space<vmem>>, vector<4x160xf32>,
    return
  }
}

</mosaic_0001>

<bundles_post_ra>
// kernel: tpu_custom_call.1
= control target key start
LH: loop header
LB: loop body
LE: loop exit
PB: predicated region body
PF: predicated region fallthrough
CT: control target
= control target key end

     0   :  { %vm1901_vm0 = vcmask 80896   ;;  %vm124_vm1 = vcmask 1043456   ;;  %v10077_v2 = vmov 0.0   ;;  %v6807_v6 = vmov 0   ;;  %s10038_s0 = inlined_call_operand.vmem [shape: f32[32,4,8], index: 0, kind: input, shape index: {}]   ;;  %s10039_s1 = inlined_call_operand.vmem [shape: bf16[32,8,160], index: 1, kind: input, shape index: {}]   ;;  %s10040_s2 = inlined_call_operand.vmem [shape: f32[10,160], index: 2, kind: input, shape index: {}]   ;;  %s10041_s3 = inlined_call_operand.vmem [shape: f32[160,10], index: 3, kind: input, shape index: {}]   ;;  %s10042_s4 = inlined_call_operand.hbm [shape: f32[4,160], index: 4, kind: output, shape index: {}]  }
   0x1   :  { %v83_v0 = vld [vmem:[%s10039_s1] sm:$0xff]  ;;  %v85_v1 = vld [vmem:[%s10039_s1 + $0x10] sm:$0xff]  ;;  %v1902_v3 = vsel %vm1901_vm0, 1.0, %v10077_v2  ;;  %163 = vmatprep.mubr.bf16.mxu0 %v6807_v6  ;;  %218 = vmatprep.mubr.bf16.mxu1 %v6807_v6  ;;  %vm120_vm2 = vcmask 64512   ;;  %v84_v13 = vld [vmem:[%s10039_s1 + $0x8] sm:$0xff] }
   0x2   :  { %v6438_v4 = vcombine.high %v83_v0, %v83_v0  ;;  %v6437_v5 = vcombine.low %v83_v0, %v83_v0  ;;  %v19_v7 = vld [vmem:[%s10038_s0] sm:$0xf]  ;;  %1903 = vadd.xlane.f32.xlu0 %v1902_v3  ;;  %v6446_v8 = vcombine.high %v85_v1, %v85_v1  ;;  %v6445_v9 = vcombine.low %v85_v1, %v85_v1  ;;  %v86_v16 = vld [vmem:[%s10039_s1 + $0x18] sm:$0xff]  ;;  %v20_v19 = vld [vmem:[%s10038_s0 + $0x4] sm:$0xf] }
   0x3   :  { %v87_v10 = vld [vmem:[%s10039_s1 + $0x20] sm:$0xff]  ;;  %v51_v12 = vpack.c.bf16 %v19_v7, %v19_v7  ;;  %v6442_v17 = vcombine.high %v84_v13, %v84_v13  ;;  %v6441_v18 = vcombine.low %v84_v13, %v84_v13  ;;  %v21_v20 = vld [vmem:[%s10038_s0 + $0x8] sm:$0xf]  ;;  %v6450_v22 = vcombine.high %v86_v16, %v86_v16  ;;  %v89_v27 = vld [vmem:[%s10039_s1 + $0x30] sm:$0xff] }
   0x4   :  { %6439 = vmatprep.subr.msk.bf16.mxu0 %vm124_vm1, %v6438_v4  ;;  %v126_v11 = vsel %vm124_vm1, %v6437_v5, 0  ;;  %v236_v14 = vsel %vm124_vm1, %v6445_v9, 0  ;;  %v6454_v15 = vcombine.high %v87_v10, %v87_v10  ;;  %v6449_v23 = vcombine.low %v86_v16, %v86_v16  ;;  %v88_v24 = vld [vmem:[%s10039_s1 + $0x28] sm:$0xff]  ;;  %v23_v35 = vld [vmem:[%s10038_s0 + $0x10] sm:$0xf]  ;;  %v90_v36 = vld [vmem:[%s10039_s1 + $0x38] sm:$0xff] }
   0x5   :  { %146 = vmatpush1.bf16.msra.mxu0 %v126_v11  ;;  %v181_v21 = vsel %vm124_vm1, %v6441_v18, 0  ;;  %v6453_v25 = vcombine.low %v87_v10, %v87_v10  ;;  %6443 = vmatprep.subr.msk.bf16.mxu1 %vm124_vm1, %v6442_v17  ;;  %v52_v26 = vpack.c.bf16 %v20_v19, %v20_v19  ;;  %v53_v28 = vpack.c.bf16 %v21_v20, %v21_v20  ;;  %v22_v33 = vld [vmem:[%s10038_s0 + $0xc] sm:$0xf]  ;;  %v91_v39 = vld [vmem:[%s10039_s1 + $0x40] sm:$0xff] }
   0x6   :  { %6447 = vmatprep.subr.msk.bf16.mxu0 %vm124_vm1, %v6446_v8  ;;  %201 = vmatpush1.bf16.msra.mxu1 %v181_v21  ;;  %v291_v29 = vsel %vm124_vm1, %v6449_v23, 0  ;;  %v6458_v30 = vcombine.high %v88_v24, %v88_v24  ;;  %v6462_v32 = vcombine.high %v89_v27, %v89_v27  ;;  %v6457_v34 = vcombine.low %v88_v24, %v88_v24 }
   0x7   :  { %6451 = vmatprep.subr.msk.bf16.mxu1 %vm124_vm1, %v6450_v22  ;;  %v346_v31 = vsel %vm124_vm1, %v6453_v25, 0  ;;  %v6461_v37 = vcombine.low %v89_v27, %v89_v27  ;;  %v54_v38 = vpack.c.bf16 %v22_v33, %v22_v33  ;;  %v55_v40 = vpack.c.bf16 %v23_v35, %v23_v35 }
   0x8   :  { %6440 = vmatmul.mubr.msk.bf16.vlgmr.msra.gmra.mxu0 %vm120_vm2, %v51_v12  ;;  %v401_v41 = vsel %vm124_vm1, %v6457_v34, 0  ;;  %v6466_v42 = vcombine.high %v90_v36, %v90_v36  ;;  %v6470_v44 = vcombine.high %v91_v39, %v91_v39 }
   0x9   :  { %256 = vmatpush1.bf16.msra.mxu0 %v236_v14  ;;  %273 = vmatprep.mubr.bf16.mxu0 %v6807_v6  ;;  %v456_v43 = vsel %vm124_vm1, %v6461_v37, 0 }
   0xa   :  { %6455 = vmatprep.subr.msk.bf16.mxu0 %vm124_vm1, %v6454_v15  ;;  %6444 = vmatmul.mubr.msk.bf16.vlgmr.msra.gmra.mxu1 %vm120_vm2, %v52_v26 }
   0xb   :  { %311 = vmatpush1.bf16.msra.mxu1 %v291_v29  ;;  %328 = vmatprep.mubr.bf16.mxu1 %v6807_v6 }
   0xc   :  { %6459 = vmatprep.subr.msk.bf16.mxu1 %vm124_vm1, %v6458_v30 }
  0x10   :  { %6448 = vmatmul.mubr.msk.bf16.vlgmr.msra.gmra.mxu0 %vm120_vm2, %v53_v28 }
  0x11   :  { %366 = vmatpush1.bf16.msra.mxu0 %v346_v31  ;;  %383 = vmatprep.mubr.bf16.mxu0 %v6807_v6 }
  0x12   :  { %6463 = vmatprep.subr.msk.bf16.mxu0 %vm124_vm1, %v6462_v32  ;;  %6452 = vmatmul.mubr.msk.bf16.vlgmr.msra.gmra.mxu1 %vm120_vm2, %v54_v38 }
  0x13   :  { %9 = vsyncpa [#allocation3], 0  ;;  %421 = vmatpush1.bf16.msra.mxu1 %v401_v41  ;;  %438 = vmatprep.mubr.bf16.mxu1 %v6807_v6  ;;  %v24_v45 = vld [vmem:[%s10038_s0 + $0x14] sm:$0xf]  ;;  %v6465_v46 = vcombine.low %v90_v36, %v90_v36  ;;  %v25_v47 = vld [vmem:[%s10038_s0 + $0x18] sm:$0xf]  ;;  %v6469_v49 = vcombine.low %v91_v39, %v91_v39 }
  0x14   :  { %6467 = vmatprep.subr.msk.bf16.mxu1 %vm124_vm1, %v6466_v42  ;;  %v92_v48 = vld [vmem:[%s10039_s1 + $0x48] sm:$0xff]  ;;  %v56_v50 = vpack.c.bf16 %v24_v45, %v24_v45  ;;  %v93_v51 = vld [vmem:[%s10039_s1 + $0x50] sm:$0xff]  ;;  %v57_v52 = vpack.c.bf16 %v25_v47, %v25_v47  ;;  %v26_v57 = vld [vmem:[%s10038_s0 + $0x1c] sm:$0xf]  ;;  %vm1910_vm3 = vcmask 1041408   ;;  %vm2661_vm4 = vcmask 257024  }
  0x15   :  { %v511_v53 = vsel %vm124_vm1, %v6465_v46, 0  ;;  %v6474_v54 = vcombine.high %v92_v48, %v92_v48  ;;  %v566_v55 = vsel %vm124_vm1, %v6469_v49, 0  ;;  %v6478_v56 = vcombine.high %v93_v51, %v93_v51  ;;  %v27_v59 = vld [vmem:[%s10038_s0 + $0x20] sm:$0xf]  ;;  %v94_v60 = vld [vmem:[%s10039_s1 + $0x58] sm:$0xff]  ;;  %v96_v10 = vld [vmem:[%s10039_s1 + $0x68] sm:$0xff] }
  0x16   :  { %v6473_v58 = vcombine.low %v92_v48, %v92_v48  ;;  %v6477_v61 = vcombine.low %v93_v51, %v93_v51  ;;  %v58_v62 = vpack.c.bf16 %v26_v57, %v26_v57  ;;  %v95_v63 = vld [vmem:[%s10039_s1 + $0x60] sm:$0xff]  ;;  %v59_v0 = vpack.c.bf16 %v27_v59, %v27_v59  ;;  %v29_v9 = vld [vmem:[%s10038_s0 + $0x28] sm:$0xf]  ;;  %v97_v13 = vld [vmem:[%s10039_s1 + $0x70] sm:$0xff] }
  0x17   :  { %v6482_v3 = vcombine.high %v94_v60, %v94_v60  ;;  %v6486_v5 = vcombine.high %v95_v63, %v95_v63  ;;  %v28_v7 = vld [vmem:[%s10038_s0 + $0x24] sm:$0xf]  ;;  %v6481_v8 = vcombine.low %v94_v60, %v94_v60  ;;  %v6485_v11 = vcombine.low %v95_v63, %v95_v63  ;;  %v30_v19 = vld [vmem:[%s10038_s0 + $0x2c] sm:$0xf]  ;;  %v31_v21 = vld [vmem:[%s10038_s0 + $0x30] sm:$0xf] }
  0x18   :  { %6456 = vmatmul.mubr.msk.bf16.vlgmr.msra.gmra.mxu0 %vm120_vm2, %v55_v40  ;;  %v621_v1 = vsel %vm124_vm1, %v6473_v58, 0  ;;  %v676_v4 = vsel %vm124_vm1, %v6477_v61, 0  ;;  %v60_v12 = vpack.c.bf16 %v28_v7, %v28_v7  ;;  %v61_v14 = vpack.c.bf16 %v29_v9, %v29_v9  ;;  %v98_v22 = vld [vmem:[%s10039_s1 + $0x78] sm:$0xff]  ;;  %v99_v25 = vld [vmem:[%s10039_s1 + $0x80] sm:$0xff]  ;;  %v32_v31 = vld [vmem:[%s10038_s0 + $0x34] sm:$0xf] }
  0x19   :  { %476 = vmatpush1.bf16.msra.mxu0 %v456_v43  ;;  %493 = vmatprep.mubr.bf16.mxu0 %v6807_v6  ;;  %v731_v15 = vsel %vm124_vm1, %v6481_v8, 0  ;;  %v6490_v16 = vcombine.high %v96_v10, %v96_v10  ;;  %v786_v17 = vsel %vm124_vm1, %v6485_v11, 0  ;;  %v6494_v18 = vcombine.high %v97_v13, %v97_v13  ;;  %v33_v33 = vld [vmem:[%s10038_s0 + $0x38] sm:$0xf]  ;;  %v100_v34 = vld [vmem:[%s10039_s1 + $0x88] sm:$0xff]  ;;  %v101_v37 = vld [vmem:[%s10039_s1 + $0x90] sm:$0xff] }
  0x1a   :  { %6471 = vmatprep.subr.msk.bf16.mxu0 %vm124_vm1, %v6470_v44  ;;  %6460 = vmatmul.mubr.msk.bf16.vlgmr.msra.gmra.mxu1 %vm120_vm2, %v56_v50  ;;  %v6489_v20 = vcombine.low %v96_v10, %v96_v10  ;;  %v6493_v23 = vcombine.low %v97_v13, %v97_v13  ;;  %v62_v24 = vpack.c.bf16 %v30_v19, %v30_v19  ;;  %v34_v43 = vld [vmem:[%s10038_s0 + $0x3c] sm:$0xf]  ;;  %v35_v45 = vld [vmem:[%s10038_s0 + $0x40] sm:$0xf]  ;;  %v37_v57 = vld [vmem:[%s10038_s0 + $0x48] sm:$0xf] }
  0x1b   :  { %531 = vmatpush1.bf16.msra.mxu1 %v511_v53  ;;  %548 = vmatprep.mubr.bf16.mxu1 %v6807_v6  ;;  %v63_v26 = vpack.c.bf16 %v31_v21, %v31_v21  ;;  %v6498_v28 = vcombine.high %v98_v22, %v98_v22  ;;  %v6502_v30 = vcombine.high %v99_v25, %v99_v25  ;;  %v102_v46 = vld [vmem:[%s10039_s1 + $0x98] sm:$0xff]  ;;  %v103_v49 = vld [vmem:[%s10039_s1 + $0xa0] sm:$0xff]  ;;  %v104_v58 = vld [vmem:[%s10039_s1 + $0xa8] sm:$0xff]  ;;  %vm2727_vm5 = vcmask 261120  }
  0x1c   :  { %6475 = vmatprep.subr.msk.bf16.mxu1 %vm124_vm1, %v6474_v54  ;;  %v841_v27 = vsel %vm124_vm1, %v6489_v20, 0  ;;  %v896_v29 = vsel %vm124_vm1, %v6493_v23, 0  ;;  %v6497_v32 = vcombine.low %v98_v22, %v98_v22  ;;  %v6501_v35 = vcombine.low %v99_v25, %v99_v25  ;;  %v105_v61 = vld [vmem:[%s10039_s1 + $0xb0] sm:$0xff]  ;;  %v106_v8 = vld [vmem:[%s10039_s1 + $0xb8] sm:$0xff]  ;;  %v107_v11 = vld [vmem:[%s10039_s1 + $0xc0] sm:$0xff] }
  0x1d   :  { %v64_v36 = vpack.c.bf16 %v32_v31, %v32_v31  ;;  %v65_v38 = vpack.c.bf16 %v33_v33, %v33_v33  ;;  %v6506_v40 = vcombine.high %v100_v34, %v100_v34  ;;  %v6510_v42 = vcombine.high %v101_v37, %v101_v37  ;;  %v39_v7 = vld [vmem:[%s10038_s0 + $0x50] sm:$0xf]  ;;  %v41_v19 = vld [vmem:[%s10038_s0 + $0x58] sm:$0xf]  ;;  %v108_v20 = vld [vmem:[%s10039_s1 + $0xc8] sm:$0xff] }
  0x1e   :  { %v951_v39 = vsel %vm124_vm1, %v6497_v32, 0  ;;  %v1006_v41 = vsel %vm124_vm1, %v6501_v35, 0  ;;  %v6505_v44 = vcombine.low %v100_v34, %v100_v34  ;;  %v6509_v47 = vcombine.low %v101_v37, %v101_v37  ;;  %v109_v23 = vld [vmem:[%s10039_s1 + $0xd0] sm:$0xff]  ;;  %v43_v31 = vld [vmem:[%s10038_s0 + $0x60] sm:$0xf]  ;;  %v110_v32 = vld [vmem:[%s10039_s1 + $0xd8] sm:$0xff] }
  0x1f   :  { %v66_v48 = vpack.c.bf16 %v34_v43, %v34_v43  ;;  %v67_v50 = vpack.c.bf16 %v35_v45, %v35_v45  ;;  %v6518_v54 = vcombine.high %v103_v49, %v103_v49  ;;  %v6517_v59 = vcombine.low %v103_v49, %v103_v49  ;;  %v111_v35 = vld [vmem:[%s10039_s1 + $0xe0] sm:$0xff]  ;;  %v45_v43 = vld [vmem:[%s10038_s0 + $0x68] sm:$0xf] }
  0x20   :  { %6464 = vmatmul.mubr.msk.bf16.vlgmr.msra.gmra.mxu0 %vm120_vm2, %v57_v52  ;;  %v1061_v51 = vsel %vm124_vm1, %v6505_v44, 0  ;;  %v6514_v52 = vcombine.high %v102_v46, %v102_v46  ;;  %v1116_v53 = vsel %vm124_vm1, %v6509_v47, 0  ;;  %v6525_v9 = vcombine.low %v105_v61, %v105_v61  ;;  %v112_v44 = vld [vmem:[%s10039_s1 + $0xe8] sm:$0xff]  ;;  %v113_v47 = vld [vmem:[%s10039_s1 + $0xf0] sm:$0xff] }
  0x21   :  { %586 = vmatpush1.bf16.msra.mxu0 %v566_v55  ;;  %603 = vmatprep.mubr.bf16.mxu0 %v6807_v6  ;;  %v36_v55 = vld [vmem:[%s10038_s0 + $0x44] sm:$0xf]  ;;  %v6533_v21 = vcombine.low %v107_v11, %v107_v11  ;;  %v6541_v33 = vcombine.low %v109_v23, %v109_v23  ;;  %v6549_v45 = vcombine.low %v111_v35, %v111_v35  ;;  %vm3463_vm6 = vcmask 1041409  }
  0x22   :  { %6479 = vmatprep.subr.msk.bf16.mxu0 %vm124_vm1, %v6478_v56  ;;  %6468 = vmatmul.mubr.msk.bf16.vlgmr.msra.gmra.mxu1 %vm120_vm2, %v58_v62  ;;  %v6513_v56 = vcombine.low %v102_v46, %v102_v46  ;;  %v68_v60 = vpack.c.bf16 %v36_v55, %v36_v55  ;;  %v69_v62 = vpack.c.bf16 %v37_v57, %v37_v57  ;;  %v47_v55 = vld [vmem:[%s10038_s0 + $0x70] sm:$0xf]  ;;  %vm3465_vm7 = vcmask 1042434  }
  0x23   :  { %641 = vmatpush1.bf16.msra.mxu1 %v621_v1  ;;  %658 = vmatprep.mubr.bf16.mxu1 %v6807_v6  ;;  %v1226_v1 = vsel %vm124_vm1, %v6517_v59, 0  ;;  %v6557_v57 = vcombine.low %v113_v47, %v113_v47  ;;  %v79_v59 = vpack.c.bf16 %v47_v55, %v47_v55  ;;  %vm3467_vm8 = vcmask 1043459  }
  0x24   :  { %6483 = vmatprep.subr.msk.bf16.mxu1 %vm124_vm1, %v6482_v3  ;;  %v1171_v63 = vsel %vm124_vm1, %v6513_v56, 0  ;;  %v6526_v3 = vcombine.high %v105_v61, %v105_v61  ;;  %v114_v56 = vld [vmem:[%s10039_s1 + $0xf8] sm:$0xff]  ;;  %vm3469_vm9 = vcmask 1044484   ;;  %vm3471_vm10 = vcmask 1045509  }
  0x25   :  { %v6562_v61 = vcombine.high %v114_v56, %v114_v56  ;;  %vm3473_vm11 = vcmask 1046534   ;;  %vm3475_vm12 = vcmask 1047559   ;;  %vm6420_vm13 = vcmask 261124  }
  0x26   :  { %vm6421_vm14 = vmor %vm6420_vm13, %vm124_vm1 }
  0x28   :  { %6472 = vmatmul.mubr.msk.bf16.vlgmr.msra.gmra.mxu0 %vm120_vm2, %v59_v0  ;;  %v6522_v0 = vcombine.high %v104_v58, %v104_v58 }
  0x29   :  { %696 = vmatpush1.bf16.msra.mxu0 %v676_v4  ;;  %713 = vmatprep.mubr.bf16.mxu0 %v6807_v6  ;;  %v38_v4 = vld [vmem:[%s10038_s0 + $0x4c] sm:$0xf] }
  0x2a   :  { %6487 = vmatprep.subr.msk.bf16.mxu0 %vm124_vm1, %v6486_v5  ;;  %6476 = vmatmul.mubr.msk.bf16.vlgmr.msra.gmra.mxu1 %vm120_vm2, %v60_v12  ;;  %v6521_v5 = vcombine.low %v104_v58, %v104_v58  ;;  %v70_v10 = vpack.c.bf16 %v38_v4, %v38_v4  ;;  %v71_v12 = vpack.c.bf16 %v39_v7, %v39_v7 }
  0x2b   :  { %751 = vmatpush1.bf16.msra.mxu1 %v731_v15  ;;  %768 = vmatprep.mubr.bf16.mxu1 %v6807_v6  ;;  %v1336_v15 = vsel %vm124_vm1, %v6525_v9, 0  ;;  %v1878_v9 = vld [vmem:[%s10040_s2 + $0x8] sm:$0xff] }
  0x2c   :  { %6491 = vmatprep.subr.msk.bf16.mxu1 %vm124_vm1, %v6490_v16  ;;  %v1281_v13 = vsel %vm124_vm1, %v6521_v5, 0  ;;  %v6534_v16 = vcombine.high %v107_v11, %v107_v11  ;;  %v1877_v11 = vld [vmem:[%s10040_s2] sm:$0xff] }
  0x30   :  { %6480 = vmatmul.mubr.msk.bf16.vlgmr.msra.gmra.mxu0 %vm120_vm2, %v61_v14  ;;  %v6530_v14 = vcombine.high %v106_v8, %v106_v8 }
  0x31   :  { %806 = vmatpush1.bf16.msra.mxu0 %v786_v17  ;;  %823 = vmatprep.mubr.bf16.mxu0 %v6807_v6  ;;  %v40_v17 = vld [vmem:[%s10038_s0 + $0x54] sm:$0xf] }
  0x32   :  { %6495 = vmatprep.subr.msk.bf16.mxu0 %vm124_vm1, %v6494_v18  ;;  %6484 = vmatmul.mubr.msk.bf16.vlgmr.msra.gmra.mxu1 %vm120_vm2, %v62_v24  ;;  %v6529_v18 = vcombine.low %v106_v8, %v106_v8  ;;  %v72_v22 = vpack.c.bf16 %v40_v17, %v40_v17  ;;  %v73_v24 = vpack.c.bf16 %v41_v19, %v41_v19  ;;  %v1879_v8 = vld [vmem:[%s10040_s2 + $0x10] sm:$0x3] }
  0x33   :  { %861 = vmatpush1.bf16.msra.mxu1 %v841_v27  ;;  %878 = vmatprep.mubr.bf16.mxu1 %v6807_v6  ;;  %v1446_v27 = vsel %vm124_vm1, %v6533_v21, 0 }
  0x34   :  { %6499 = vmatprep.subr.msk.bf16.mxu1 %vm124_vm1, %v6498_v28  ;;  %v1391_v25 = vsel %vm124_vm1, %v6529_v18, 0  ;;  %v6542_v28 = vcombine.high %v109_v23, %v109_v23 }
  0x38   :  { %6488 = vmatmul.mubr.msk.bf16.vlgmr.msra.gmra.mxu0 %vm120_vm2, %v63_v26  ;;  %v6538_v26 = vcombine.high %v108_v20, %v108_v20 }
  0x39   :  { %916 = vmatpush1.bf16.msra.mxu0 %v896_v29  ;;  %933 = vmatprep.mubr.bf16.mxu0 %v6807_v6  ;;  %v42_v29 = vld [vmem:[%s10038_s0 + $0x5c] sm:$0xf] }
  0x3a   :  { %6503 = vmatprep.subr.msk.bf16.mxu0 %vm124_vm1, %v6502_v30  ;;  %6492 = vmatmul.mubr.msk.bf16.vlgmr.msra.gmra.mxu1 %vm120_vm2, %v64_v36  ;;  %v6537_v30 = vcombine.low %v108_v20, %v108_v20  ;;  %v74_v34 = vpack.c.bf16 %v42_v29, %v42_v29  ;;  %v75_v36 = vpack.c.bf16 %v43_v31, %v43_v31 }
  0x3b   :  { %971 = vmatpush1.bf16.msra.mxu1 %v951_v39  ;;  %988 = vmatprep.mubr.bf16.mxu1 %v6807_v6  ;;  %v1556_v39 = vsel %vm124_vm1, %v6541_v33, 0 }
  0x3c   :  { %6507 = vmatprep.subr.msk.bf16.mxu1 %vm124_vm1, %v6506_v40  ;;  %v1501_v37 = vsel %vm124_vm1, %v6537_v30, 0  ;;  %v6550_v40 = vcombine.high %v111_v35, %v111_v35 }
  0x40   :  { %6496 = vmatmul.mubr.msk.bf16.vlgmr.msra.gmra.mxu0 %vm120_vm2, %v65_v38  ;;  %v6546_v38 = vcombine.high %v110_v32, %v110_v32 }
  0x41   :  { %1026 = vmatpush1.bf16.msra.mxu0 %v1006_v41  ;;  %1043 = vmatprep.mubr.bf16.mxu0 %v6807_v6  ;;  %v44_v41 = vld [vmem:[%s10038_s0 + $0x64] sm:$0xf] }
  0x42   :  { %6511 = vmatprep.subr.msk.bf16.mxu0 %vm124_vm1, %v6510_v42  ;;  %6500 = vmatmul.mubr.msk.bf16.vlgmr.msra.gmra.mxu1 %vm120_vm2, %v66_v48  ;;  %v6545_v42 = vcombine.low %v110_v32, %v110_v32  ;;  %v76_v46 = vpack.c.bf16 %v44_v41, %v44_v41  ;;  %v77_v48 = vpack.c.bf16 %v45_v43, %v45_v43 }
  0x43   :  { %1081 = vmatpush1.bf16.msra.mxu1 %v1061_v51  ;;  %1098 = vmatprep.mubr.bf16.mxu1 %v6807_v6  ;;  %v1666_v51 = vsel %vm124_vm1, %v6549_v45, 0 }
  0x44   :  { %6515 = vmatprep.subr.msk.bf16.mxu1 %vm124_vm1, %v6514_v52  ;;  %v1611_v49 = vsel %vm124_vm1, %v6545_v42, 0  ;;  %v6558_v52 = vcombine.high %v113_v47, %v113_v47 }
  0x48   :  { %6504 = vmatmul.mubr.msk.bf16.vlgmr.msra.gmra.mxu0 %vm120_vm2, %v67_v50  ;;  %v6554_v50 = vcombine.high %v112_v44, %v112_v44 }
  0x49   :  { %1136 = vmatpush1.bf16.msra.mxu0 %v1116_v53  ;;  %1153 = vmatprep.mubr.bf16.mxu0 %v6807_v6  ;;  %v46_v53 = vld [vmem:[%s10038_s0 + $0x6c] sm:$0xf] }
  0x4a   :  { %6519 = vmatprep.subr.msk.bf16.mxu0 %vm124_vm1, %v6518_v54  ;;  %6508 = vmatmul.mubr.msk.bf16.vlgmr.msra.gmra.mxu1 %vm120_vm2, %v68_v60  ;;  %v6553_v54 = vcombine.low %v112_v44, %v112_v44  ;;  %v78_v58 = vpack.c.bf16 %v46_v53, %v46_v53 }
  0x4b   :  { %1191 = vmatpush1.bf16.msra.mxu1 %v1171_v63  ;;  %1208 = vmatprep.mubr.bf16.mxu1 %v6807_v6  ;;  %v7142_v63 = vld [vmem:[%s10040_s2 + $0x18] sm:$0x3] }
  0x4c   :  { %6523 = vmatprep.subr.msk.bf16.mxu1 %vm124_vm1, %v6522_v0  ;;  %v1721_v60 = vsel %vm124_vm1, %v6553_v54, 0  ;;  %v48_v0 = vld [vmem:[%s10038_s0 + $0x74] sm:$0xf] }
  0x4d   :  { %v80_v4 = vpack.c.bf16 %v48_v0, %v48_v0 }
  0x50   :  { %6512 = vmatmul.mubr.msk.bf16.vlgmr.msra.gmra.mxu0 %vm120_vm2, %v69_v62  ;;  %v1776_v62 = vsel %vm124_vm1, %v6557_v57, 0 }
  0x51   :  { %1246 = vmatpush1.bf16.msra.mxu0 %v1226_v1  ;;  %1263 = vmatprep.mubr.bf16.mxu0 %v6807_v6  ;;  %v6561_v1 = vcombine.low %v114_v56, %v114_v56 }
  0x52   :  { %6527 = vmatprep.subr.msk.bf16.mxu0 %vm124_vm1, %v6526_v3  ;;  %6516 = vmatmul.mubr.msk.bf16.vlgmr.msra.gmra.mxu1 %vm120_vm2, %v70_v10  ;;  %v49_v3 = vld [vmem:[%s10038_s0 + $0x78] sm:$0xf]  ;;  %v50_v10 = vld [vmem:[%s10038_s0 + $0x7c] sm:$0xf] }
  0x53   :  { %1301 = vmatpush1.bf16.msra.mxu1 %v1281_v13  ;;  %1318 = vmatprep.mubr.bf16.mxu1 %v6807_v6  ;;  %v81_v5 = vpack.c.bf16 %v49_v3, %v49_v3  ;;  %v1831_v7 = vsel %vm124_vm1, %v6561_v1, 0 }
  0x54   :  { %6531 = vmatprep.subr.msk.bf16.mxu1 %vm124_vm1, %v6530_v14 }
  0x58   :  { %6520 = vmatmul.mubr.msk.bf16.vlgmr.msra.gmra.mxu0 %vm120_vm2, %v71_v12  ;;  %v82_v12 = vpack.c.bf16 %v50_v10, %v50_v10 }
  0x59   :  { %1356 = vmatpush1.bf16.msra.mxu0 %v1336_v15  ;;  %1373 = vmatprep.mubr.bf16.mxu0 %v6807_v6 }
  0x5a   :  { %6535 = vmatprep.subr.msk.bf16.mxu0 %vm124_vm1, %v6534_v16  ;;  %6524 = vmatmul.mubr.msk.bf16.vlgmr.msra.gmra.mxu1 %vm120_vm2, %v72_v22 }
  0x5b   :  { %1411 = vmatpush1.bf16.msra.mxu1 %v1391_v25  ;;  %1428 = vmatprep.mubr.bf16.mxu1 %v6807_v6 }
  0x5c   :  { %6539 = vmatprep.subr.msk.bf16.mxu1 %vm124_vm1, %v6538_v26 }
  0x60   :  { %6528 = vmatmul.mubr.msk.bf16.vlgmr.msra.gmra.mxu0 %vm120_vm2, %v73_v24 }
  0x61   :  { %1466 = vmatpush1.bf16.msra.mxu0 %v1446_v27  ;;  %1483 = vmatprep.mubr.bf16.mxu0 %v6807_v6 }
  0x62   :  { %6543 = vmatprep.subr.msk.bf16.mxu0 %vm124_vm1, %v6542_v28  ;;  %6532 = vmatmul.mubr.msk.bf16.vlgmr.msra.gmra.mxu1 %vm120_vm2, %v74_v34 }
  0x63   :  { %1521 = vmatpush1.bf16.msra.mxu1 %v1501_v37  ;;  %1538 = vmatprep.mubr.bf16.mxu1 %v6807_v6 }
  0x64   :  { %6547 = vmatprep.subr.msk.bf16.mxu1 %vm124_vm1, %v6546_v38 }
  0x68   :  { %6536 = vmatmul.mubr.msk.bf16.vlgmr.msra.gmra.mxu0 %vm120_vm2, %v75_v36 }
  0x69   :  { %1576 = vmatpush1.bf16.msra.mxu0 %v1556_v39  ;;  %1593 = vmatprep.mubr.bf16.mxu0 %v6807_v6 }
  0x6a   :  { %6551 = vmatprep.subr.msk.bf16.mxu0 %vm124_vm1, %v6550_v40  ;;  %6540 = vmatmul.mubr.msk.bf16.vlgmr.msra.gmra.mxu1 %vm120_vm2, %v76_v46 }
  0x6b   :  { %1631 = vmatpush1.bf16.msra.mxu1 %v1611_v49  ;;  %1648 = vmatprep.mubr.bf16.mxu1 %v6807_v6 }
  0x6c   :  { %6555 = vmatprep.subr.msk.bf16.mxu1 %vm124_vm1, %v6554_v50 }
  0x70   :  { %6544 = vmatmul.mubr.msk.bf16.vlgmr.msra.gmra.mxu0 %vm120_vm2, %v77_v48 }
  0x71   :  { %1686 = vmatpush1.bf16.msra.mxu0 %v1666_v51  ;;  %1703 = vmatprep.mubr.bf16.mxu0 %v6807_v6 }
  0x72   :  { %6559 = vmatprep.subr.msk.bf16.mxu0 %vm124_vm1, %v6558_v52  ;;  %6548 = vmatmul.mubr.msk.bf16.vlgmr.msra.gmra.mxu1 %vm120_vm2, %v78_v58 }
  0x73   :  { %1741 = vmatpush1.bf16.msra.mxu1 %v1721_v60  ;;  %1758 = vmatprep.mubr.bf16.mxu1 %v6807_v6 }
  0x74   :  { %6563 = vmatprep.subr.msk.bf16.mxu1 %vm124_vm1, %v6562_v61 }
  0x78   :  { %6552 = vmatmul.mubr.msk.bf16.vlgmr.msra.gmra.mxu0 %vm120_vm2, %v79_v59 }
  0x79   :  { %1796 = vmatpush1.bf16.msra.mxu0 %v1776_v62  ;;  %1813 = vmatprep.mubr.bf16.mxu0 %v6807_v6 }
  0x7a   :  { %6565 = vmatprep.subr.msk.mxu0 %vm1910_vm3, %v7142_v63  ;;  %6556 = vmatmul.mubr.msk.bf16.vlgmr.msra.gmra.mxu1 %vm120_vm2, %v80_v4 }
  0x7b   :  { %1851 = vmatpush1.bf16.msra.mxu1 %v1831_v7  ;;  %1868 = vmatprep.mubr.bf16.mxu1 %v6807_v6 }
  0x7c   :  { %2731 = vmatprep.subr.mxu1 %v10077_v2 }
  0x80   :  { %6560 = vmatmul.mubr.msk.bf16.vlgmr.msra.gmra.mxu0 %vm120_vm2, %v81_v5 }
  0x81   :  { %6566 = vmatpush1.msk.msra.mxu0 %vm1910_vm3, %v1879_v8  ;;  %1981 = vmatprep.mubr.f32.mxu0 %v10077_v2 }
  0x82   :  { %1947 = vmatprep.subr.mxu0 %v1878_v9  ;;  %6564 = vmatmul.mubr.msk.bf16.vlgmr.msra.gmra.mxu1 %vm120_vm2, %v82_v12 }
  0x83   :  { %1948 = vmatpush1.msra.mxu0 %v1877_v11 }
  0x84   :  { %6572 = vmatprep.subr.msk.mxu0 %vm1910_vm3, %v7142_v63 }
  0x8b   :  { %v1904_v6 = vpop.xlane.xlu0 %1903 }
  0x8c   :  { %6671 = vrcp.f32 %v1904_v6 }
  0x99   :  { %v6672_v13 = vpop.eup %6671 }
  0x9a   :  { %6567 = vmatmul.mubr.msk.f32.vlgmr.msra.gmra.mxu0 %vm1901_vm0, %v6672_v13 }
  0x9b   :  { %1987 = vmatprep.mubr.f32.mxu0 %v10077_v2  ;;  %6573 = vmatpush1.msk.msra.mxu0 %vm1910_vm3, %v1879_v8 }
  0x9c   :  { %2834 = vmatprep.subr.mxu0 %v1878_v9 }
  0x9d   :  { %2835 = vmatpush1.msra.mxu0 %v1877_v11 }
  0x9e   :  { %6568 = vmatmul.mubr.msk.f32.gmra.mxu0 %vm1901_vm0, %v6672_v13  ;;  %3538 = vmatprep.subr.mxu0 %v10077_v2 }
  0x9f   :  { %1993 = vmatprep.mubr.f32.mxu0 %v10077_v2 }
  0xa2   :  { %6569 = vmatmul.mubr.msk.f32.gmra.mxu0 %vm1901_vm0, %v6672_v13 }
  0xa3   :  { %1999 = vmatprep.mubr.f32.mxu0 %v10077_v2 }
  0xa6   :  { %6570 = vmatmul.mubr.msk.f32.gmra.mxu0 %vm1901_vm0, %v6672_v13 }
  0xa7   :  { %2868 = vmatprep.mubr.f32.mxu0 %v10077_v2 }
  0xc8   :  { %v7188_v14 = vpop.f32.mrf.mxu0 }
  0xc9   :  { %10264 = vst [vmem:[#allocation5_spill] sm:$0xff] %v7188_v14 }
  0xca   :  { %v7190_v15 = vpop.f32.mrf.mxu0  ;;  %v7192_v18 = vpop.f32.mrf.mxu1 }
  0xcb   :  { %10265 = vst [vmem:[#allocation6_spill] sm:$0xff] %v7190_v15  ;;  %10266 = vst [vmem:[#allocation7_spill] sm:$0xff] %v7192_v18 }
  0xcc   :  { %v169_v16 = vpop.f32.mrf.mxu0  ;;  %v7196_v20 = vpop.f32.mrf.mxu1 }
  0xcd   :  { %10268 = vst [vmem:[#allocation9_spill] sm:$0xff] %v7196_v20 }
  0xce   :  { %v170_v17 = vpop.f32.mrf.mxu0  ;;  %v224_v22 = vpop.f32.mrf.mxu1 }
  0xd0   :  { %v7194_v19 = vpop.f32.mrf.mxu0  ;;  %v225_v24 = vpop.f32.mrf.mxu1 }
  0xd1   :  { %10267 = vst [vmem:[#allocation8_spill] sm:$0xff] %v7194_v19 }
  0xd2   :  { %v7198_v21 = vpop.f32.mrf.mxu0  ;;  %v7200_v26 = vpop.f32.mrf.mxu1 }
  0xd3   :  { %10269 = vst [vmem:[#allocation10_spill] sm:$0xff] %v7198_v21  ;;  %10270 = vst [vmem:[#allocation11_spill] sm:$0xff] %v7200_v26 }
  0xd4   :  { %v279_v23 = vpop.f32.mrf.mxu0  ;;  %v7204_v28 = vpop.f32.mrf.mxu1 }
  0xd5   :  { %10272 = vst [vmem:[#allocation13_spill] sm:$0xff] %v7204_v28 }
  0xd6   :  { %v280_v25 = vpop.f32.mrf.mxu0  ;;  %v334_v30 = vpop.f32.mrf.mxu1 }
  0xd8   :  { %v7202_v27 = vpop.f32.mrf.mxu0  ;;  %v335_v32 = vpop.f32.mrf.mxu1 }
  0xd9   :  { %10271 = vst [vmem:[#allocation12_spill] sm:$0xff] %v7202_v27 }
  0xda   :  { %v7206_v29 = vpop.f32.mrf.mxu0  ;;  %v7208_v34 = vpop.f32.mrf.mxu1 }
  0xdb   :  { %10273 = vst [vmem:[#allocation14_spill] sm:$0xff] %v7206_v29  ;;  %10274 = vst [vmem:[#allocation15_spill] sm:$0xff] %v7208_v34 }
  0xdc   :  { %v389_v31 = vpop.f32.mrf.mxu0  ;;  %v7212_v36 = vpop.f32.mrf.mxu1 }
  0xdd   :  { %10276 = vst [vmem:[#allocation17_spill] sm:$0xff] %v7212_v36 }
  0xde   :  { %v390_v33 = vpop.f32.mrf.mxu0  ;;  %v444_v38 = vpop.f32.mrf.mxu1 }
  0xe0   :  { %v7210_v35 = vpop.f32.mrf.mxu0  ;;  %v445_v40 = vpop.f32.mrf.mxu1 }
  0xe1   :  { %10275 = vst [vmem:[#allocation16_spill] sm:$0xff] %v7210_v35 }
  0xe2   :  { %v7214_v37 = vpop.f32.mrf.mxu0  ;;  %v7216_v42 = vpop.f32.mrf.mxu1 }
  0xe3   :  { %10277 = vst [vmem:[#allocation18_spill] sm:$0xff] %v7214_v37  ;;  %10278 = vst [vmem:[#allocation19_spill] sm:$0xff] %v7216_v42 }
  0xe4   :  { %v499_v39 = vpop.f32.mrf.mxu0  ;;  %v7220_v44 = vpop.f32.mrf.mxu1 }
  0xe5   :  { %10280 = vst [vmem:[#allocation21_spill] sm:$0xff] %v7220_v44 }
  0xe6   :  { %v500_v41 = vpop.f32.mrf.mxu0  ;;  %v554_v46 = vpop.f32.mrf.mxu1 }
  0xe8   :  { %v7218_v43 = vpop.f32.mrf.mxu0  ;;  %v555_v48 = vpop.f32.mrf.mxu1 }
  0xe9   :  { %10279 = vst [vmem:[#allocation20_spill] sm:$0xff] %v7218_v43 }
  0xea   :  { %v7222_v45 = vpop.f32.mrf.mxu0  ;;  %v7224_v50 = vpop.f32.mrf.mxu1 }
  0xeb   :  { %10281 = vst [vmem:[#allocation22_spill] sm:$0xff] %v7222_v45  ;;  %10282 = vst [vmem:[#allocation23_spill] sm:$0xff] %v7224_v50 }
  0xec   :  { %v609_v47 = vpop.f32.mrf.mxu0  ;;  %v7228_v52 = vpop.f32.mrf.mxu1 }
  0xed   :  { %10284 = vst [vmem:[#allocation25_spill] sm:$0xff] %v7228_v52 }
  0xee   :  { %v610_v49 = vpop.f32.mrf.mxu0  ;;  %v664_v54 = vpop.f32.mrf.mxu1 }
  0xf0   :  { %v7226_v51 = vpop.f32.mrf.mxu0  ;;  %v665_v56 = vpop.f32.mrf.mxu1 }
  0xf1   :  { %10283 = vst [vmem:[#allocation24_spill] sm:$0xff] %v7226_v51 }
  0xf2   :  { %v7230_v53 = vpop.f32.mrf.mxu0  ;;  %v7232_v58 = vpop.f32.mrf.mxu1 }
  0xf3   :  { %10285 = vst [vmem:[#allocation26_spill] sm:$0xff] %v7230_v53  ;;  %10286 = vst [vmem:[#allocation27_spill] sm:$0xff] %v7232_v58 }
  0xf4   :  { %v719_v55 = vpop.f32.mrf.mxu0  ;;  %v7236_v60 = vpop.f32.mrf.mxu1 }
  0xf5   :  { %10288 = vst [vmem:[#allocation29_spill] sm:$0xff] %v7236_v60 }
  0xf6   :  { %v720_v57 = vpop.f32.mrf.mxu0  ;;  %v774_v62 = vpop.f32.mrf.mxu1 }
  0xf8   :  { %v7234_v59 = vpop.f32.mrf.mxu0  ;;  %v775_v1 = vpop.f32.mrf.mxu1 }
  0xf9   :  { %10287 = vst [vmem:[#allocation28_spill] sm:$0xff] %v7234_v59 }
  0xfa   :  { %v7238_v61 = vpop.f32.mrf.mxu0  ;;  %v7240_v4 = vpop.f32.mrf.mxu1 }
  0xfb   :  { %10289 = vst [vmem:[#allocation30_spill] sm:$0xff] %v7238_v61  ;;  %10290 = vst [vmem:[#allocation31_spill] sm:$0xff] %v7240_v4 }
  0xfc   :  { %v829_v0 = vpop.f32.mrf.mxu0  ;;  %v7244_v7 = vpop.f32.mrf.mxu1 }
  0xfd   :  { %10292 = vst [vmem:[#allocation33_spill] sm:$0xff] %v7244_v7 }
  0xfe   :  { %v830_v3 = vpop.f32.mrf.mxu0  ;;  %v884_v9 = vpop.f32.mrf.mxu1 }
 0x100   :  { %v7242_v5 = vpop.f32.mrf.mxu0  ;;  %v885_v11 = vpop.f32.mrf.mxu1 }
 0x101   :  { %10291 = vst [vmem:[#allocation32_spill] sm:$0xff] %v7242_v5 }
 0x102   :  { %v7246_v8 = vpop.f32.mrf.mxu0  ;;  %v7248_v6 = vpop.f32.mrf.mxu1 }
 0x103   :  { %10293 = vst [vmem:[#allocation34_spill] sm:$0xff] %v7246_v8  ;;  %10294 = vst [vmem:[#allocation35_spill] sm:$0xff] %v7248_v6 }
 0x104   :  { %v939_v10 = vpop.f32.mrf.mxu0  ;;  %v7252_v16 = vpop.f32.mrf.mxu1 }
 0x105   :  { %10296 = vst [vmem:[#allocation37_spill] sm:$0xff] %v7252_v16 }
 0x106   :  { %v940_v12 = vpop.f32.mrf.mxu0  ;;  %v994_v22 = vpop.f32.mrf.mxu1 }
 0x108   :  { %v7250_v13 = vpop.f32.mrf.mxu0  ;;  %v995_v24 = vpop.f32.mrf.mxu1 }
 0x109   :  { %10295 = vst [vmem:[#allocation36_spill] sm:$0xff] %v7250_v13 }
 0x10a   :  { %v7254_v17 = vpop.f32.mrf.mxu0  ;;  %v7256_v30 = vpop.f32.mrf.mxu1 }
 0x10b   :  { %10297 = vst [vmem:[#allocation38_spill] sm:$0xff] %v7254_v17  ;;  %10298 = vst [vmem:[#allocation39_spill] sm:$0xff] %v7256_v30 }
 0x10c   :  { %v1049_v23 = vpop.f32.mrf.mxu0  ;;  %v7260_v32 = vpop.f32.mrf.mxu1 }
 0x10d   :  { %10300 = vst [vmem:[#allocation41_spill] sm:$0xff] %v7260_v32 }
 0x10e   :  { %v1050_v25 = vpop.f32.mrf.mxu0  ;;  %v1104_v38 = vpop.f32.mrf.mxu1 }
 0x110   :  { %v7258_v31 = vpop.f32.mrf.mxu0  ;;  %v1105_v40 = vpop.f32.mrf.mxu1 }
 0x111   :  { %10299 = vst [vmem:[#allocation40_spill] sm:$0xff] %v7258_v31 }
 0x112   :  { %v7262_v33 = vpop.f32.mrf.mxu0  ;;  %v7264_v46 = vpop.f32.mrf.mxu1 }
 0x113   :  { %10301 = vst [vmem:[#allocation42_spill] sm:$0xff] %v7262_v33  ;;  %10302 = vst [vmem:[#allocation43_spill] sm:$0xff] %v7264_v46 }
 0x114   :  { %v1159_v39 = vpop.f32.mrf.mxu0  ;;  %v7268_v48 = vpop.f32.mrf.mxu1 }
 0x115   :  { %10304 = vst [vmem:[#allocation45_spill] sm:$0xff] %v7268_v48 }
 0x116   :  { %v1160_v41 = vpop.f32.mrf.mxu0  ;;  %v1214_v54 = vpop.f32.mrf.mxu1 }
 0x118   :  { %v7266_v47 = vpop.f32.mrf.mxu0  ;;  %v1215_v56 = vpop.f32.mrf.mxu1 }
 0x119   :  { %10303 = vst [vmem:[#allocation44_spill] sm:$0xff] %v7266_v47 }
 0x11a   :  { %v7270_v49 = vpop.f32.mrf.mxu0  ;;  %v7272_v62 = vpop.f32.mrf.mxu1 }
 0x11b   :  { %10305 = vst [vmem:[#allocation46_spill] sm:$0xff] %v7270_v49  ;;  %10306 = vst [vmem:[#allocation47_spill] sm:$0xff] %v7272_v62 }
 0x11c   :  { %v1269_v55 = vpop.f32.mrf.mxu0  ;;  %v7276_v1 = vpop.f32.mrf.mxu1 }
 0x11d   :  { %10308 = vst [vmem:[#allocation49_spill] sm:$0xff] %v7276_v1 }
 0x11e   :  { %v1270_v57 = vpop.f32.mrf.mxu0  ;;  %v1324_v9 = vpop.f32.mrf.mxu1 }
 0x120   :  { %v7274_v0 = vpop.f32.mrf.mxu0  ;;  %v1325_v11 = vpop.f32.mrf.mxu1 }
 0x121   :  { %10307 = vst [vmem:[#allocation48_spill] sm:$0xff] %v7274_v0  ;;  %v7304_v11 = vld [vmem:[%s10041_s3 + $0x70] sm:$0xff] }
 0x122   :  { %v7278_v3 = vpop.f32.mrf.mxu0  ;;  %v7280_v22 = vpop.f32.mrf.mxu1  ;;  %10319 = vst [vmem:[#allocation60_spill] sm:$0xff] %v7304_v11 }
 0x123   :  { %10309 = vst [vmem:[#allocation50_spill] sm:$0xff] %v7278_v3  ;;  %10310 = vst [vmem:[#allocation51_spill] sm:$0xff] %v7280_v22 }
 0x124   :  { %v1379_v10 = vpop.f32.mrf.mxu0  ;;  %v7284_v24 = vpop.f32.mrf.mxu1 }
 0x125   :  { %10312 = vst [vmem:[#allocation53_spill] sm:$0xff] %v7284_v24  ;;  %v7299_v10 = vld [vmem:[%s10041_s3 + $0x78] sm:$0xff] }
 0x126   :  { %v1380_v12 = vpop.f32.mrf.mxu0  ;;  %v1434_v38 = vpop.f32.mrf.mxu1  ;;  %10318 = vst [vmem:[#allocation59_spill] sm:$0xff] %v7299_v10  ;;  %2732 = vmatpush1.msra.mxu1 %v7299_v10 }
 0x127   :  { %2733 = vmatprep.subr.mxu1 %v10077_v2 }
 0x128   :  { %v7282_v23 = vpop.f32.mrf.mxu0  ;;  %v1435_v40 = vpop.f32.mrf.mxu1  ;;  %2734 = vmatpush1.msra.mxu1 %v7304_v11 }
 0x129   :  { %10311 = vst [vmem:[#allocation52_spill] sm:$0xff] %v7282_v23  ;;  %2735 = vmatprep.subr.mxu1 %v10077_v2 }
 0x12a   :  { %v7286_v25 = vpop.f32.mrf.mxu0  ;;  %v7288_v54 = vpop.f32.mrf.mxu1 }
 0x12b   :  { %10313 = vst [vmem:[#allocation54_spill] sm:$0xff] %v7286_v25  ;;  %10314 = vst [vmem:[#allocation55_spill] sm:$0xff] %v7288_v54 }
 0x12c   :  { %v1489_v39 = vpop.f32.mrf.mxu0  ;;  %v7292_v56 = vpop.f32.mrf.mxu1 }
 0x12d   :  { %10316 = vst [vmem:[#allocation57_spill] sm:$0xff] %v7292_v56  ;;  %v7311_v39 = vld [vmem:[%s10041_s3 + $0x68] sm:$0xff] }
 0x12e   :  { %v1490_v41 = vpop.f32.mrf.mxu0  ;;  %v1544_v9 = vpop.f32.mrf.mxu1  ;;  %10320 = vst [vmem:[#allocation61_spill] sm:$0xff] %v7311_v39  ;;  %2736 = vmatpush1.msra.mxu1 %v7311_v39  ;;  %v7340_v39 = vld [vmem:[%s10041_s3 + $0x50] sm:$0xff] }
 0x12f   :  { %v7320_v9 = vld [vmem:[%s10041_s3 + $0x60] sm:$0xff]  ;;  %2737 = vmatprep.subr.mxu1 %v10077_v2  ;;  %10327 = vst [vmem:[#allocation68_spill] sm:$0xff] %v7340_v39 }
 0x130   :  { %v7290_v55 = vpop.f32.mrf.mxu0  ;;  %v1545_v38 = vpop.f32.mrf.mxu1  ;;  %10322 = vst [vmem:[#allocation63_spill] sm:$0xff] %v7320_v9  ;;  %2738 = vmatpush1.msra.mxu1 %v7320_v9  ;;  %v7347_v9 = vld [vmem:[%s10041_s3 + $0x48] sm:$0xff] }
 0x131   :  { %10315 = vst [vmem:[#allocation56_spill] sm:$0xff] %v7290_v55  ;;  %2739 = vmatprep.subr.mxu1 %v10077_v2  ;;  %10328 = vst [vmem:[#allocation69_spill] sm:$0xff] %v7347_v9 }
 0x132   :  { %v7294_v57 = vpop.f32.mrf.mxu0  ;;  %v7314_v41 = vpop.f32.mrf.mxu1 }
 0x133   :  { %10317 = vst [vmem:[#allocation58_spill] sm:$0xff] %v7294_v57  ;;  %10321 = vst [vmem:[#allocation62_spill] sm:$0xff] %v7314_v41 }
 0x134   :  { %v1599_v12 = vpop.f32.mrf.mxu0  ;;  %v7325_v38 = vpop.f32.mrf.mxu1 }
 0x135   :  { %10324 = vst [vmem:[#allocation65_spill] sm:$0xff] %v7325_v38 }
 0x136   :  { %v1600_v40 = vpop.f32.mrf.mxu0  ;;  %v1654_v10 = vpop.f32.mrf.mxu1 }
 0x137   :  { %v7331_v40 = vld [vmem:[%s10041_s3 + $0x58] sm:$0xff] }
 0x138   :  { %v7323_v12 = vpop.f32.mrf.mxu0  ;;  %10325 = vst [vmem:[#allocation66_spill] sm:$0xff] %v7331_v40  ;;  %2740 = vmatpush1.msra.mxu1 %v7331_v40  ;;  %v1655_v38 = vpop.f32.mrf.mxu1  ;;  %v7356_v40 = vld [vmem:[%s10041_s3 + $0x40] sm:$0xff] }
 0x139   :  { %10323 = vst [vmem:[#allocation64_spill] sm:$0xff] %v7323_v12  ;;  %2741 = vmatprep.subr.mxu1 %v10077_v2  ;;  %10330 = vst [vmem:[#allocation71_spill] sm:$0xff] %v7356_v40 }
 0x13a   :  { %v7334_v11 = vpop.f32.mrf.mxu0  ;;  %2742 = vmatpush1.msra.mxu1 %v7340_v39 }
 0x13b   :  { %10326 = vst [vmem:[#allocation67_spill] sm:$0xff] %v7334_v11  ;;  %v7350_v11 = vpop.f32.mrf.mxu1  ;;  %2743 = vmatprep.subr.mxu1 %v10077_v2 }
 0x13c   :  { %v1709_v12 = vpop.f32.mrf.mxu0  ;;  %10329 = vst [vmem:[#allocation70_spill] sm:$0xff] %v7350_v11  ;;  %2744 = vmatpush1.msra.mxu1 %v7347_v9  ;;  %v7376_v9 = vld [vmem:[%s10041_s3 + $0x30] sm:$0xff] }
 0x13d   :  { %v7361_v38 = vpop.f32.mrf.mxu1  ;;  %2745 = vmatprep.subr.mxu1 %v10077_v2  ;;  %10335 = vst [vmem:[#allocation76_spill] sm:$0xff] %v7376_v9 }
 0x13e   :  { %v1710_v10 = vpop.f32.mrf.mxu0  ;;  %10332 = vst [vmem:[#allocation73_spill] sm:$0xff] %v7361_v38  ;;  %2746 = vmatpush1.msra.mxu1 %v7356_v40  ;;  %v7383_v40 = vld [vmem:[%s10041_s3 + $0x28] sm:$0xff] }
 0x13f   :  { %v7367_v10 = vld [vmem:[%s10041_s3 + $0x38] sm:$0xff]  ;;  %v1764_v11 = vpop.f32.mrf.mxu1  ;;  %2747 = vmatprep.subr.mxu1 %v10077_v2  ;;  %10336 = vst [vmem:[#allocation77_spill] sm:$0xff] %v7383_v40 }
 0x140   :  { %v7359_v12 = vpop.f32.mrf.mxu0  ;;  %10333 = vst [vmem:[#allocation74_spill] sm:$0xff] %v7367_v10  ;;  %2748 = vmatpush1.msra.mxu1 %v7367_v10  ;;  %v7392_v10 = vld [vmem:[%s10041_s3 + $0x20] sm:$0xff] }
 0x141   :  { %10331 = vst [vmem:[#allocation72_spill] sm:$0xff] %v7359_v12  ;;  %v1765_v12 = vpop.f32.mrf.mxu1  ;;  %2749 = vmatprep.subr.mxu1 %v10077_v2  ;;  %10338 = vst [vmem:[#allocation79_spill] sm:$0xff] %v7392_v10 }
 0x142   :  { %v7370_v39 = vpop.f32.mrf.mxu0  ;;  %2750 = vmatpush1.msra.mxu1 %v7376_v9  ;;  %v7408_v9 = vld [vmem:[%s10041_s3 + $0x10] sm:$0xff] }
 0x143   :  { %10334 = vst [vmem:[#allocation75_spill] sm:$0xff] %v7370_v39  ;;  %v7386_v39 = vpop.f32.mrf.mxu1  ;;  %2751 = vmatprep.subr.mxu1 %v10077_v2  ;;  %10341 = vst [vmem:[#allocation82_spill] sm:$0xff] %v7408_v9 }
 0x144   :  { %v1819_v38 = vpop.f32.mrf.mxu0  ;;  %10337 = vst [vmem:[#allocation78_spill] sm:$0xff] %v7386_v39  ;;  %2752 = vmatpush1.msra.mxu1 %v7383_v40  ;;  %v7443_v39 = vld [vmem:[%s10041_s3 + $0x88] sm:$0xff] }
 0x145   :  { %v7395_v12 = vpop.f32.mrf.mxu1  ;;  %2753 = vmatprep.subr.mxu1 %v10077_v2  ;;  %v7401_v38 = vld [vmem:[%s10041_s3 + $0x18] sm:$0xff]  ;;  %10346 = vst [vmem:[#allocation87_spill] sm:$0xff] %v7443_v39 }
 0x146   :  { %v1820_v11 = vpop.f32.mrf.mxu0  ;;  %10339 = vst [vmem:[#allocation80_spill] sm:$0xff] %v7395_v12  ;;  %10340 = vst [vmem:[#allocation81_spill] sm:$0xff] %v7401_v38  ;;  %2754 = vmatpush1.msra.mxu1 %v7392_v10  ;;  %v7415_v12 = vld [vmem:[%s10041_s3 + $0x8] sm:$0xff]  ;;  %v2019_v10 = vlaneseq }
 0x147   :  { %2755 = vmatprep.subr.mxu1 %v10077_v2  ;;  %v1874_v11 = vpop.f32.mrf.mxu1  ;;  %10342 = vst [vmem:[#allocation83_spill] sm:$0xff] %v7415_v12 }
 0x148   :  { %2756 = vmatpush1.msra.mxu1 %v7401_v38  ;;  %v7422_v11 = vld [vmem:[%s10041_s3] sm:$0xff]  ;;  %v6808_v38 = vmov 1966171168  }
 0x149   :  { %2757 = vmatprep.subr.mxu1 %v10077_v2  ;;  %v1875_v40 = vpop.f32.mrf.mxu1  ;;  %10343 = vst [vmem:[#allocation84_spill] sm:$0xff] %v7422_v11 }
 0x14a   :  { %2758 = vmatpush1.msra.mxu1 %v7408_v9  ;;  %v7429_v40 = vld [vmem:[%s10041_s3 + $0x98] sm:$0xff]  ;;  %v7436_v9 = vld [vmem:[%s10041_s3 + $0x90] sm:$0xff] }
 0x14b   :  { %2759 = vmatprep.subr.mxu1 %v10077_v2  ;;  %10344 = vst [vmem:[#allocation85_spill] sm:$0xff] %v7429_v40  ;;  %10345 = vst [vmem:[#allocation86_spill] sm:$0xff] %v7436_v9 }
 0x14c   :  { %2760 = vmatpush1.msra.mxu1 %v7415_v12  ;;  %v2017_v12 = vunpack.c.l.s4 %v6808_v38 }
 0x14d   :  { %2761 = vmatprep.subr.mxu1 %v10077_v2 }
 0x14e   :  { %2762 = vmatpush1.msra.mxu1 %v7422_v11  ;;  %v7450_v11 = vld [vmem:[%s10041_s3 + $0x80] sm:$0xff]  ;;  %v2018_v38 = vunpack.c.0.s8 %v2017_v12 }
 0x14f   :  { %2787 = vmatprep.subr.mxu1 %v10077_v2  ;;  %10347 = vst [vmem:[#allocation88_spill] sm:$0xff] %v7450_v11 }
 0x150   :  { %2788 = vmatpush2.msra.mxu1 %v7429_v40  ;;  %v2020_v40 = vshrl.u32 %v2019_v10, 7 }
 0x151   :  { %2789 = vmatprep.subr.mxu1 %v10077_v2 }
 0x152   :  { %2790 = vmatpush2.msra.mxu1 %v7436_v9  ;;  %v7457_v9 = vsub.s32 %v2018_v38, %v2020_v40  ;;  %v7464_v23 = vsub.s32 1, %v2020_v40 }
 0x153   :  { %2791 = vmatprep.subr.mxu1 %v10077_v2 }
 0x154   :  { %2792 = vmatpush2.msra.mxu1 %v7443_v39  ;;  %10348 = vst [vmem:[#allocation89_spill] sm:$0xff] %v7457_v9  ;;  %v7461_v39 = vsub.s32 0, %v2020_v40  ;;  %10350 = vst [vmem:[#allocation91_spill] sm:$0xff] %v7464_v23 }
 0x155   :  { %2793 = vmatprep.subr.mxu1 %v10077_v2 }
 0x156   :  { %2794 = vmatpush2.msra.mxu1 %v7450_v11  ;;  %10349 = vst [vmem:[#allocation90_spill] sm:$0xff] %v7461_v39 }
 0x157   :  { %6579 = vmatprep.subr.msk.mxu1 %vm1910_vm3, %v7142_v63 }
 0x15a   :  { %v1983_v41 = vpop.f32.mrf.mxu0 }
 0x15c   :  { %v1985_v57 = vpop.f32.mrf.mxu0 }
 0x15d   :  { %v2014_v55 = vcombine.low %v1983_v41, %v1985_v57  ;;  %v2015_v56 = vcombine.high %v1983_v41, %v1985_v57 }
 0x15e   :  { %v1989_v11 = vpop.f32.mrf.mxu0 }
 0x15f   :  { %v2022_v54 = vrot.slane %v2014_v55, %v7457_v9  ;;  %v2029_v25 = vrot.slane %v2015_v56, %v7457_v9 }
 0x160   :  { %v1991_v22 = vpop.f32.mrf.mxu0 }
 0x161   :  { %v2030_v10 = vcombine.high %v2022_v54, %v2022_v54  ;;  %v2031_v12 = vcombine.high %v2029_v25, %v2029_v25  ;;  %v2038_v2 = vrot.slane %v2022_v54, %v7457_v9  ;;  %v2045_v63 = vrot.slane %v2029_v25, %v7457_v9 }
 0x162   :  { %v2064_v62 = vcombine.low %v1989_v11, %v1991_v22  ;;  %v2065_v48 = vcombine.high %v1989_v11, %v1991_v22 }
 0x163   :  { %v2052_v38 = vrot.slane %v2030_v10, %v7457_v9  ;;  %v2060_v24 = vcombine.high %v2038_v2, %v2038_v2  ;;  %v2217_v57 = vrot.slane %v2038_v2, %v7461_v39  ;;  %v2059_v55 = vrot.slane %v2031_v12, %v7457_v9 }
 0x164   :  { %v2221_v3 = vrot.slane %v2038_v2, %v7464_v23  ;;  %v2061_v0 = vcombine.high %v2045_v63, %v2045_v63  ;;  %v2249_v2 = vrot.slane %v2045_v63, %v7461_v39 }
 0x165   :  { %v2062_v41 = vcombine.high %v2052_v38, %v2052_v38  ;;  %v2225_v56 = vrot.slane %v2052_v38, %v7461_v39  ;;  %v2229_v54 = vrot.slane %v2052_v38, %v7464_v23  ;;  %v2233_v40 = vrot.slane %v2060_v24, %v7461_v39 }
 0x166   :  { %v2237_v25 = vrot.slane %v2060_v24, %v7464_v23  ;;  %v2534_v1 = vmul.f32 %v2217_v57, %v7188_v14  ;;  %v2063_v12 = vcombine.high %v2059_v55, %v2059_v55  ;;  %v2535_v38 = vmul.f32 %v2221_v3, %v7190_v15 }
 0x167   :  { %v2241_v10 = vrot.slane %v2062_v41, %v7461_v39  ;;  %v2245_v49 = vrot.slane %v2062_v41, %v7464_v23  ;;  %v2536_v47 = vmul.f32 %v2225_v56, %v7192_v18  ;;  %v2537_v46 = vmul.f32 %v2229_v54, %v7196_v20 }
 0x168   :  { %v2538_v33 = vmul.f32 %v2233_v40, %v7194_v19  ;;  %v2253_v24 = vrot.slane %v2045_v63, %v7464_v23  ;;  %v2257_v31 = vrot.slane %v2059_v55, %v7461_v39  ;;  %v2261_v57 = vrot.slane %v2059_v55, %v7464_v23 }
 0x169   :  { %v2265_v14 = vrot.slane %v2061_v0, %v7461_v39  ;;  %v2539_v41 = vmul.f32 %v2237_v25, %v7198_v21  ;;  %v2540_v22 = vmul.f32 %v2241_v10, %v7200_v26  ;;  %v2598_v11 = vsel %vm124_vm1, %v2534_v1, 0.0 }
 0x16a   :  { %v2599_v3 = vsel %vm124_vm1, %v2536_v47, 0.0  ;;  %v2269_v56 = vrot.slane %v2061_v0, %v7464_v23  ;;  %v2273_v54 = vrot.slane %v2063_v12, %v7461_v39  ;;  %v2541_v63 = vmul.f32 %v2245_v49, %v7204_v28 }
 0x16b   :  { %v2600_v40 = vadd.f32 %v2599_v3, %v2598_v11  ;;  %v2542_v20 = vmul.f32 %v2249_v2, %v7202_v27  ;;  %v2601_v55 = vsel %vm124_vm1, %v2538_v33, 0.0  ;;  %v2662_v15 = vsel %vm2661_vm4, %v2535_v38, 0.0 }
 0x16c   :  { %v2663_v25 = vsel %vm2661_vm4, %v2537_v46, 0.0  ;;  %v2277_v10 = vrot.slane %v2063_v12, %v7464_v23  ;;  %v2543_v1 = vmul.f32 %v2253_v24, %v7206_v29  ;;  %v2544_v0 = vmul.f32 %v2257_v31, %v7208_v34  ;;  %v7509_v31 = vpop.f32.mrf.mxu0 }
 0x16d   :  { %v2602_v47 = vadd.f32 %v2601_v55, %v2600_v40  ;;  %v2664_v21 = vadd.f32 %v2663_v25, %v2662_v15  ;;  %v2603_v26 = vsel %vm124_vm1, %v2540_v22, 0.0  ;;  %v2665_v49 = vsel %vm2661_vm4, %v2539_v41, 0.0 }
 0x16e   :  { %v2072_v2 = vrot.slane %v2064_v62, %v7457_v9  ;;  %v2545_v33 = vmul.f32 %v2261_v57, %v7212_v36  ;;  %v2079_v46 = vrot.slane %v2065_v48, %v7457_v9  ;;  %v2546_v12 = vmul.f32 %v2265_v14, %v7210_v35 }
 0x16f   :  { %v2604_v11 = vadd.f32 %v2603_v26, %v2602_v47  ;;  %v2666_v38 = vadd.f32 %v2665_v49, %v2664_v21  ;;  %v2605_v24 = vsel %vm124_vm1, %v2542_v20, 0.0  ;;  %v2667_v15 = vsel %vm2661_vm4, %v2541_v63, 0.0  ;;  %v1997_v49 = vpop.f32.mrf.mxu0 }
 0x170   :  { %v2080_v3 = vcombine.high %v2072_v2, %v2072_v2  ;;  %v2081_v41 = vcombine.high %v2079_v46, %v2079_v46  ;;  %v2088_v62 = vrot.slane %v2072_v2, %v7457_v9  ;;  %v2547_v57 = vmul.f32 %v2269_v56, %v7214_v37 }
 0x171   :  { %v2606_v22 = vadd.f32 %v2605_v24, %v2604_v11  ;;  %v2668_v40 = vadd.f32 %v2667_v15, %v2666_v38  ;;  %v2548_v21 = vmul.f32 %v2273_v54, %v7216_v42  ;;  %v2669_v26 = vsel %vm2661_vm4, %v2543_v1, 0.0 }
 0x172   :  { %v2102_v14 = vrot.slane %v2080_v3, %v7457_v9  ;;  %v2549_v20 = vmul.f32 %v2277_v10, %v7220_v44  ;;  %v2607_v48 = vsel %vm124_vm1, %v2544_v0, 0.0  ;;  %v2095_v55 = vrot.slane %v2079_v46, %v7457_v9 }
 0x173   :  { %v2670_v63 = vadd.f32 %v2669_v26, %v2668_v40  ;;  %v2608_v25 = vadd.f32 %v2607_v48, %v2606_v22  ;;  %v2109_v47 = vrot.slane %v2081_v41, %v7457_v9  ;;  %v2671_v2 = vsel %vm2661_vm4, %v2545_v33, 0.0 }
 0x174   :  { %v2110_v56 = vcombine.high %v2088_v62, %v2088_v62  ;;  %v2112_v11 = vcombine.high %v2102_v14, %v2102_v14  ;;  %v2281_v54 = vrot.slane %v2088_v62, %v7461_v39  ;;  %v2609_v1 = vsel %vm124_vm1, %v2546_v12, 0.0 }
 0x175   :  { %v2672_v38 = vadd.f32 %v2671_v2, %v2670_v63  ;;  %v2673_v10 = vsel %vm2661_vm4, %v2547_v57, 0.0  ;;  %v2611_v0 = vsel %vm124_vm1, %v2548_v21, 0.0  ;;  %v2111_v24 = vcombine.high %v2095_v55, %v2095_v55 }
 0x176   :  { %v2289_v46 = vrot.slane %v2102_v14, %v7461_v39  ;;  %v2675_v15 = vsel %vm2661_vm4, %v2549_v20, 0.0  ;;  %v2114_v3 = vcombine.low %v7509_v31, %v1997_v49  ;;  %v2610_v22 = vadd.f32 %v2609_v1, %v2608_v25 }
 0x177   :  { %v2113_v33 = vcombine.high %v2109_v47, %v2109_v47  ;;  %v2285_v40 = vrot.slane %v2088_v62, %v7464_v23  ;;  %v2293_v41 = vrot.slane %v2102_v14, %v7464_v23  ;;  %v2297_v12 = vrot.slane %v2110_v56, %v7461_v39 }
 0x178   :  { %v2301_v26 = vrot.slane %v2110_v56, %v7464_v23  ;;  %v2305_v57 = vrot.slane %v2112_v11, %v7461_v39  ;;  %v2550_v21 = vmul.f32 %v2281_v54, %v7218_v43  ;;  %v2674_v48 = vadd.f32 %v2673_v10, %v2672_v38 }
 0x179   :  { %v2309_v63 = vrot.slane %v2112_v11, %v7464_v23  ;;  %v2313_v20 = vrot.slane %v2095_v55, %v7461_v39  ;;  %v2317_v25 = vrot.slane %v2095_v55, %v7464_v23  ;;  %v2321_v2 = vrot.slane %v2109_v47, %v7461_v39 }
 0x17a   :  { %v2325_v62 = vrot.slane %v2109_v47, %v7464_v23  ;;  %v2329_v14 = vrot.slane %v2111_v24, %v7461_v39  ;;  %v2552_v1 = vmul.f32 %v2289_v46, %v7224_v50  ;;  %v2333_v56 = vrot.slane %v2111_v24, %v7464_v23 }
 0x17b   :  { %v2337_v44 = vrot.slane %v2113_v33, %v7461_v39  ;;  %v2551_v54 = vmul.f32 %v2285_v40, %v7222_v45  ;;  %v2612_v38 = vadd.f32 %v2611_v0, %v2610_v22  ;;  %v2341_v11 = vrot.slane %v2113_v33, %v7464_v23 }
 0x17c   :  { %v2553_v10 = vmul.f32 %v2293_v41, %v7228_v52  ;;  %v2554_v55 = vmul.f32 %v2297_v12, %v7226_v51  ;;  %v2613_v37 = vsel %vm124_vm1, %v2550_v21, 0.0  ;;  %v2555_v47 = vmul.f32 %v2301_v26, %v7230_v53  ;;  %v7557_v26 = vpop.f32.mrf.mxu0 }
 0x17d   :  { %v2556_v36 = vmul.f32 %v2305_v57, %v7232_v58  ;;  %v2557_v46 = vmul.f32 %v2309_v63, %v7236_v60  ;;  %v2614_v24 = vadd.f32 %v2613_v37, %v2612_v38  ;;  %v2558_v29 = vmul.f32 %v2313_v20, %v7234_v59 }
 0x17e   :  { %v2559_v40 = vmul.f32 %v2317_v25, %v7238_v61  ;;  %v2615_v0 = vsel %vm124_vm1, %v2552_v1, 0.0  ;;  %v2676_v22 = vadd.f32 %v2675_v15, %v2674_v48  ;;  %v2560_v33 = vmul.f32 %v2321_v2, %v7240_v4 }
 0x17f   :  { %v2561_v41 = vmul.f32 %v2325_v62, %v7244_v7  ;;  %v2616_v12 = vadd.f32 %v2615_v0, %v2614_v24  ;;  %v2677_v21 = vsel %vm2661_vm4, %v2551_v54, 0.0  ;;  %v2617_v57 = vsel %vm124_vm1, %v2554_v55, 0.0 }
 0x180   :  { %v2678_v63 = vadd.f32 %v2677_v21, %v2676_v22  ;;  %v2115_v37 = vcombine.high %v7509_v31, %v1997_v49  ;;  %v2122_v20 = vrot.slane %v2114_v3, %v7457_v9  ;;  %v2562_v25 = vmul.f32 %v2329_v14, %v7242_v5  ;;  %v7570_v3 = vpop.f32.mrf.mxu0 }
 0x181   :  { %v2563_v15 = vmul.f32 %v2333_v56, %v7246_v8  ;;  %v2618_v48 = vadd.f32 %v2617_v57, %v2616_v12  ;;  %v2679_v2 = vsel %vm2661_vm4, %v2553_v10, 0.0  ;;  %v2619_v62 = vsel %vm124_vm1, %v2556_v36, 0.0 }
 0x182   :  { %v2680_v1 = vadd.f32 %v2679_v2, %v2678_v63  ;;  %v2129_v54 = vrot.slane %v2115_v37, %v7457_v9  ;;  %v2130_v38 = vcombine.high %v2122_v20, %v2122_v20  ;;  %v2564_v55 = vmul.f32 %v2337_v44, %v7248_v6 }
 0x183   :  { %v2620_v24 = vadd.f32 %v2619_v62, %v2618_v48  ;;  %v2681_v31 = vsel %vm2661_vm4, %v2555_v47, 0.0  ;;  %v2138_v49 = vrot.slane %v2122_v20, %v7457_v9  ;;  %v2621_v14 = vsel %vm124_vm1, %v2558_v29, 0.0 }
 0x184   :  { %v2682_v56 = vadd.f32 %v2681_v31, %v2680_v1  ;;  %v2131_v0 = vcombine.high %v2129_v54, %v2129_v54  ;;  %v2152_v10 = vrot.slane %v2130_v38, %v7457_v9  ;;  %v2565_v36 = vmul.f32 %v2341_v11, %v7252_v16  ;;  %v10354_v16 = vld [vmem:[#allocation45_spill] sm:$0xff] }
 0x185   :  { %v2622_v22 = vadd.f32 %v2621_v14, %v2620_v24  ;;  %v2623_v12 = vsel %vm124_vm1, %v2560_v33, 0.0  ;;  %v2683_v44 = vsel %vm2661_vm4, %v2557_v46, 0.0  ;;  %v2625_v21 = vsel %vm124_vm1, %v2562_v25, 0.0 }
 0x186   :  { %v2684_v47 = vadd.f32 %v2683_v44, %v2682_v56  ;;  %v2145_v57 = vrot.slane %v2129_v54, %v7457_v9  ;;  %v2164_v63 = vcombine.low %v7557_v26, %v7570_v3  ;;  %v2685_v29 = vsel %vm2661_vm4, %v2559_v40, 0.0 }
 0x187   :  { %v2687_v37 = vsel %vm2661_vm4, %v2561_v41, 0.0  ;;  %v2159_v20 = vrot.slane %v2131_v0, %v7457_v9  ;;  %v2160_v11 = vcombine.high %v2138_v49, %v2138_v49  ;;  %v2624_v48 = vadd.f32 %v2623_v12, %v2622_v22 }
 0x188   :  { %v2686_v2 = vadd.f32 %v2685_v29, %v2684_v47  ;;  %v2689_v33 = vsel %vm2661_vm4, %v2563_v15, 0.0  ;;  %v2162_v46 = vcombine.high %v2152_v10, %v2152_v10  ;;  %v2345_v25 = vrot.slane %v2138_v49, %v7461_v39 }
 0x189   :  { %v2627_v62 = vsel %vm124_vm1, %v2564_v55, 0.0  ;;  %v2691_v1 = vsel %vm2661_vm4, %v2565_v36, 0.0  ;;  %v2165_v54 = vcombine.high %v7557_v26, %v7570_v3  ;;  %v2161_v38 = vcombine.high %v2145_v57, %v2145_v57 }
 0x18a   :  { %v2688_v40 = vadd.f32 %v2687_v37, %v2686_v2  ;;  %v2349_v41 = vrot.slane %v2138_v49, %v7464_v23  ;;  %v2172_v24 = vrot.slane %v2164_v63, %v7457_v9  ;;  %v2163_v31 = vcombine.high %v2159_v20, %v2159_v20 }
 0x18b   :  { %v2353_v14 = vrot.slane %v2152_v10, %v7461_v39  ;;  %v2357_v15 = vrot.slane %v2152_v10, %v7464_v23  ;;  %v2361_v56 = vrot.slane %v2160_v11, %v7461_v39  ;;  %v2626_v0 = vadd.f32 %v2625_v21, %v2624_v48  ;;  %v10351_v48 = vld [vmem:[#allocation40_spill] sm:$0xff] }
 0x18c   :  { %v2365_v55 = vrot.slane %v2160_v11, %v7464_v23  ;;  %v2369_v36 = vrot.slane %v2162_v46, %v7461_v39  ;;  %v2373_v26 = vrot.slane %v2162_v46, %v7464_v23  ;;  %v2377_v3 = vrot.slane %v2145_v57, %v7461_v39  ;;  %v10352_v46 = vld [vmem:[#allocation42_spill] sm:$0xff] }
 0x18d   :  { %v2381_v49 = vrot.slane %v2145_v57, %v7464_v23  ;;  %v2385_v22 = vrot.slane %v2159_v20, %v7461_v39  ;;  %v2566_v12 = vmul.f32 %v2345_v25, %v7250_v13  ;;  %v2690_v44 = vadd.f32 %v2689_v33, %v2688_v40 }
 0x18e   :  { %v2389_v10 = vrot.slane %v2159_v20, %v7464_v23  ;;  %v2393_v47 = vrot.slane %v2161_v38, %v7461_v39  ;;  %v2397_v21 = vrot.slane %v2161_v38, %v7464_v23  ;;  %v2401_v63 = vrot.slane %v2163_v31, %v7461_v39  ;;  %v10353_v20 = vld [vmem:[#allocation43_spill] sm:$0xff]  ;;  %v10355_v38 = vld [vmem:[#allocation44_spill] sm:$0xff] }
 0x18f   :  { %v2405_v29 = vrot.slane %v2163_v31, %v7464_v23  ;;  %v2567_v37 = vmul.f32 %v2349_v41, %v7254_v17  ;;  %v2568_v11 = vmul.f32 %v2353_v14, %v7256_v30  ;;  %v2569_v57 = vmul.f32 %v2357_v15, %v7260_v32  ;;  %v10356_v31 = vld [vmem:[#allocation46_spill] sm:$0xff]  ;;  %v10357_v41 = vld [vmem:[#allocation47_spill] sm:$0xff]  ;;  %v10358_v15 = vld [vmem:[#allocation49_spill] sm:$0xff] }
 0x190   :  { %v2570_v2 = vmul.f32 %v2361_v56, %v10351_v48  ;;  %v2571_v33 = vmul.f32 %v2365_v55, %v10352_v46  ;;  %v2628_v25 = vadd.f32 %v2627_v62, %v2626_v0  ;;  %v2572_v40 = vmul.f32 %v2369_v36, %v10353_v20  ;;  %v10359_v56 = vld [vmem:[#allocation48_spill] sm:$0xff]  ;;  %v10360_v55 = vld [vmem:[#allocation50_spill] sm:$0xff] }
 0x191   :  { %v2573_v8 = vmul.f32 %v2373_v26, %v10354_v16  ;;  %v2574_v7 = vmul.f32 %v2377_v3, %v10355_v38  ;;  %v2629_v61 = vsel %vm124_vm1, %v2566_v12, 0.0  ;;  %v2575_v60 = vmul.f32 %v2381_v49, %v10356_v31  ;;  %v10373_v31 = vld [vmem:[#allocation70_spill] sm:$0xff] }
 0x192   :  { %v2576_v17 = vmul.f32 %v2385_v22, %v10357_v41  ;;  %v2630_v14 = vadd.f32 %v2629_v61, %v2628_v25  ;;  %v2692_v53 = vadd.f32 %v2691_v1, %v2690_v44  ;;  %v2577_v32 = vmul.f32 %v2389_v10, %v10358_v15  ;;  %v10361_v44 = vld [vmem:[#allocation51_spill] sm:$0xff] }
 0x193   :  { %v2578_v52 = vmul.f32 %v2393_v47, %v10359_v56  ;;  %v2631_v62 = vsel %vm124_vm1, %v2568_v11, 0.0  ;;  %v2693_v0 = vsel %vm2661_vm4, %v2567_v37, 0.0  ;;  %v2579_v36 = vmul.f32 %v2397_v21, %v10360_v55  ;;  %v10362_v47 = vld [vmem:[#allocation53_spill] sm:$0xff]  ;;  %v10371_v55 = vld [vmem:[#allocation64_spill] sm:$0xff] }
 0x194   :  { %v2632_v26 = vadd.f32 %v2631_v62, %v2630_v14  ;;  %v2694_v3 = vadd.f32 %v2693_v0, %v2692_v53  ;;  %v2179_v12 = vrot.slane %v2165_v54, %v7457_v9  ;;  %v2633_v49 = vsel %vm124_vm1, %v2570_v2, 0.0 }
 0x195   :  { %v2695_v22 = vsel %vm2661_vm4, %v2569_v57, 0.0  ;;  %v2180_v61 = vcombine.high %v2172_v24, %v2172_v24  ;;  %v2188_v1 = vrot.slane %v2172_v24, %v7457_v9  ;;  %v2580_v10 = vmul.f32 %v2401_v63, %v10361_v44 }
 0x196   :  { %v2581_v25 = vmul.f32 %v2405_v29, %v10362_v47  ;;  %v2634_v11 = vadd.f32 %v2633_v49, %v2632_v26  ;;  %v2696_v15 = vadd.f32 %v2695_v22, %v2694_v3  ;;  %v2635_v37 = vsel %vm124_vm1, %v2572_v40, 0.0 }
 0x197   :  { %v2637_v21 = vsel %vm124_vm1, %v2574_v7, 0.0  ;;  %v2697_v53 = vsel %vm2661_vm4, %v2571_v33, 0.0  ;;  %v2202_v54 = vrot.slane %v2180_v61, %v7457_v9  ;;  %v2639_v57 = vsel %vm124_vm1, %v2576_v17, 0.0 }
 0x198   :  { %v2636_v2 = vadd.f32 %v2635_v37, %v2634_v11  ;;  %v2698_v14 = vadd.f32 %v2697_v53, %v2696_v15  ;;  %v2181_v62 = vcombine.high %v2179_v12, %v2179_v12  ;;  %v2641_v24 = vsel %vm124_vm1, %v2578_v52, 0.0 }
 0x199   :  { %v2699_v63 = vsel %vm2661_vm4, %v2573_v8, 0.0  ;;  %v2210_v29 = vcombine.high %v2188_v1, %v2188_v1  ;;  %v2409_v0 = vrot.slane %v2188_v1, %v7461_v39  ;;  %v2701_v7 = vsel %vm2661_vm4, %v2575_v60, 0.0  ;;  %v10363_v60 = vld [vmem:[#allocation52_spill] sm:$0xff] }
 0x19a   :  { %v2638_v26 = vadd.f32 %v2637_v21, %v2636_v2  ;;  %v2700_v40 = vadd.f32 %v2699_v63, %v2698_v14  ;;  %v2703_v33 = vsel %vm2661_vm4, %v2577_v32, 0.0  ;;  %v2195_v3 = vrot.slane %v2179_v12, %v7457_v9 }
 0x19b   :  { %v2212_v49 = vcombine.high %v2202_v54, %v2202_v54  ;;  %v2413_v17 = vrot.slane %v2188_v1, %v7464_v23  ;;  %v2417_v15 = vrot.slane %v2202_v54, %v7461_v39  ;;  %v2705_v8 = vsel %vm2661_vm4, %v2579_v36, 0.0  ;;  %v10364_v36 = vld [vmem:[#allocation54_spill] sm:$0xff] }
 0x19c   :  { %v2640_v22 = vadd.f32 %v2639_v57, %v2638_v26  ;;  %v2702_v52 = vadd.f32 %v2701_v7, %v2700_v40  ;;  %v2209_v61 = vrot.slane %v2181_v62, %v7457_v9  ;;  %v2421_v11 = vrot.slane %v2202_v54, %v7464_v23  ;;  %v10365_v62 = vld [vmem:[#allocation55_spill] sm:$0xff]  ;;  %v10368_v9 = vld [vmem:[#allocation58_spill] sm:$0xff] }
 0x19d   :  { %v2425_v37 = vrot.slane %v2210_v29, %v7461_v39  ;;  %v2582_v21 = vmul.f32 %v2409_v0, %v10363_v60  ;;  %v2643_v32 = vsel %vm124_vm1, %v2580_v10, 0.0  ;;  %v2429_v1 = vrot.slane %v2210_v29, %v7464_v23 }
 0x19e   :  { %v2642_v12 = vadd.f32 %v2641_v24, %v2640_v22  ;;  %v2704_v53 = vadd.f32 %v2703_v33, %v2702_v52  ;;  %v2707_v2 = vsel %vm2661_vm4, %v2581_v25, 0.0  ;;  %v2211_v57 = vcombine.high %v2195_v3, %v2195_v3  ;;  %v10366_v24 = vld [vmem:[#allocation57_spill] sm:$0xff]  ;;  %v10367_v22 = vld [vmem:[#allocation56_spill] sm:$0xff] }
 0x19f   :  { %v2433_v14 = vrot.slane %v2212_v49, %v7461_v39  ;;  %v2583_v63 = vmul.f32 %v2413_v17, %v10364_v36  ;;  %v2584_v26 = vmul.f32 %v2417_v15, %v10365_v62  ;;  %v2213_v40 = vcombine.high %v2209_v61, %v2209_v61  ;;  %v10369_v15 = vld [vmem:[#allocation62_spill] sm:$0xff] }
 0x1a0   :  { %v2706_v54 = vadd.f32 %v2705_v8, %v2704_v53  ;;  %v2437_v7 = vrot.slane %v2212_v49, %v7464_v23  ;;  %v2644_v0 = vadd.f32 %v2643_v32, %v2642_v12  ;;  %v2441_v10 = vrot.slane %v2195_v3, %v7461_v39  ;;  %v10370_v12 = vld [vmem:[#allocation65_spill] sm:$0xff] }
 0x1a1   :  { %v2585_v33 = vmul.f32 %v2421_v11, %v10366_v24  ;;  %v2586_v29 = vmul.f32 %v2425_v37, %v10367_v22  ;;  %v2645_v25 = vsel %vm124_vm1, %v2582_v21, 0.0  ;;  %v2445_v52 = vrot.slane %v2195_v3, %v7464_v23 }
 0x1a2   :  { %v2587_v47 = vmul.f32 %v2429_v1, %v10368_v9  ;;  %v2646_v17 = vadd.f32 %v2645_v25, %v2644_v0  ;;  %v2708_v36 = vadd.f32 %v2707_v2, %v2706_v54  ;;  %v2588_v8 = vmul.f32 %v2433_v14, %v10369_v15  ;;  %v10372_v54 = vld [vmem:[#allocation67_spill] sm:$0xff] }
 0x1a3   :  { %v2647_v53 = vsel %vm124_vm1, %v2584_v26, 0.0  ;;  %v2709_v49 = vsel %vm2661_vm4, %v2583_v63, 0.0  ;;  %v2449_v32 = vrot.slane %v2209_v61, %v7461_v39  ;;  %v2457_v11 = vrot.slane %v2211_v57, %v7461_v39 }
 0x1a4   :  { %v2589_v37 = vmul.f32 %v2437_v7, %v10370_v12  ;;  %v2648_v24 = vadd.f32 %v2647_v53, %v2646_v17  ;;  %v2710_v21 = vadd.f32 %v2709_v49, %v2708_v36  ;;  %v2590_v3 = vmul.f32 %v2441_v10, %v10371_v55  ;;  %v10374_v17 = vld [vmem:[#allocation72_spill] sm:$0xff]  ;;  %v10375_v49 = vld [vmem:[#allocation73_spill] sm:$0xff] }
 0x1a5   :  { %v2649_v1 = vsel %vm124_vm1, %v2586_v29, 0.0  ;;  %v2711_v2 = vsel %vm2661_vm4, %v2585_v33, 0.0  ;;  %v2453_v14 = vrot.slane %v2209_v61, %v7464_v23  ;;  %v2461_v26 = vrot.slane %v2211_v57, %v7464_v23 }
 0x1a6   :  { %v2591_v63 = vmul.f32 %v2445_v52, %v10372_v54  ;;  %v2650_v0 = vadd.f32 %v2649_v1, %v2648_v24  ;;  %v2712_v25 = vadd.f32 %v2711_v2, %v2710_v21  ;;  %v2713_v9 = vsel %vm2661_vm4, %v2587_v47, 0.0  ;;  %v10376_v1 = vld [vmem:[#allocation75_spill] sm:$0xff] }
 0x1a7   :  { %v2592_v7 = vmul.f32 %v2449_v32, %v10373_v31  ;;  %v2651_v36 = vsel %vm124_vm1, %v2588_v8, 0.0  ;;  %v2465_v10 = vrot.slane %v2213_v40, %v7461_v39  ;;  %v2594_v29 = vmul.f32 %v2457_v11, %v10374_v17  ;;  %v10377_v39 = vld [vmem:[#allocation78_spill] sm:$0xff] }
 0x1a8   :  { %v2714_v53 = vadd.f32 %v2713_v9, %v2712_v25  ;;  %v2652_v33 = vadd.f32 %v2651_v36, %v2650_v0  ;;  %v2653_v61 = vsel %vm124_vm1, %v2590_v3, 0.0  ;;  %v2593_v57 = vmul.f32 %v2453_v14, %v10375_v49  ;;  %v10378_v25 = vld [vmem:[#allocation80_spill] sm:$0xff] }
 0x1a9   :  { %v2715_v52 = vsel %vm2661_vm4, %v2589_v37, 0.0  ;;  %v2469_v24 = vrot.slane %v2213_v40, %v7464_v23  ;;  %v2595_v32 = vmul.f32 %v2461_v26, %v10376_v1  ;;  %v2717_v8 = vsel %vm2661_vm4, %v2591_v63, 0.0 }
 0x1aa   :  { %v2654_v21 = vadd.f32 %v2653_v61, %v2652_v33  ;;  %v2716_v47 = vadd.f32 %v2715_v52, %v2714_v53  ;;  %v2655_v2 = vsel %vm124_vm1, %v2592_v7, 0.0  ;;  %v2596_v11 = vmul.f32 %v2465_v10, %v10377_v39 }
 0x1ab   :  { %v2719_v3 = vsel %vm2661_vm4, %v2593_v57, 0.0  ;;  %v2597_v14 = vmul.f32 %v2469_v24, %v10378_v25  ;;  %v2657_v37 = vsel %vm124_vm1, %v2594_v29, 0.0  ;;  %v2721_v53 = vsel %vm2661_vm4, %v2595_v32, 0.0  ;;  %v6729_v57 = vld [vmem:[%s10040_s2 + $0x10] sm:$0x3]  ;;  %v6730_v24 = vld [vmem:[%s10040_s2 + $0x8] sm:$0xff] }
 0x1ac   :  { %v2656_v9 = vadd.f32 %v2655_v2, %v2654_v21  ;;  %v2718_v0 = vadd.f32 %v2717_v8, %v2716_v47  ;;  %v2659_v26 = vsel %vm124_vm1, %v2596_v11, 0.0  ;;  %v10379_v52 = vmov 0.0   ;;  %v6731_v21 = vld [vmem:[%s10040_s2] sm:$0xff]  ;;  %v10380_v8 = vld [vmem:[#allocation59_spill] sm:$0xff]  ;;  %v10382_v11 = vld [vmem:[#allocation61_spill] sm:$0xff] }
 0x1ad   :  { %v2723_v7 = vsel %vm2661_vm4, %v2597_v14, 0.0  ;;  %v10381_v2 = vld [vmem:[#allocation60_spill] sm:$0xff]  ;;  %v10386_v14 = vld [vmem:[#allocation69_spill] sm:$0xff] }
 0x1ae   :  { %v2720_v36 = vadd.f32 %v2719_v3, %v2718_v0  ;;  %v2658_v40 = vadd.f32 %v2657_v37, %v2656_v9  ;;  %v10383_v9 = vld [vmem:[#allocation63_spill] sm:$0xff]  ;;  %v10384_v0 = vld [vmem:[#allocation66_spill] sm:$0xff]  ;;  %v10385_v3 = vld [vmem:[#allocation68_spill] sm:$0xff] }
 0x1af   :  { %v10387_v37 = vld [vmem:[#allocation71_spill] sm:$0xff] }
 0x1b0   :  { %v2722_v33 = vadd.f32 %v2721_v53, %v2720_v36  ;;  %v7690_v63 = vadd.f32 %v2659_v26, %v2658_v40  ;;  %v10388_v36 = vld [vmem:[#allocation74_spill] sm:$0xff]  ;;  %v10389_v40 = vld [vmem:[#allocation76_spill] sm:$0xff]  ;;  %v10390_v53 = vld [vmem:[#allocation77_spill] sm:$0xff] }
 0x1b1   :  { %v10391_v26 = vld [vmem:[#allocation79_spill] sm:$0xff] }
 0x1b2   :  { %v7693_v10 = vadd.f32 %v2723_v7, %v2722_v33  ;;  %v2725_v61 = vmul.f32 %v7690_v63, %v7690_v63  ;;  %v10392_v33 = vld [vmem:[#allocation81_spill] sm:$0xff]  ;;  %v10393_v7 = vld [vmem:[#allocation82_spill] sm:$0xff] }
 0x1b4   :  { %v2726_v29 = vmul.f32 %v7693_v10, %v7693_v10 }
 0x1b6   :  { %6571 = vmatprep.mubr.msk.f32.mxu1 %vm2727_vm5, %v2726_v29  ;;  %v10395_v29 = vld [vmem:[#allocation84_spill] sm:$0xff] }
 0x1b7   :  { %2796 = vmatmul.mubr.f32.vlgmr.msra.gmra.mxu1 %v2725_v61  ;;  %v10394_v61 = vld [vmem:[#allocation83_spill] sm:$0xff] }
 0x1b8   :  { %6580 = vmatpush1.msk.msra.mxu1 %vm1910_vm3, %v6729_v57  ;;  %3751 = vmatprep.mubr.f32.mxu1 %v10379_v52  ;;  %v10396_v57 = vld [vmem:[#allocation85_spill] sm:$0xff] }
 0x1b9   :  { %3717 = vmatprep.subr.mxu1 %v6730_v24  ;;  %v10397_v24 = vld [vmem:[#allocation86_spill] sm:$0xff] }
 0x1ba   :  { %3718 = vmatpush1.msra.mxu1 %v6731_v21  ;;  %v10398_v21 = vld [vmem:[#allocation87_spill] sm:$0xff] }
 0x1bb   :  { %4499 = vmatprep.subr.mxu1 %v10379_v52 }
 0x277   :  { %v2797_v47 = vpop.f32.mrf.mxu1 }
 0x278   :  { %6574 = vmatmul.mubr.msk.f32.vlgmr.msra.gmra.mxu0 %vm1901_vm0, %v2797_v47  ;;  %v10399_v47 = vld [vmem:[#allocation88_spill] sm:$0xff] }
 0x279   :  { %v2799_v32 = vpop.f32.mrf.mxu1  ;;  %3539 = vmatpush1.msra.mxu0 %v10380_v8 }
 0x27a   :  { %3540 = vmatprep.subr.mxu0 %v10379_v52  ;;  %v6732_v32 = vld [vmem:[%s10040_s2 + $0x18] sm:$0x3] }
 0x27b   :  { %3541 = vmatpush1.msra.mxu0 %v10381_v2 }
 0x27c   :  { %3542 = vmatprep.subr.mxu0 %v10379_v52 }
 0x27d   :  { %3543 = vmatpush1.msra.mxu0 %v10382_v11 }
 0x27e   :  { %3544 = vmatprep.subr.mxu0 %v10379_v52 }
 0x27f   :  { %3545 = vmatpush1.msra.mxu0 %v10383_v9 }
 0x280   :  { %3546 = vmatprep.subr.mxu0 %v10379_v52 }
 0x281   :  { %3547 = vmatpush1.msra.mxu0 %v10384_v0 }
 0x282   :  { %3548 = vmatprep.subr.mxu0 %v10379_v52 }
 0x283   :  { %3549 = vmatpush1.msra.mxu0 %v10385_v3 }
 0x284   :  { %3550 = vmatprep.subr.mxu0 %v10379_v52 }
 0x285   :  { %3551 = vmatpush1.msra.mxu0 %v10386_v14 }
 0x286   :  { %3552 = vmatprep.subr.mxu0 %v10379_v52 }
 0x287   :  { %3553 = vmatpush1.msra.mxu0 %v10387_v37 }
 0x288   :  { %3554 = vmatprep.subr.mxu0 %v10379_v52 }
 0x289   :  { %3555 = vmatpush1.msra.mxu0 %v10388_v36 }
 0x28a   :  { %3556 = vmatprep.subr.mxu0 %v10379_v52 }
 0x28b   :  { %3557 = vmatpush1.msra.mxu0 %v10389_v40 }
 0x28c   :  { %3558 = vmatprep.subr.mxu0 %v10379_v52 }
 0x28d   :  { %3559 = vmatpush1.msra.mxu0 %v10390_v53 }
 0x28e   :  { %3560 = vmatprep.subr.mxu0 %v10379_v52 }
 0x28f   :  { %3561 = vmatpush1.msra.mxu0 %v10391_v26 }
 0x290   :  { %3562 = vmatprep.subr.mxu0 %v10379_v52 }
 0x291   :  { %3563 = vmatpush1.msra.mxu0 %v10392_v33  ;;  %v10400_v33 = vld [vmem:[#allocation5_spill] sm:$0xff] }
 0x292   :  { %3564 = vmatprep.subr.mxu0 %v10379_v52 }
 0x293   :  { %3565 = vmatpush1.msra.mxu0 %v10393_v7 }
 0x294   :  { %3566 = vmatprep.subr.mxu0 %v10379_v52 }
 0x295   :  { %3567 = vmatpush1.msra.mxu0 %v10394_v61 }
 0x296   :  { %3568 = vmatprep.subr.mxu0 %v10379_v52 }
 0x297   :  { %3569 = vmatpush1.msra.mxu0 %v10395_v29 }
 0x298   :  { %3594 = vmatprep.subr.mxu0 %v10379_v52 }
 0x299   :  { %3595 = vmatpush2.msra.mxu0 %v10396_v57 }
 0x29a   :  { %3596 = vmatprep.subr.mxu0 %v10379_v52 }
 0x29b   :  { %3597 = vmatpush2.msra.mxu0 %v10397_v24  ;;  %v10401_v24 = vld [vmem:[#allocation11_spill] sm:$0xff] }
 0x29c   :  { %3598 = vmatprep.subr.mxu0 %v10379_v52 }
 0x29d   :  { %3599 = vmatpush2.msra.mxu0 %v10398_v21 }
 0x29e   :  { %3600 = vmatprep.subr.mxu0 %v10379_v52 }
 0x29f   :  { %3601 = vmatpush2.msra.mxu0 %v10399_v47 }
 0x2a0   :  { %6586 = vmatprep.subr.msk.mxu0 %vm1910_vm3, %v6732_v32 }
 0x338   :  { %v2870_v8 = vpop.f32.mrf.mxu0 }
 0x339   :  { %v2875_v2 = vadd.f32 1.0, %v2870_v8  ;;  %6673 = vrcp.f32 %v2870_v8 }
 0x33a   :  { %v2872_v11 = vpop.f32.mrf.mxu0 }
 0x33b   :  { %6675 = vrcp.f32 %v2875_v2  ;;  %v2876_v9 = vadd.f32 1.0, %v2872_v11 }
 0x33c   :  { %6677 = vrcp.f32 %v2872_v11 }
 0x33d   :  { %6679 = vrcp.f32 %v2876_v9 }
 0x346   :  { %v6674_v0 = vpop.eup %6673 }
 0x347   :  { %v2882_v36 = vmul.f32 %v6674_v0, %v7690_v63 }
 0x348   :  { %v6676_v3 = vpop.eup %6675 }
 0x349   :  { %v6678_v14 = vpop.eup %6677  ;;  %v2878_v37 = vmul.f32 %v6676_v3, %v2870_v8 }
 0x34a   :  { %v6680_v40 = vpop.eup %6679  ;;  %v2884_v26 = vmul.f32 %v6678_v14, %v7693_v10 }
 0x34b   :  { %v2885_v53 = vmul.f32 %v2882_v36, %v2878_v37  ;;  %v2880_v57 = vmul.f32 %v6680_v40, %v2872_v11 }
 0x34d   :  { %v2887_v7 = vmul.f32 %v2885_v53, %v10400_v33  ;;  %v2889_v61 = vmul.f32 %v2885_v53, %v7192_v18  ;;  %v2891_v29 = vmul.f32 %v2885_v53, %v7194_v19  ;;  %v2893_v21 = vmul.f32 %v2885_v53, %v10401_v24 }
 0x34e   :  { %v2895_v47 = vmul.f32 %v2885_v53, %v7202_v27  ;;  %v2897_v32 = vmul.f32 %v2885_v53, %v7208_v34  ;;  %v2899_v8 = vmul.f32 %v2885_v53, %v7210_v35  ;;  %v7766_v63 = vmul.f32 %v2885_v53, %v7216_v42  ;;  %v10408_v34 = vld [vmem:[#allocation21_spill] sm:$0xff] }
 0x34f   :  { %v7769_v10 = vmul.f32 %v2885_v53, %v7218_v43  ;;  %v7772_v2 = vmul.f32 %v2885_v53, %v7224_v50  ;;  %v7775_v9 = vmul.f32 %v2885_v53, %v7226_v51  ;;  %v7778_v11 = vmul.f32 %v2885_v53, %v7232_v58 }
 0x350   :  { %v7781_v0 = vmul.f32 %v2885_v53, %v7234_v59  ;;  %v7784_v3 = vmul.f32 %v2885_v53, %v7240_v4  ;;  %v7787_v14 = vmul.f32 %v2885_v53, %v7242_v5  ;;  %v7790_v37 = vmul.f32 %v2885_v53, %v7248_v6 }
 0x351   :  { %v7793_v36 = vmul.f32 %v2885_v53, %v7250_v13  ;;  %v7796_v40 = vmul.f32 %v2885_v53, %v7256_v30  ;;  %v7799_v58 = vmul.f32 %v2885_v53, %v10351_v48  ;;  %v7802_v59 = vmul.f32 %v2885_v53, %v10353_v20 }
 0x352   :  { %v7805_v4 = vmul.f32 %v2885_v53, %v10355_v38  ;;  %v7808_v5 = vmul.f32 %v2885_v53, %v10357_v41  ;;  %v7811_v6 = vmul.f32 %v2885_v53, %v10359_v56  ;;  %v7814_v13 = vmul.f32 %v2885_v53, %v10361_v44 }
 0x353   :  { %v7817_v30 = vmul.f32 %v2885_v53, %v10363_v60  ;;  %v7820_v48 = vmul.f32 %v2885_v53, %v10365_v62  ;;  %v7823_v20 = vmul.f32 %v2885_v53, %v10367_v22  ;;  %v7826_v38 = vmul.f32 %v2885_v53, %v10369_v15 }
 0x354   :  { %v7829_v41 = vmul.f32 %v2885_v53, %v10371_v55  ;;  %v7832_v56 = vmul.f32 %v2885_v53, %v10373_v31  ;;  %v7835_v44 = vmul.f32 %v2885_v53, %v10374_v17  ;;  %v7838_v60 = vmul.f32 %v2885_v53, %v10377_v39  ;;  %v10402_v53 = vld [vmem:[#allocation6_spill] sm:$0xff] }
 0x355   :  { %v2886_v62 = vmul.f32 %v2884_v26, %v2880_v57  ;;  %v7841_v51 = vsel %vm124_vm1, %v2887_v7, 0.0  ;;  %v7844_v22 = vsel %vm124_vm1, %v2889_v61, 0.0  ;;  %v7847_v15 = vsel %vm124_vm1, %v2891_v29, 0.0  ;;  %v10403_v57 = vld [vmem:[#allocation9_spill] sm:$0xff]  ;;  %v10404_v39 = vld [vmem:[#allocation10_spill] sm:$0xff] }
 0x356   :  { %v7850_v55 = vsel %vm124_vm1, %v2893_v21, 0.0  ;;  %v7853_v31 = vsel %vm124_vm1, %v2895_v47, 0.0  ;;  %v7856_v17 = vsel %vm124_vm1, %v2897_v32, 0.0  ;;  %v7862_v61 = vsel %vm124_vm1, %v2899_v8, 0.0  ;;  %v10405_v21 = vld [vmem:[#allocation14_spill] sm:$0xff]  ;;  %v10406_v47 = vld [vmem:[#allocation17_spill] sm:$0xff] }
 0x357   :  { %v2888_v26 = vmul.f32 %v2886_v62, %v10402_v53  ;;  %v2890_v7 = vmul.f32 %v2886_v62, %v10403_v57  ;;  %v2892_v50 = vmul.f32 %v2886_v62, %v10404_v39  ;;  %v7865_v29 = vmul.f32 %v2886_v62, %v7204_v28  ;;  %v10407_v32 = vld [vmem:[#allocation18_spill] sm:$0xff]  ;;  %v10409_v8 = vld [vmem:[#allocation25_spill] sm:$0xff] }
 0x358   :  { %v7868_v43 = vmul.f32 %v2886_v62, %v10405_v21  ;;  %v7871_v42 = vmul.f32 %v2886_v62, %v10406_v47  ;;  %v7874_v35 = vmul.f32 %v2886_v62, %v10407_v32  ;;  %v7877_v27 = vmul.f32 %v2886_v62, %v10408_v34  ;;  %v10410_v28 = vld [vmem:[#allocation26_spill] sm:$0xff]  ;;  %v10412_v21 = vld [vmem:[#allocation29_spill] sm:$0xff] }
 0x359   :  { %v7880_v24 = vmul.f32 %v2886_v62, %v7222_v45  ;;  %v7883_v39 = vmul.f32 %v2886_v62, %v10409_v8  ;;  %v7886_v19 = vmul.f32 %v2886_v62, %v10410_v28  ;;  %v7889_v57 = vmul.f32 %v2886_v62, %v10412_v21  ;;  %v10413_v47 = vld [vmem:[#allocation30_spill] sm:$0xff]  ;;  %v10414_v32 = vld [vmem:[#allocation33_spill] sm:$0xff] }
 0x35a   :  { %v7892_v53 = vmul.f32 %v2886_v62, %v10413_v47  ;;  %v7895_v18 = vmul.f32 %v2886_v62, %v10414_v32  ;;  %v10416_v34 = vld [vmem:[#allocation34_spill] sm:$0xff]  ;;  %v10418_v45 = vld [vmem:[#allocation37_spill] sm:$0xff]  ;;  %v7910_v21 = vmul.f32 %v2886_v62, %v10352_v46  ;;  %v7913_v47 = vmul.f32 %v2886_v62, %v10354_v16 }
 0x35b   :  { %10411 = vst [vmem:[#allocation59_spill] sm:$0xff] %v7886_v19  ;;  %v7898_v33 = vmul.f32 %v2886_v62, %v10416_v34  ;;  %v7901_v23 = vmul.f32 %v2886_v62, %v10418_v45  ;;  %v10420_v8 = vld [vmem:[#allocation38_spill] sm:$0xff]  ;;  %v10422_v28 = vld [vmem:[#allocation41_spill] sm:$0xff] }
 0x35c   :  { %10415 = vst [vmem:[#allocation60_spill] sm:$0xff] %v7895_v18  ;;  %v7904_v52 = vmul.f32 %v2886_v62, %v10420_v8  ;;  %v7907_v19 = vmul.f32 %v2886_v62, %v10422_v28  ;;  %10424 = vst [vmem:[#allocation69_spill] sm:$0xff] %v7910_v21  ;;  %v10426_v32 = vld [vmem:[#allocation46_spill] sm:$0xff]  ;;  %v10427_v34 = vld [vmem:[#allocation49_spill] sm:$0xff] }
 0x35d   :  { %10417 = vst [vmem:[#allocation61_spill] sm:$0xff] %v7898_v33  ;;  %10419 = vst [vmem:[#allocation63_spill] sm:$0xff] %v7901_v23  ;;  %v7916_v18 = vmul.f32 %v2886_v62, %v10426_v32  ;;  %v7919_v33 = vmul.f32 %v2886_v62, %v10427_v34  ;;  %v10428_v45 = vld [vmem:[#allocation50_spill] sm:$0xff]  ;;  %v10429_v8 = vld [vmem:[#allocation53_spill] sm:$0xff]  ;;  %v7937_v32 = vmul.f32 %v2886_v62, %v10370_v12  ;;  %v7957_v12 = vsel %vm124_vm1, %v7769_v10, 0.0 }
 0x35e   :  { %10421 = vst [vmem:[#allocation66_spill] sm:$0xff] %v7904_v52  ;;  %10423 = vst [vmem:[#allocation68_spill] sm:$0xff] %v7907_v19  ;;  %v7922_v23 = vmul.f32 %v2886_v62, %v10428_v45  ;;  %v7925_v52 = vmul.f32 %v2886_v62, %v10429_v8  ;;  %v10431_v28 = vld [vmem:[#allocation54_spill] sm:$0xff]  ;;  %v10433_v46 = vld [vmem:[#allocation57_spill] sm:$0xff]  ;;  %v7940_v34 = vmul.f32 %v2886_v62, %v10372_v54  ;;  %v7961_v54 = vsel %vm124_vm1, %v7772_v2, 0.0 }
 0x35f   :  { %10425 = vst [vmem:[#allocation71_spill] sm:$0xff] %v7913_v47  ;;  %v7928_v19 = vmul.f32 %v2886_v62, %v10431_v28  ;;  %v7931_v21 = vmul.f32 %v2886_v62, %v10433_v46  ;;  %v10435_v16 = vld [vmem:[#allocation58_spill] sm:$0xff]  ;;  %10437 = vst [vmem:[#allocation81_spill] sm:$0xff] %v7937_v32  ;;  %v7943_v45 = vmul.f32 %v2886_v62, %v10375_v49  ;;  %v7953_v46 = vsel %vm124_vm1, %v7766_v63, 0.0 }
 0x360   :  { %10430 = vst [vmem:[#allocation74_spill] sm:$0xff] %v7925_v52  ;;  %v7934_v47 = vmul.f32 %v2886_v62, %v10435_v16  ;;  %10438 = vst [vmem:[#allocation82_spill] sm:$0xff] %v7940_v34  ;;  %v7946_v8 = vmul.f32 %v2886_v62, %v10376_v1  ;;  %v7949_v28 = vmul.f32 %v2886_v62, %v10378_v25  ;;  %v7965_v49 = vsel %vm124_vm1, %v7775_v9, 0.0 }
 0x361   :  { %10432 = vst [vmem:[#allocation76_spill] sm:$0xff] %v7928_v19  ;;  %10434 = vst [vmem:[#allocation77_spill] sm:$0xff] %v7931_v21  ;;  %v7969_v62 = vsel %vm124_vm1, %v7778_v11, 0.0  ;;  %v7973_v63 = vsel %vm124_vm1, %v7781_v0, 0.0  ;;  %v7977_v10 = vsel %vm124_vm1, %v7784_v3, 0.0  ;;  %v7981_v2 = vsel %vm124_vm1, %v7787_v14, 0.0 }
 0x362   :  { %10436 = vst [vmem:[#allocation79_spill] sm:$0xff] %v7934_v47  ;;  %10439 = vst [vmem:[#allocation83_spill] sm:$0xff] %v7943_v45  ;;  %v7985_v9 = vsel %vm124_vm1, %v7790_v37, 0.0  ;;  %v7989_v11 = vsel %vm124_vm1, %v7793_v36, 0.0  ;;  %v7993_v0 = vsel %vm124_vm1, %v7796_v40, 0.0  ;;  %v7997_v3 = vsel %vm124_vm1, %v7799_v58, 0.0 }
 0x363   :  { %10440 = vst [vmem:[#allocation84_spill] sm:$0xff] %v7946_v8  ;;  %10441 = vst [vmem:[#allocation85_spill] sm:$0xff] %v7949_v28  ;;  %v8001_v14 = vsel %vm124_vm1, %v7802_v59, 0.0  ;;  %v8005_v37 = vsel %vm124_vm1, %v7805_v4, 0.0  ;;  %v8009_v36 = vsel %vm124_vm1, %v7808_v5, 0.0  ;;  %v8013_v40 = vsel %vm124_vm1, %v7811_v6, 0.0 }
 0x364   :  { %10442 = vst [vmem:[#allocation86_spill] sm:$0xff] %v7985_v9  ;;  %v8017_v58 = vsel %vm124_vm1, %v7814_v13, 0.0  ;;  %v8021_v59 = vsel %vm124_vm1, %v7817_v30, 0.0  ;;  %v8025_v4 = vsel %vm124_vm1, %v7820_v48, 0.0  ;;  %v8029_v5 = vsel %vm124_vm1, %v7823_v20, 0.0 }
 0x365   :  { %10443 = vst [vmem:[#allocation87_spill] sm:$0xff] %v8017_v58  ;;  %10444 = vst [vmem:[#allocation88_spill] sm:$0xff] %v8021_v59  ;;  %v8033_v6 = vsel %vm124_vm1, %v7826_v38, 0.0  ;;  %v8037_v13 = vsel %vm124_vm1, %v7829_v41, 0.0  ;;  %v8041_v30 = vsel %vm124_vm1, %v7832_v56, 0.0  ;;  %v8045_v48 = vsel %vm124_vm1, %v7835_v44, 0.0 }
 0x366   :  { %10445 = vst [vmem:[#allocation92_spill] sm:$0xff] %v8025_v4  ;;  %10446 = vst [vmem:[#allocation93_spill] sm:$0xff] %v8029_v5  ;;  %v2952_v25 = vrot.slane %v7841_v51, 4  ;;  %v2958_v20 = vsel %vm2661_vm4, %v2888_v26, 0.0  ;;  %v2966_v1 = vrot.slane %v7844_v22, 4  ;;  %v2972_v16 = vsel %vm2661_vm4, %v2890_v7, 0.0 }
 0x367   :  { %10447 = vst [vmem:[#allocation94_spill] sm:$0xff] %v8033_v6  ;;  %10448 = vst [vmem:[#allocation95_spill] sm:$0xff] %v8037_v13  ;;  %v2959_v38 = vrot.slane %v2958_v20, 4  ;;  %v2980_v41 = vrot.slane %v7847_v15, 4  ;;  %v2986_v28 = vsel %vm2661_vm4, %v2892_v50, 0.0  ;;  %v2973_v45 = vrot.slane %v2972_v16, 4 }
 0x368   :  { %10449 = vst [vmem:[#allocation96_spill] sm:$0xff] %v8041_v30  ;;  %10450 = vst [vmem:[#allocation97_spill] sm:$0xff] %v8045_v48  ;;  %v2953_v56 = vadd.f32 %v2952_v25, %v7841_v51  ;;  %v2967_v8 = vadd.f32 %v2966_v1, %v7844_v22  ;;  %v2987_v44 = vrot.slane %v2986_v28, 4  ;;  %v2994_v26 = vrot.slane %v7850_v55, 4 }
 0x369   :  { %v2960_v48 = vadd.f32 %v2959_v38, %v2958_v20  ;;  %v2981_v30 = vadd.f32 %v2980_v41, %v7847_v15  ;;  %v3000_v34 = vsel %vm2661_vm4, %v7865_v29, 0.0  ;;  %v2974_v32 = vadd.f32 %v2973_v45, %v2972_v16 }
 0x36a   :  { %v2954_v13 = vrot.slane %v2953_v56, 2  ;;  %v2968_v7 = vrot.slane %v2967_v8, 2  ;;  %v2988_v6 = vadd.f32 %v2987_v44, %v2986_v28  ;;  %v2995_v51 = vadd.f32 %v2994_v26, %v7850_v55 }
 0x36b   :  { %v2961_v47 = vrot.slane %v2960_v48, 2  ;;  %v2982_v50 = vrot.slane %v2981_v30, 2  ;;  %v3001_v25 = vrot.slane %v3000_v34, 4  ;;  %v2975_v5 = vrot.slane %v2974_v32, 2 }
 0x36c   :  { %v2955_v22 = vadd.f32 %v2954_v13, %v2953_v56  ;;  %v2969_v1 = vadd.f32 %v2968_v7, %v2967_v8  ;;  %v2989_v20 = vrot.slane %v2988_v6, 2  ;;  %v2996_v41 = vrot.slane %v2995_v51, 2 }
 0x36d   :  { %v2962_v38 = vadd.f32 %v2961_v47, %v2960_v48  ;;  %v2983_v15 = vadd.f32 %v2982_v50, %v2981_v30  ;;  %v3002_v21 = vadd.f32 %v3001_v25, %v3000_v34  ;;  %v2976_v29 = vadd.f32 %v2975_v5, %v2974_v32 }
 0x36e   :  { %v2956_v4 = vrot.slane %v2955_v22, 1  ;;  %v2970_v19 = vrot.slane %v2969_v1, 1  ;;  %v2990_v59 = vadd.f32 %v2989_v20, %v2988_v6  ;;  %v2997_v28 = vadd.f32 %v2996_v41, %v2995_v51 }
 0x36f   :  { %v2963_v52 = vrot.slane %v2962_v38, 1  ;;  %v2984_v45 = vrot.slane %v2983_v15, 1  ;;  %v3003_v16 = vrot.slane %v3002_v21, 2  ;;  %v8062_v55 = vsel %vm124_vm1, %v7838_v60, 0.0 }
 0x370   :  { %v8064_v13 = vadd.f32 %v2956_v4, %v2955_v22  ;;  %v2977_v8 = vrot.slane %v2976_v29, 1  ;;  %v2991_v56 = vrot.slane %v2990_v59, 1  ;;  %v8068_v30 = vadd.f32 %v2970_v19, %v2969_v1 }
 0x371   :  { %v8066_v47 = vadd.f32 %v2963_v52, %v2962_v38  ;;  %v2998_v34 = vrot.slane %v2997_v28, 1  ;;  %v3004_v48 = vadd.f32 %v3003_v16, %v3002_v21  ;;  %v8072_v5 = vadd.f32 %v2984_v45, %v2983_v15 }
 0x372   :  { %v8070_v32 = vadd.f32 %v2977_v8, %v2976_v29  ;;  %v3008_v6 = vrot.slane %v7853_v31, 4  ;;  %v3014_v60 = vsel %vm2661_vm4, %v7868_v43, 0.0  ;;  %v8077_v44 = vadd.f32 %v2991_v56, %v2990_v59 }
 0x373   :  { %v3005_v4 = vrot.slane %v3004_v48, 1  ;;  %v3015_v26 = vrot.slane %v3014_v60, 4  ;;  %v3022_v52 = vrot.slane %v7856_v17, 4  ;;  %v3028_v21 = vsel %vm2661_vm4, %v7871_v42, 0.0 }
 0x374   :  { %v3009_v19 = vadd.f32 %v3008_v6, %v7853_v31  ;;  %v3036_v7 = vrot.slane %v7862_v61, 4  ;;  %v3042_v50 = vsel %vm2661_vm4, %v7874_v35, 0.0  ;;  %v8086_v51 = vadd.f32 %v2998_v34, %v2997_v28 }
 0x375   :  { %v3016_v25 = vadd.f32 %v3015_v26, %v3014_v60  ;;  %v3023_v43 = vadd.f32 %v3022_v52, %v7856_v17  ;;  %v3029_v59 = vrot.slane %v3028_v21, 4  ;;  %v3043_v20 = vrot.slane %v3042_v50, 4 }
 0x376   :  { %v3010_v22 = vrot.slane %v3009_v19, 2  ;;  %v8090_v1 = vadd.f32 %v3036_v7, %v7862_v61  ;;  %v3050_v31 = vrot.slane %v7953_v46, 4  ;;  %v3056_v41 = vsel %vm2661_vm4, %v7877_v27, 0.0 }
 0x377   :  { %v3017_v38 = vrot.slane %v3016_v25, 2  ;;  %v3024_v42 = vrot.slane %v3023_v43, 2  ;;  %v3030_v15 = vadd.f32 %v3029_v59, %v3028_v21  ;;  %v8095_v35 = vadd.f32 %v3005_v4, %v3004_v48 }
 0x378   :  { %v8097_v29 = vadd.f32 %v3010_v22, %v3009_v19  ;;  %v8100_v45 = vadd.f32 %v3043_v20, %v3042_v50  ;;  %v8107_v8 = vadd.f32 %v3050_v31, %v7953_v46  ;;  %v3057_v34 = vrot.slane %v3056_v41, 4 }
 0x379   :  { %v8102_v28 = vadd.f32 %v3017_v38, %v3016_v25  ;;  %v8104_v61 = vadd.f32 %v3024_v42, %v3023_v43  ;;  %v3031_v16 = vrot.slane %v3030_v15, 2  ;;  %v3064_v27 = vrot.slane %v7957_v12, 4  ;;  %v10451_v25 = vld [vmem:[#allocation59_spill] sm:$0xff] }
 0x37a   :  { %v3070_v48 = vsel %vm2661_vm4, %v7880_v24, 0.0  ;;  %v3078_v46 = vrot.slane %v7961_v54, 4  ;;  %v3084_v19 = vsel %vm2661_vm4, %v7883_v39, 0.0  ;;  %v3092_v21 = vrot.slane %v7965_v49, 4 }
 0x37b   :  { %v8114_v60 = vadd.f32 %v3031_v16, %v3030_v15  ;;  %v3071_v26 = vrot.slane %v3070_v48, 4  ;;  %v3065_v52 = vadd.f32 %v3064_v27, %v7957_v12  ;;  %v3085_v50 = vrot.slane %v3084_v19, 4 }
 0x37c   :  { %v3098_v24 = vsel %vm2661_vm4, %v10451_v25, 0.0  ;;  %v3106_v43 = vrot.slane %v7969_v62, 4  ;;  %v3079_v22 = vadd.f32 %v3078_v46, %v7961_v54  ;;  %v3093_v20 = vadd.f32 %v3092_v21, %v7965_v49 }
 0x37d   :  { %v3072_v7 = vadd.f32 %v3071_v26, %v3070_v48  ;;  %v3066_v59 = vrot.slane %v3065_v52, 2  ;;  %v3099_v12 = vrot.slane %v3098_v24, 4  ;;  %v3086_v38 = vadd.f32 %v3085_v50, %v3084_v19 }
 0x37e   :  { %v3107_v42 = vadd.f32 %v3106_v43, %v7969_v62  ;;  %v3112_v39 = vsel %vm2661_vm4, %v7889_v57, 0.0  ;;  %v3080_v16 = vrot.slane %v3079_v22, 2  ;;  %v3094_v27 = vrot.slane %v3093_v20, 2 }
 0x37f   :  { %v3073_v31 = vrot.slane %v3072_v7, 2  ;;  %v3067_v15 = vadd.f32 %v3066_v59, %v3065_v52  ;;  %v3100_v48 = vadd.f32 %v3099_v12, %v3098_v24  ;;  %v3087_v25 = vrot.slane %v3086_v38, 2 }
 0x380   :  { %v3108_v17 = vrot.slane %v3107_v42, 2  ;;  %v3113_v56 = vrot.slane %v3112_v39, 4  ;;  %v3081_v54 = vadd.f32 %v3080_v16, %v3079_v22  ;;  %v3095_v46 = vadd.f32 %v3094_v27, %v3093_v20 }
 0x381   :  { %v3074_v26 = vadd.f32 %v3073_v31, %v3072_v7  ;;  %v3068_v6 = vrot.slane %v3067_v15, 1  ;;  %v3101_v49 = vrot.slane %v3100_v48, 2  ;;  %v3088_v4 = vadd.f32 %v3087_v25, %v3086_v38 }
 0x382   :  { %v8130_v19 = vadd.f32 %v3108_v17, %v3107_v42  ;;  %v3114_v62 = vadd.f32 %v3113_v56, %v3112_v39  ;;  %v8132_v50 = vadd.f32 %v3057_v34, %v3056_v41  ;;  %v3082_v57 = vrot.slane %v3081_v54, 1 }
 0x383   :  { %v3075_v21 = vrot.slane %v3074_v26, 1  ;;  %v3096_v52 = vrot.slane %v3095_v46, 1  ;;  %v3102_v43 = vadd.f32 %v3101_v49, %v3100_v48  ;;  %v8134_v59 = vadd.f32 %v3068_v6, %v3067_v15  ;;  %v10456_v15 = vld [vmem:[#allocation60_spill] sm:$0xff]  ;;  %v10458_v49 = vld [vmem:[#allocation61_spill] sm:$0xff] }
 0x384   :  { %10452 = vst [vmem:[#allocation59_spill] sm:$0xff] %v8130_v19  ;;  %v3089_v24 = vrot.slane %v3088_v4, 1  ;;  %v3115_v12 = vrot.slane %v3114_v62, 2  ;;  %v8138_v31 = vadd.f32 %v3082_v57, %v3081_v54  ;;  %v3120_v17 = vrot.slane %v7973_v63, 4 }
 0x385   :  { %10453 = vst [vmem:[#allocation98_spill] sm:$0xff] %v8134_v59  ;;  %v8136_v7 = vadd.f32 %v3075_v21, %v3074_v26  ;;  %v3103_v22 = vrot.slane %v3102_v43, 1  ;;  %v8142_v38 = vadd.f32 %v3096_v52, %v3095_v46  ;;  %v3126_v56 = vsel %vm2661_vm4, %v7892_v53, 0.0 }
 0x386   :  { %10454 = vst [vmem:[#allocation99_spill] sm:$0xff] %v8138_v31  ;;  %v3116_v41 = vadd.f32 %v3115_v12, %v3114_v62  ;;  %v3134_v34 = vrot.slane %v7977_v10, 4  ;;  %v8147_v6 = vadd.f32 %v3089_v24, %v3088_v4  ;;  %v3121_v42 = vadd.f32 %v3120_v17, %v7973_v63  ;;  %v10460_v12 = vld [vmem:[#allocation63_spill] sm:$0xff] }
 0x387   :  { %10455 = vst [vmem:[#allocation100_spill] sm:$0xff] %v8142_v38  ;;  %v3127_v39 = vrot.slane %v3126_v56, 4  ;;  %v3140_v16 = vsel %vm2661_vm4, %v10456_v15, 0.0  ;;  %v3148_v25 = vrot.slane %v7981_v2, 4  ;;  %v8156_v54 = vadd.f32 %v3103_v22, %v3102_v43 }
 0x388   :  { %v3117_v27 = vrot.slane %v3116_v41, 1  ;;  %v8153_v48 = vadd.f32 %v3134_v34, %v7977_v10  ;;  %v3141_v26 = vrot.slane %v3140_v16, 4  ;;  %v3122_v53 = vrot.slane %v3121_v42, 2  ;;  %v10461_v34 = vld [vmem:[#allocation66_spill] sm:$0xff] }
 0x389   :  { %v3128_v46 = vadd.f32 %v3127_v39, %v3126_v56  ;;  %v3154_v4 = vsel %vm2661_vm4, %v10458_v49, 0.0  ;;  %v8165_v10 = vadd.f32 %v3148_v25, %v7981_v2  ;;  %v3168_v43 = vsel %vm2661_vm4, %v10460_v12, 0.0  ;;  %v10462_v49 = vld [vmem:[#allocation68_spill] sm:$0xff] }
 0x38a   :  { %10457 = vst [vmem:[#allocation60_spill] sm:$0xff] %v8153_v48  ;;  %v8160_v21 = vadd.f32 %v3117_v27, %v3116_v41  ;;  %v3142_v62 = vadd.f32 %v3141_v26, %v3140_v16  ;;  %v3155_v24 = vrot.slane %v3154_v4, 4  ;;  %v3169_v17 = vrot.slane %v3168_v43, 4 }
 0x38b   :  { %v3129_v52 = vrot.slane %v3128_v46, 2  ;;  %10459 = vst [vmem:[#allocation61_spill] sm:$0xff] %v8165_v10  ;;  %v3176_v56 = vrot.slane %v7989_v11, 4  ;;  %v3182_v41 = vsel %vm2661_vm4, %v10461_v34, 0.0  ;;  %v8172_v39 = vadd.f32 %v3122_v53, %v3121_v42 }
 0x38c   :  { %v3143_v22 = vrot.slane %v3142_v62, 2  ;;  %v3183_v16 = vrot.slane %v3182_v41, 4  ;;  %v3190_v27 = vrot.slane %v7993_v0, 4  ;;  %v8179_v26 = vadd.f32 %v3155_v24, %v3154_v4 }
 0x38d   :  { %v8174_v15 = vadd.f32 %v3129_v52, %v3128_v46  ;;  %v3177_v25 = vadd.f32 %v3176_v56, %v7989_v11  ;;  %v3196_v12 = vsel %vm2661_vm4, %v10462_v49, 0.0  ;;  %v8185_v20 = vadd.f32 %v3169_v17, %v3168_v43  ;;  %v10464_v17 = vld [vmem:[#allocation71_spill] sm:$0xff] }
 0x38e   :  { %v8177_v2 = vadd.f32 %v3143_v22, %v3142_v62  ;;  %v3184_v42 = vadd.f32 %v3183_v16, %v3182_v41  ;;  %v3191_v53 = vadd.f32 %v3190_v27, %v7993_v0  ;;  %v3197_v52 = vrot.slane %v3196_v12, 4  ;;  %v10463_v62 = vld [vmem:[#allocation69_spill] sm:$0xff] }
 0x38f   :  { %v3178_v46 = vrot.slane %v3177_v25, 2  ;;  %v3204_v34 = vrot.slane %v7997_v3, 4  ;;  %v3210_v4 = vsel %vm2661_vm4, %v10463_v62, 0.0  ;;  %v3218_v56 = vrot.slane %v8001_v14, 4 }
 0x390   :  { %v3185_v24 = vrot.slane %v3184_v42, 2  ;;  %v3192_v22 = vrot.slane %v3191_v53, 2  ;;  %v3211_v11 = vrot.slane %v3210_v4, 4  ;;  %v3198_v63 = vadd.f32 %v3197_v52, %v3196_v12 }
 0x391   :  { %v3179_v49 = vadd.f32 %v3178_v46, %v3177_v25  ;;  %v3205_v43 = vadd.f32 %v3204_v34, %v7997_v3  ;;  %v3224_v41 = vsel %vm2661_vm4, %v10464_v17, 0.0  ;;  %v3219_v57 = vadd.f32 %v3218_v56, %v8001_v14  ;;  %v10478_v25 = vld [vmem:[#allocation93_spill] sm:$0xff] }
 0x392   :  { %v3186_v0 = vadd.f32 %v3185_v24, %v3184_v42  ;;  %v3193_v16 = vadd.f32 %v3192_v22, %v3191_v53  ;;  %v3212_v27 = vadd.f32 %v3211_v11, %v3210_v4  ;;  %v3199_v31 = vrot.slane %v3198_v63, 2 }
 0x393   :  { %v3180_v38 = vrot.slane %v3179_v49, 1  ;;  %v3206_v62 = vrot.slane %v3205_v43, 2  ;;  %v3225_v59 = vrot.slane %v3224_v41, 4  ;;  %v3220_v48 = vrot.slane %v3219_v57, 2 }
 0x394   :  { %v3187_v9 = vrot.slane %v3186_v0, 1  ;;  %v3194_v19 = vrot.slane %v3193_v16, 1  ;;  %v3213_v10 = vrot.slane %v3212_v27, 2  ;;  %v3200_v12 = vadd.f32 %v3199_v31, %v3198_v63 }
 0x395   :  { %v3207_v3 = vadd.f32 %v3206_v62, %v3205_v43  ;;  %v3226_v46 = vadd.f32 %v3225_v59, %v3224_v41  ;;  %v8197_v52 = vadd.f32 %v3180_v38, %v3179_v49  ;;  %v8201_v34 = vadd.f32 %v3220_v48, %v3219_v57 }
 0x396   :  { %v8199_v42 = vadd.f32 %v3187_v9, %v3186_v0  ;;  %v3214_v53 = vadd.f32 %v3213_v10, %v3212_v27  ;;  %v3201_v14 = vrot.slane %v3200_v12, 1  ;;  %v3232_v22 = vrot.slane %v8005_v37, 4 }
 0x397   :  { %10465 = vst [vmem:[#allocation63_spill] sm:$0xff] %v8197_v52  ;;  %10466 = vst [vmem:[#allocation66_spill] sm:$0xff] %v8201_v34  ;;  %v3208_v4 = vrot.slane %v3207_v3, 1  ;;  %v3227_v24 = vrot.slane %v3226_v46, 2  ;;  %v8204_v11 = vadd.f32 %v3194_v19, %v3193_v16  ;;  %v3238_v31 = vsel %vm2661_vm4, %v7916_v18, 0.0 }
 0x398   :  { %v3215_v56 = vrot.slane %v3214_v53, 1  ;;  %v3246_v59 = vrot.slane %v8009_v36, 4  ;;  %v8209_v38 = vadd.f32 %v3201_v14, %v3200_v12  ;;  %v3233_v48 = vadd.f32 %v3232_v22, %v8005_v37 }
 0x399   :  { %10467 = vst [vmem:[#allocation68_spill] sm:$0xff] %v8204_v11  ;;  %v3228_v63 = vadd.f32 %v3227_v24, %v3226_v46  ;;  %v8213_v57 = vadd.f32 %v3208_v4, %v3207_v3  ;;  %v3239_v10 = vrot.slane %v3238_v31, 4  ;;  %v3252_v19 = vsel %vm2661_vm4, %v7919_v33, 0.0  ;;  %v10473_v4 = vld [vmem:[#allocation88_spill] sm:$0xff]  ;;  %v10477_v33 = vld [vmem:[#allocation77_spill] sm:$0xff] }
 0x39a   :  { %v8216_v49 = vadd.f32 %v3246_v59, %v8009_v36  ;;  %v8220_v43 = vadd.f32 %v3215_v56, %v3214_v53  ;;  %v3234_v17 = vrot.slane %v3233_v48, 2  ;;  %v3253_v41 = vrot.slane %v3252_v19, 4  ;;  %v10472_v53 = vld [vmem:[#allocation74_spill] sm:$0xff] }
 0x39b   :  { %10468 = vst [vmem:[#allocation69_spill] sm:$0xff] %v8213_v57  ;;  %v3229_v18 = vrot.slane %v3228_v63, 1  ;;  %v3240_v0 = vadd.f32 %v3239_v10, %v3238_v31  ;;  %v3260_v27 = vrot.slane %v8013_v40, 4  ;;  %v3266_v37 = vsel %vm2661_vm4, %v7922_v23, 0.0  ;;  %v10474_v31 = vld [vmem:[#allocation76_spill] sm:$0xff] }
 0x39c   :  { %10469 = vst [vmem:[#allocation71_spill] sm:$0xff] %v8216_v49  ;;  %v8228_v36 = vadd.f32 %v3234_v17, %v3233_v48  ;;  %v3254_v12 = vadd.f32 %v3253_v41, %v3252_v19  ;;  %v3267_v46 = vrot.slane %v3266_v37, 4  ;;  %v3280_v14 = vsel %vm2661_vm4, %v10472_v53, 0.0  ;;  %v10475_v23 = vld [vmem:[#allocation92_spill] sm:$0xff] }
 0x39d   :  { %v8226_v62 = vadd.f32 %v3229_v18, %v3228_v63  ;;  %v3241_v3 = vrot.slane %v3240_v0, 2  ;;  %v3288_v24 = vrot.slane %v10473_v4, 4  ;;  %v3281_v56 = vrot.slane %v3280_v14, 4 }
 0x39e   :  { %10471 = vst [vmem:[#allocation102_spill] sm:$0xff] %v8228_v36  ;;  %v3255_v22 = vrot.slane %v3254_v12, 2  ;;  %v3294_v59 = vsel %vm2661_vm4, %v10474_v31, 0.0  ;;  %v3302_v63 = vrot.slane %v10475_v23, 4  ;;  %v8240_v48 = vadd.f32 %v3260_v27, %v8013_v40 }
 0x39f   :  { %10470 = vst [vmem:[#allocation101_spill] sm:$0xff] %v8226_v62  ;;  %v8237_v10 = vadd.f32 %v3241_v3, %v3240_v0  ;;  %v3289_v19 = vadd.f32 %v3288_v24, %v10473_v4  ;;  %v3295_v18 = vrot.slane %v3294_v59, 4  ;;  %v8245_v41 = vadd.f32 %v3267_v46, %v3266_v37  ;;  %v10479_v24 = vld [vmem:[#allocation79_spill] sm:$0xff]  ;;  %v10483_v62 = vld [vmem:[#allocation82_spill] sm:$0xff] }
 0x3a0   :  { %10476 = vst [vmem:[#allocation74_spill] sm:$0xff] %v8240_v48  ;;  %v8243_v17 = vadd.f32 %v3255_v22, %v3254_v12  ;;  %v3303_v53 = vadd.f32 %v3302_v63, %v10475_v23  ;;  %v3308_v16 = vsel %vm2661_vm4, %v10477_v33, 0.0  ;;  %v8251_v9 = vadd.f32 %v3281_v56, %v3280_v14  ;;  %v10480_v23 = vld [vmem:[#allocation94_spill] sm:$0xff]  ;;  %v10481_v14 = vld [vmem:[#allocation81_spill] sm:$0xff] }
 0x3a1   :  { %v3290_v0 = vrot.slane %v3289_v19, 2  ;;  %v3296_v3 = vadd.f32 %v3295_v18, %v3294_v59  ;;  %v3309_v27 = vrot.slane %v3308_v16, 4  ;;  %v3316_v4 = vrot.slane %v10478_v25, 4 }
 0x3a2   :  { %v3304_v40 = vrot.slane %v3303_v53, 2  ;;  %v3322_v12 = vsel %vm2661_vm4, %v10479_v24, 0.0  ;;  %v3330_v63 = vrot.slane %v10480_v23, 4  ;;  %v3336_v56 = vsel %vm2661_vm4, %v10481_v14, 0.0 }
 0x3a3   :  { %v3291_v37 = vadd.f32 %v3290_v0, %v3289_v19  ;;  %v3297_v46 = vrot.slane %v3296_v3, 2  ;;  %v3323_v22 = vrot.slane %v3322_v12, 4  ;;  %v3310_v33 = vadd.f32 %v3309_v27, %v3308_v16 }
 0x3a4   :  { %v3305_v57 = vadd.f32 %v3304_v40, %v3303_v53  ;;  %v3317_v31 = vadd.f32 %v3316_v4, %v10478_v25  ;;  %v3331_v52 = vadd.f32 %v3330_v63, %v10480_v23  ;;  %v3337_v19 = vrot.slane %v3336_v56, 4 }
 0x3a5   :  { %v3292_v59 = vrot.slane %v3291_v37, 1  ;;  %v3298_v18 = vadd.f32 %v3297_v46, %v3296_v3  ;;  %v3324_v11 = vadd.f32 %v3323_v22, %v3322_v12  ;;  %v3311_v48 = vrot.slane %v3310_v33, 2  ;;  %v10482_v46 = vld [vmem:[#allocation95_spill] sm:$0xff] }
 0x3a6   :  { %v3306_v58 = vrot.slane %v3305_v57, 1  ;;  %v3318_v24 = vrot.slane %v3317_v31, 2  ;;  %v3332_v53 = vrot.slane %v3331_v52, 2  ;;  %v3338_v27 = vadd.f32 %v3337_v19, %v3336_v56 }
 0x3a7   :  { %v3299_v49 = vrot.slane %v3298_v18, 1  ;;  %v3325_v36 = vrot.slane %v3324_v11, 2  ;;  %v8262_v16 = vadd.f32 %v3292_v59, %v3291_v37  ;;  %v3312_v25 = vadd.f32 %v3311_v48, %v3310_v33 }
 0x3a8   :  { %v3319_v40 = vadd.f32 %v3318_v24, %v3317_v31  ;;  %v8264_v4 = vadd.f32 %v3306_v58, %v3305_v57  ;;  %v8266_v12 = vadd.f32 %v3332_v53, %v3331_v52  ;;  %v3344_v22 = vrot.slane %v10482_v46, 4  ;;  %v10484_v57 = vld [vmem:[#allocation96_spill] sm:$0xff]  ;;  %v10486_v53 = vld [vmem:[#allocation97_spill] sm:$0xff] }
 0x3a9   :  { %v3326_v3 = vadd.f32 %v3325_v36, %v3324_v11  ;;  %v3313_v23 = vrot.slane %v3312_v25, 1  ;;  %v3339_v14 = vrot.slane %v3338_v27, 2  ;;  %v3350_v0 = vsel %vm2661_vm4, %v10483_v62, 0.0  ;;  %v10485_v62 = vld [vmem:[#allocation83_spill] sm:$0xff] }
 0x3aa   :  { %v3320_v63 = vrot.slane %v3319_v40, 1  ;;  %v8271_v34 = vadd.f32 %v3299_v49, %v3298_v18  ;;  %v3345_v48 = vadd.f32 %v3344_v22, %v10482_v46  ;;  %v3351_v31 = vrot.slane %v3350_v0, 4  ;;  %v10487_v22 = vld [vmem:[#allocation84_spill] sm:$0xff] }
 0x3ab   :  { %v3327_v37 = vrot.slane %v3326_v3, 1  ;;  %v8274_v58 = vadd.f32 %v3313_v23, %v3312_v25  ;;  %v3340_v11 = vadd.f32 %v3339_v14, %v3338_v27  ;;  %v3358_v36 = vrot.slane %v10484_v57, 4 }
 0x3ac   :  { %v8278_v33 = vadd.f32 %v3320_v63, %v3319_v40  ;;  %v3346_v56 = vrot.slane %v3345_v48, 2  ;;  %v3352_v59 = vadd.f32 %v3351_v31, %v3350_v0  ;;  %v3364_v49 = vsel %vm2661_vm4, %v10485_v62, 0.0 }
 0x3ad   :  { %v3341_v18 = vrot.slane %v3340_v11, 1  ;;  %v8283_v24 = vadd.f32 %v3358_v36, %v10484_v57  ;;  %v3365_v19 = vrot.slane %v3364_v49, 4  ;;  %v3372_v25 = vrot.slane %v10486_v53, 4 }
 0x3ae   :  { %v8286_v27 = vadd.f32 %v3327_v37, %v3326_v3  ;;  %v8288_v46 = vadd.f32 %v3346_v56, %v3345_v48  ;;  %v3353_v40 = vrot.slane %v3352_v59, 2  ;;  %v3378_v0 = vsel %vm2661_vm4, %v10487_v22, 0.0  ;;  %v10488_v48 = vld [vmem:[#allocation85_spill] sm:$0xff] }
 0x3af   :  { %v8292_v23 = vadd.f32 %v3341_v18, %v3340_v11  ;;  %v3366_v14 = vadd.f32 %v3365_v19, %v3364_v49  ;;  %v8299_v3 = vadd.f32 %v3372_v25, %v10486_v53  ;;  %v3379_v37 = vrot.slane %v3378_v0, 4 }
 0x3b0   :  { %v8296_v57 = vadd.f32 %v3353_v40, %v3352_v59  ;;  %v3392_v36 = vsel %vm2661_vm4, %v10488_v48, 0.0  ;;  %v3033_v11 = vrot.slane %v8114_v60, 1  ;;  %v10489_v18 = vrot.slane %v8100_v45, 2 }
 0x3b1   :  { %v3367_v56 = vrot.slane %v3366_v14, 2  ;;  %v3393_v62 = vrot.slane %v3392_v36, 4  ;;  %v10490_v59 = vrot.slane %v8102_v28, 1  ;;  %v3059_v25 = vrot.slane %v8132_v50, 2 }
 0x3b2   :  { %v3046_v49 = vadd.f32 %v10489_v18, %v8100_v45  ;;  %v3477_v40 = vsel %vm3463_vm6, %v8070_v32, %v8066_v47  ;;  %v8317_v48 = vadd.f32 %v3379_v37, %v3378_v0  ;;  %v3034_v18 = vadd.f32 %v3033_v11, %v8114_v60 }
 0x3b3   :  { %v3020_v53 = vadd.f32 %v10490_v59, %v8102_v28  ;;  %v8315_v22 = vadd.f32 %v3367_v56, %v3366_v14  ;;  %v8319_v52 = vadd.f32 %v3393_v62, %v3392_v36  ;;  %v3060_v31 = vadd.f32 %v3059_v25, %v8132_v50 }
 0x3b4   :  { %v3047_v45 = vrot.slane %v3046_v49, 1  ;;  %v3478_v28 = vsel %vm3465_vm7, %v8077_v44, %v3477_v40  ;;  %v10491_v59 = vrot.slane %v8097_v29, 1  ;;  %v3026_v32 = vrot.slane %v8104_v61, 1 }
 0x3b5   :  { %v3479_v47 = vsel %vm3467_vm8, %v8095_v35, %v3478_v28  ;;  %v10492_v0 = vrot.slane %v8090_v1, 2  ;;  %v3061_v60 = vrot.slane %v3060_v31, 1  ;;  %v3052_v37 = vrot.slane %v8107_v8, 2 }
 0x3b6   :  { %v3013_v63 = vadd.f32 %v10491_v59, %v8097_v29  ;;  %v3048_v19 = vadd.f32 %v3047_v45, %v3046_v49  ;;  %v3480_v50 = vsel %vm3469_vm9, %v3020_v53, %v3479_v47  ;;  %v3464_v44 = vsel %vm3463_vm6, %v8068_v30, %v8064_v13 }
 0x3b7   :  { %v3039_v14 = vadd.f32 %v10492_v0, %v8090_v1  ;;  %v3481_v29 = vsel %vm3471_vm10, %v3034_v18, %v3480_v50  ;;  %v3027_v36 = vadd.f32 %v3026_v32, %v8104_v61  ;;  %v3466_v56 = vsel %vm3465_vm7, %v8072_v5, %v3464_v44 }
 0x3b8   :  { %v3062_v62 = vadd.f32 %v3061_v60, %v3060_v31  ;;  %v3482_v1 = vsel %vm3473_vm11, %v3048_v19, %v3481_v29  ;;  %v3053_v11 = vadd.f32 %v3052_v37, %v8107_v8  ;;  %v3468_v49 = vsel %vm3467_vm8, %v8086_v51, %v3466_v56  ;;  %v10497_v37 = vld [vmem:[#allocation61_spill] sm:$0xff]  ;;  %v10498_v29 = vld [vmem:[#allocation59_spill] sm:$0xff] }
 0x3b9   :  { %v3040_v35 = vrot.slane %v3039_v14, 1  ;;  %v3381_v53 = vrot.slane %v8317_v48, 2  ;;  %v3470_v13 = vsel %vm3469_vm9, %v3013_v63, %v3468_v49  ;;  %v3145_v30 = vrot.slane %v8177_v2, 1 }
 0x3ba   :  { %v3483_v61 = vsel %vm3475_vm12, %v3062_v62, %v3482_v1  ;;  %v3054_v40 = vrot.slane %v3053_v11, 1  ;;  %v3472_v5 = vsel %vm3471_vm10, %v3027_v36, %v3470_v13  ;;  %v10493_v31 = vrot.slane %v8179_v26, 2  ;;  %v10500_v1 = vld [vmem:[#allocation86_spill] sm:$0xff]  ;;  %v10503_v13 = vld [vmem:[#allocation99_spill] sm:$0xff] }
 0x3bb   :  { %v3041_v25 = vadd.f32 %v3040_v35, %v3039_v14  ;;  %6575 = vmatprep.mubr.msk.f32.mxu0 %vm2727_vm5, %v3483_v61  ;;  %v10494_v8 = vrot.slane %v8174_v15, 1  ;;  %v3171_v63 = vrot.slane %v8185_v20, 2  ;;  %v3491_v18 = vsel %vm3463_vm6, %v8147_v6, %v8136_v7  ;;  %v10495_v14 = vld [vmem:[#allocation60_spill] sm:$0xff]  ;;  %v6733_v61 = vld [vmem:[%s10040_s2 + $0x10] sm:$0x3] }
 0x3bc   :  { %v3158_v19 = vadd.f32 %v10493_v31, %v8179_v26  ;;  %v3055_v28 = vadd.f32 %v3054_v40, %v3053_v11  ;;  %v3146_v59 = vadd.f32 %v3145_v30, %v8177_v2  ;;  %v3492_v26 = vsel %vm3465_vm7, %v8156_v54, %v3491_v18 }
 0x3bd   :  { %v3474_v51 = vsel %vm3473_vm11, %v3041_v25, %v3472_v5  ;;  %v3132_v45 = vadd.f32 %v10494_v8, %v8174_v15  ;;  %v3172_v32 = vadd.f32 %v3171_v63, %v8185_v20  ;;  %v3493_v0 = vsel %vm3467_vm8, %v8160_v21, %v3492_v26  ;;  %v10502_v25 = vld [vmem:[#allocation98_spill] sm:$0xff]  ;;  %v6734_v8 = vld [vmem:[%s10040_s2 + $0x8] sm:$0xff] }
 0x3be   :  { %v3159_v47 = vrot.slane %v3158_v19, 1  ;;  %v3124_v15 = vrot.slane %v8172_v39, 1  ;;  %v10496_v60 = vrot.slane %v10495_v14, 2  ;;  %v3476_v7 = vsel %vm3475_vm12, %v3055_v28, %v3474_v51 }
 0x3bf   :  { %v3494_v2 = vsel %vm3469_vm9, %v3132_v45, %v3493_v0  ;;  %v3150_v44 = vrot.slane %v10497_v37, 2  ;;  %3603 = vmatmul.mubr.f32.vlgmr.msra.gmra.mxu0 %v3476_v7  ;;  %v3173_v54 = vrot.slane %v3172_v32, 1  ;;  %v10499_v21 = vrot.slane %v10498_v29, 1 }
 0x3c0   :  { %v3137_v50 = vadd.f32 %v10496_v60, %v10495_v14  ;;  %v3160_v6 = vadd.f32 %v3159_v47, %v3158_v19  ;;  %v3495_v20 = vsel %vm3471_vm10, %v3146_v59, %v3494_v2  ;;  %v10501_v11 = vrot.slane %v10500_v1, 4  ;;  %6587 = vmatpush1.msk.msra.mxu0 %vm1910_vm3, %v6733_v61  ;;  %v10504_v19 = vld [vmem:[#allocation100_spill] sm:$0xff] }
 0x3c1   :  { %v3111_v36 = vadd.f32 %v10499_v21, %v10498_v29  ;;  %v3151_v62 = vadd.f32 %v3150_v44, %v10497_v37  ;;  %v3484_v30 = vsel %vm3463_vm6, %v10503_v13, %v10502_v25  ;;  %v3174_v40 = vadd.f32 %v3173_v54, %v3172_v32  ;;  %4602 = vmatprep.subr.mxu0 %v6734_v8  ;;  %v6735_v59 = vld [vmem:[%s10040_s2] sm:$0xff]  ;;  %v10508_v21 = vld [vmem:[#allocation66_spill] sm:$0xff] }
 0x3c2   :  { %v3138_v35 = vrot.slane %v3137_v50, 1  ;;  %v3496_v56 = vsel %vm3473_vm11, %v3160_v6, %v3495_v20  ;;  %v3163_v49 = vadd.f32 %v10501_v11, %v10500_v1  ;;  %v3125_v5 = vadd.f32 %v3124_v15, %v8172_v39  ;;  %4603 = vmatpush1.msra.mxu0 %v6735_v59  ;;  %v10512_v1 = vld [vmem:[#allocation71_spill] sm:$0xff]  ;;  %v10514_v13 = vld [vmem:[#allocation74_spill] sm:$0xff] }
 0x3c3   :  { %v3485_v51 = vsel %vm3465_vm7, %v10504_v19, %v3484_v30  ;;  %v3152_v45 = vrot.slane %v3151_v62, 1  ;;  %v3257_v28 = vrot.slane %v8243_v17, 1  ;;  %v3497_v39 = vsel %vm3475_vm12, %v3174_v40, %v3496_v56  ;;  %v10510_v56 = vld [vmem:[#allocation101_spill] sm:$0xff] }
 0x3c4   :  { %v3139_v31 = vadd.f32 %v3138_v35, %v3137_v50  ;;  %v3164_v63 = vrot.slane %v3163_v49, 2  ;;  %v3486_v18 = vsel %vm3467_vm8, %v3111_v36, %v3485_v51  ;;  %v10505_v26 = vrot.slane %v8245_v41, 2  ;;  %6576 = vmatprep.mubr.msk.f32.mxu0 %vm2727_vm5, %v3497_v39 }
 0x3c5   :  { %v3487_v47 = vsel %vm3469_vm9, %v3125_v5, %v3486_v18  ;;  %v3283_v0 = vrot.slane %v8251_v9, 2  ;;  %v10506_v15 = vmov 0.0   ;;  %v3153_v14 = vadd.f32 %v3152_v45, %v3151_v62  ;;  %v10511_v62 = vld [vmem:[#allocation102_spill] sm:$0xff]  ;;  %v10515_v5 = vld [vmem:[#allocation87_spill] sm:$0xff]  ;;  %v10518_v18 = vld [vmem:[#allocation68_spill] sm:$0xff] }
 0x3c6   :  { %v3270_v32 = vadd.f32 %v10505_v26, %v8245_v41  ;;  %5299 = vmatprep.subr.mxu0 %v10506_v15  ;;  %v3165_v60 = vadd.f32 %v3164_v63, %v3163_v49  ;;  %v3488_v50 = vsel %vm3471_vm10, %v3139_v31, %v3487_v47  ;;  %v10507_v7 = vrot.slane %v8237_v10, 1  ;;  %v10517_v63 = vld [vmem:[#allocation63_spill] sm:$0xff]  ;;  %v10519_v26 = vld [vmem:[#allocation69_spill] sm:$0xff] }
 0x3c7   :  { %v3258_v2 = vadd.f32 %v3257_v28, %v8243_v17  ;;  %v3284_v44 = vadd.f32 %v3283_v0, %v8251_v9  ;;  %v3505_v41 = vsel %vm3463_vm6, %v8209_v38, %v8199_v42  ;;  %v3489_v20 = vsel %vm3473_vm11, %v3153_v14, %v3488_v50 }
 0x3c8   :  { %v3244_v6 = vadd.f32 %v10507_v7, %v8237_v10  ;;  %v3271_v37 = vrot.slane %v3270_v32, 1  ;;  %v3166_v54 = vrot.slane %v3165_v60, 1  ;;  %v3506_v29 = vsel %vm3465_vm7, %v8220_v43, %v3505_v41 }
 0x3c9   :  { %v10509_v36 = vrot.slane %v10508_v21, 1  ;;  %v3285_v10 = vrot.slane %v3284_v44, 1  ;;  %v3507_v17 = vsel %vm3467_vm8, %v10510_v56, %v3506_v29  ;;  %v3236_v9 = vrot.slane %v10511_v62, 1 }
 0x3ca   :  { %v10513_v11 = vrot.slane %v10512_v1, 2  ;;  %v3167_v38 = vadd.f32 %v3166_v54, %v3165_v60  ;;  %v3272_v49 = vadd.f32 %v3271_v37, %v3270_v32  ;;  %v3508_v25 = vsel %vm3469_vm9, %v3244_v6, %v3507_v17 }
 0x3cb   :  { %v3223_v35 = vadd.f32 %v10509_v36, %v10508_v21  ;;  %v3262_v43 = vrot.slane %v10514_v13, 2  ;;  %v3286_v30 = vadd.f32 %v3285_v10, %v3284_v44  ;;  %v3509_v61 = vsel %vm3471_vm10, %v3258_v2, %v3508_v25 }
 0x3cc   :  { %v3249_v42 = vadd.f32 %v10513_v11, %v10512_v1  ;;  %v10516_v31 = vrot.slane %v10515_v5, 4  ;;  %v3490_v51 = vsel %vm3475_vm12, %v3167_v38, %v3489_v20  ;;  %v3510_v8 = vsel %vm3473_vm11, %v3272_v49, %v3509_v61 }
 0x3cd   :  { %v3263_v45 = vadd.f32 %v3262_v43, %v10514_v13  ;;  %v3498_v28 = vsel %vm3463_vm6, %v10518_v18, %v10517_v63  ;;  %3608 = vmatmul.mubr.f32.gmra.mxu0 %v3490_v51  ;;  %v3511_v59 = vsel %vm3475_vm12, %v3286_v30, %v3510_v8  ;;  %v3237_v39 = vadd.f32 %v3236_v9, %v10511_v62 }
 0x3ce   :  { %v3250_v40 = vrot.slane %v3249_v42, 1  ;;  %v3275_v19 = vadd.f32 %v10516_v31, %v10515_v5  ;;  %v3499_v32 = vsel %vm3465_vm7, %v10519_v26, %v3498_v28  ;;  %6577 = vmatprep.mubr.msk.f32.mxu0 %vm2727_vm5, %v3511_v59  ;;  %v3369_v50 = vrot.slane %v8315_v22, 1 }
 0x3cf   :  { %v3264_v14 = vrot.slane %v3263_v45, 1  ;;  %v3500_v60 = vsel %vm3467_vm8, %v3223_v35, %v3499_v32  ;;  %v3382_v2 = vadd.f32 %v3381_v53, %v8317_v48  ;;  %v3395_v37 = vrot.slane %v8319_v52, 2 }
 0x3d0   :  { %v3276_v47 = vrot.slane %v3275_v19, 2  ;;  %v3251_v0 = vadd.f32 %v3250_v40, %v3249_v42  ;;  %v3501_v6 = vsel %vm3469_vm9, %v3237_v39, %v3500_v60  ;;  %v10520_v54 = vrot.slane %v8296_v57, 1 }
 0x3d1   :  { %v3265_v44 = vadd.f32 %v3264_v14, %v3263_v45  ;;  %v3519_v29 = vsel %vm3463_vm6, %v8274_v58, %v8271_v34  ;;  %v3383_v36 = vrot.slane %v3382_v2, 1  ;;  %v3396_v35 = vadd.f32 %v3395_v37, %v8319_v52 }
 0x3d2   :  { %v3277_v7 = vadd.f32 %v3276_v47, %v3275_v19  ;;  %v3502_v41 = vsel %vm3471_vm10, %v3251_v0, %v3501_v6  ;;  %v3356_v20 = vadd.f32 %v10520_v54, %v8296_v57  ;;  %v3520_v48 = vsel %vm3465_vm7, %v8286_v27, %v3519_v29 }
 0x3d3   :  { %v3503_v53 = vsel %vm3473_vm11, %v3265_v44, %v3502_v41  ;;  %v3370_v10 = vadd.f32 %v3369_v50, %v8315_v22  ;;  %v3521_v56 = vsel %vm3467_vm8, %v8292_v23, %v3520_v48  ;;  %v3348_v57 = vrot.slane %v8288_v46, 1 }
 0x3d4   :  { %v3278_v21 = vrot.slane %v3277_v7, 1  ;;  %v3384_v62 = vadd.f32 %v3383_v36, %v3382_v2  ;;  %v3397_v9 = vrot.slane %v3396_v35, 1  ;;  %v3522_v34 = vsel %vm3469_vm9, %v3356_v20, %v3521_v56 }
 0x3d5   :  { %v3523_v58 = vsel %vm3471_vm10, %v3370_v10, %v3522_v34  ;;  %v10521_v52 = vrot.slane %v8283_v24, 2  ;;  %v3374_v1 = vrot.slane %v8299_v3, 2  ;;  %v10522_v42 = vrot.slane %v8062_v55, 4 }
 0x3d6   :  { %v3279_v17 = vadd.f32 %v3278_v21, %v3277_v7  ;;  %v3398_v11 = vadd.f32 %v3397_v9, %v3396_v35  ;;  %v3524_v23 = vsel %vm3473_vm11, %v3384_v62, %v3523_v58  ;;  %v10523_v49 = vrot.slane %v8266_v12, 1 }
 0x3d7   :  { %v3361_v27 = vadd.f32 %v10521_v52, %v8283_v24  ;;  %v3387_v38 = vadd.f32 %v10522_v42, %v8062_v55  ;;  %v3375_v43 = vadd.f32 %v3374_v1, %v8299_v3  ;;  %v3512_v24 = vsel %vm3463_vm6, %v8264_v4, %v8262_v16  ;;  %v8540_v42 = vld [vmem:[%s10041_s3 + $0x70] sm:$0xff] }
 0x3d8   :  { %v3504_v22 = vsel %vm3475_vm12, %v3279_v17, %v3503_v53  ;;  %v3335_v25 = vadd.f32 %v10523_v49, %v8266_v12  ;;  %v3525_v30 = vsel %vm3475_vm12, %v3398_v11, %v3524_v23  ;;  %v3349_v61 = vadd.f32 %v3348_v57, %v8288_v46  ;;  %v8533_v23 = vld [vmem:[%s10041_s3 + $0x78] sm:$0xff]  ;;  %v8547_v49 = vld [vmem:[%s10041_s3 + $0x68] sm:$0xff] }
 0x3d9   :  { %3613 = vmatmul.mubr.f32.gmra.mxu0 %v3504_v22  ;;  %v3362_v13 = vrot.slane %v3361_v27, 1  ;;  %v3388_v40 = vrot.slane %v3387_v38, 2  ;;  %v3513_v55 = vsel %vm3465_vm7, %v8278_v33, %v3512_v24  ;;  %v3376_v31 = vrot.slane %v3375_v43, 1 }
 0x3da   :  { %6578 = vmatprep.mubr.msk.f32.mxu0 %vm2727_vm5, %v3525_v30  ;;  %v3514_v12 = vsel %vm3467_vm8, %v3335_v25, %v3513_v55  ;;  %v8554_v25 = vld [vmem:[%s10041_s3 + $0x60] sm:$0xff]  ;;  %v8568_v30 = vld [vmem:[%s10041_s3 + $0x50] sm:$0xff] }
 0x3db   :  { %v3363_v5 = vadd.f32 %v3362_v13, %v3361_v27  ;;  %v3389_v19 = vadd.f32 %v3388_v40, %v3387_v38  ;;  %v3515_v3 = vsel %vm3469_vm9, %v3349_v61, %v3514_v12  ;;  %v3377_v51 = vadd.f32 %v3376_v31, %v3375_v43  ;;  %v8561_v43 = vld [vmem:[%s10041_s3 + $0x58] sm:$0xff]  ;;  %v8577_v61 = vld [vmem:[%s10041_s3 + $0x48] sm:$0xff]  ;;  %v8584_v55 = vld [vmem:[%s10041_s3 + $0x40] sm:$0xff] }
 0x3dd   :  { %v3516_v16 = vsel %vm3471_vm10, %v3363_v5, %v3515_v3  ;;  %v3390_v4 = vrot.slane %v3389_v19, 1  ;;  %v8591_v5 = vld [vmem:[%s10041_s3 + $0x38] sm:$0xff]  ;;  %v8607_v3 = vld [vmem:[%s10041_s3 + $0x28] sm:$0xff] }
 0x3de   :  { %v3517_v8 = vsel %vm3473_vm11, %v3377_v51, %v3516_v16  ;;  %v8614_v51 = vld [vmem:[%s10041_s3 + $0x20] sm:$0xff]  ;;  %v8621_v16 = vld [vmem:[%s10041_s3 + $0x18] sm:$0xff] }
 0x3df   :  { %v3391_v46 = vadd.f32 %v3390_v4, %v3389_v19  ;;  %v8598_v19 = vld [vmem:[%s10041_s3 + $0x30] sm:$0xff] }
 0x3e1   :  { %v3518_v45 = vsel %vm3475_vm12, %v3391_v46, %v3517_v8  ;;  %v8628_v8 = vld [vmem:[%s10041_s3 + $0x10] sm:$0xff] }
 0x3e2   :  { %3618 = vmatmul.mubr.f32.gmra.mxu0 %v3518_v45  ;;  %v8636_v45 = vld [vmem:[%s10041_s3 + $0x8] sm:$0xff] }
 0x3e3   :  { %4636 = vmatprep.mubr.f32.mxu0 %v10506_v15 }
 0x47f   :  { %v3604_v33 = vpop.f32.mrf.mxu0 }
 0x480   :  { %v8501_v63 = vmul.f32 0.25, %v3604_v33  ;;  %v8644_v33 = vld [vmem:[%s10041_s3] sm:$0xff] }
 0x481   :  { %v3606_v18 = vpop.f32.mrf.mxu0 }
 0x482   :  { %10524 = vst [vmem:[#allocation88_spill] sm:$0xff] %v8501_v63  ;;  %v3631_v28 = vsel %vm1901_vm0, %v8501_v63, -inf  ;;  %v8651_v18 = vld [vmem:[%s10041_s3 + $0x98] sm:$0xff] }
 0x483   :  { %3632 = vmax.xlane.f32.xlu0 %v3631_v28  ;;  %v8658_v28 = vld [vmem:[%s10041_s3 + $0x90] sm:$0xff] }
 0x48d   :  { %v3609_v59 = vpop.f32.mrf.mxu0 }
 0x48e   :  { %v8505_v39 = vmul.f32 0.25, %v3609_v59  ;;  %v8665_v59 = vld [vmem:[%s10041_s3 + $0x88] sm:$0xff] }
 0x48f   :  { %v3611_v47 = vpop.f32.mrf.mxu0 }
 0x490   :  { %10525 = vst [vmem:[#allocation76_spill] sm:$0xff] %v8505_v39  ;;  %v3634_v26 = vsel %vm1901_vm0, %v8505_v39, -inf  ;;  %v8672_v47 = vld [vmem:[%s10041_s3 + $0x80] sm:$0xff] }
 0x491   :  { %3635 = vmax.xlane.f32.xlu1 %v3634_v26  ;;  %v6756_v26 = vld [vmem:[%s10040_s2 + $0x18] sm:$0x3] }
 0x499   :  { %v3614_v32 = vpop.f32.mrf.mxu0 }
 0x49a   :  { %v8509_v0 = vmul.f32 0.25, %v3614_v32 }
 0x49b   :  { %v3616_v14 = vpop.f32.mrf.mxu0 }
 0x49c   :  { %10526 = vst [vmem:[#allocation92_spill] sm:$0xff] %v8509_v0  ;;  %v3637_v60 = vsel %vm1901_vm0, %v8509_v0, -inf }
 0x49d   :  { %3638 = vmax.xlane.f32.xlu1 %v3637_v60 }
 0x4a2   :  { %v3619_v50 = vpop.f32.mrf.mxu0 }
 0x4a3   :  { %v8513_v7 = vmul.f32 0.25, %v3619_v50 }
 0x4a4   :  { %v3621_v6 = vpop.f32.mrf.mxu0 }
 0x4a5   :  { %10527 = vst [vmem:[#allocation77_spill] sm:$0xff] %v8513_v7  ;;  %v3640_v2 = vsel %vm1901_vm0, %v8513_v7, -inf  ;;  %v10528_v6 = vld [vmem:[#allocation89_spill] sm:$0xff] }
 0x4a6   :  { %3641 = vmax.xlane.f32.xlu0 %v3640_v2 }
 0x50c   :  { %v3633_v37 = vpop.xlane.xlu0 %3632 }
 0x50d   :  { %v3643_v44 = vsub.f32 %v8501_v63, %v3633_v37 }
 0x50f   :  { %v3647_v41 = vmul.f32 1.442695, %v3643_v44 }
 0x511   :  { %6681 = vpow2.f32 %v3647_v41 }
 0x51a   :  { %v3636_v54 = vpop.xlane.xlu1 %3635 }
 0x51b   :  { %v3644_v20 = vsub.f32 %v8505_v39, %v3636_v54  ;;  %v10543_v39 = vld [vmem:[#allocation16_spill] sm:$0xff] }
 0x51d   :  { %v3649_v29 = vmul.f32 1.442695, %v3644_v20 }
 0x51e   :  { %v6682_v21 = vpop.eup %6681 }
 0x51f   :  { %6683 = vpow2.f32 %v3649_v29  ;;  %v3655_v36 = vsel %vm1901_vm0, %v6682_v21, 0.0  ;;  %v10529_v29 = vld [vmem:[#allocation90_spill] sm:$0xff] }
 0x520   :  { %3656 = vadd.xlane.f32.xlu1 %v3655_v36 }
 0x526   :  { %v3639_v35 = vpop.xlane.xlu1 %3638 }
 0x527   :  { %v3645_v48 = vsub.f32 %v8509_v0, %v3639_v35 }
 0x529   :  { %v3651_v53 = vmul.f32 1.442695, %v3645_v48 }
 0x52b   :  { %6685 = vpow2.f32 %v3651_v53  ;;  %v10530_v53 = vld [vmem:[#allocation91_spill] sm:$0xff] }
 0x52c   :  { %v6684_v10 = vpop.eup %6683 }
 0x52d   :  { %v3658_v57 = vsel %vm1901_vm0, %v6684_v10, 0.0 }
 0x52e   :  { %3659 = vadd.xlane.f32.xlu0 %v3658_v57 }
 0x52f   :  { %v3642_v56 = vpop.xlane.xlu0 %3641 }
 0x530   :  { %v3646_v17 = vsub.f32 %v8513_v7, %v3642_v56 }
 0x532   :  { %v3653_v62 = vmul.f32 1.442695, %v3646_v17 }
 0x534   :  { %6687 = vpow2.f32 %v3653_v62 }
 0x538   :  { %v6686_v9 = vpop.eup %6685 }
 0x539   :  { %v3661_v34 = vsel %vm1901_vm0, %v6686_v9, 0.0 }
 0x53a   :  { %3662 = vadd.xlane.f32.xlu1 %v3661_v34  ;;  %v10531_v34 = vld [vmem:[#allocation5_spill] sm:$0xff] }
 0x541   :  { %v8524_v58 = vpop.eup %6687 }
 0x542   :  { %v3664_v52 = vsel %vm1901_vm0, %v8524_v58, 0.0 }
 0x543   :  { %3665 = vadd.xlane.f32.xlu0 %v3664_v52 }
 0x5a9   :  { %v3657_v27 = vpop.xlane.xlu1 %3656 }
 0x5aa   :  { %6689 = vrcp.f32 %v3657_v27  ;;  %v10532_v27 = vld [vmem:[#allocation7_spill] sm:$0xff] }
 0x5b7   :  { %v3660_v1 = vpop.xlane.xlu0 %3659  ;;  %v6690_v22 = vpop.eup %6689 }
 0x5b8   :  { %6691 = vrcp.f32 %v3660_v1  ;;  %v3668_v11 = vmul.f32 %v6690_v22, %v6682_v21 }
 0x5ba   :  { %6581 = vmatmul.mubr.msk.f32.vlgmr.msra.gmra.mxu1 %vm1901_vm0, %v3668_v11 }
 0x5bb   :  { %3757 = vmatprep.mubr.f32.mxu1 %v10506_v15  ;;  %4500 = vmatpush1.msra.mxu1 %v8533_v23 }
 0x5bc   :  { %4501 = vmatprep.subr.mxu1 %v10506_v15 }
 0x5bd   :  { %4502 = vmatpush1.msra.mxu1 %v8540_v42 }
 0x5be   :  { %4503 = vmatprep.subr.mxu1 %v10506_v15 }
 0x5bf   :  { %4504 = vmatpush1.msra.mxu1 %v8547_v49 }
 0x5c0   :  { %4505 = vmatprep.subr.mxu1 %v10506_v15 }
 0x5c1   :  { %4506 = vmatpush1.msra.mxu1 %v8554_v25 }
 0x5c2   :  { %4507 = vmatprep.subr.mxu1 %v10506_v15 }
 0x5c3   :  { %v3663_v38 = vpop.xlane.xlu1 %3662  ;;  %4508 = vmatpush1.msra.mxu1 %v8561_v43 }
 0x5c4   :  { %6693 = vrcp.f32 %v3663_v38  ;;  %4509 = vmatprep.subr.mxu1 %v10506_v15  ;;  %v10533_v38 = vld [vmem:[#allocation6_spill] sm:$0xff] }
 0x5c5   :  { %v6692_v13 = vpop.eup %6691  ;;  %4510 = vmatpush1.msra.mxu1 %v8568_v30 }
 0x5c6   :  { %v3670_v24 = vmul.f32 %v6692_v13, %v6684_v10  ;;  %4511 = vmatprep.subr.mxu1 %v10506_v15 }
 0x5c7   :  { %4512 = vmatpush1.msra.mxu1 %v8577_v61 }
 0x5c8   :  { %6582 = vmatmul.mubr.msk.f32.gmra.mxu1 %vm1901_vm0, %v3670_v24  ;;  %4513 = vmatprep.subr.mxu1 %v10506_v15  ;;  %v10534_v24 = vld [vmem:[#allocation9_spill] sm:$0xff] }
 0x5c9   :  { %3763 = vmatprep.mubr.f32.mxu1 %v10506_v15  ;;  %4514 = vmatpush1.msra.mxu1 %v8584_v55 }
 0x5ca   :  { %4515 = vmatprep.subr.mxu1 %v10506_v15 }
 0x5cb   :  { %4516 = vmatpush1.msra.mxu1 %v8591_v5 }
 0x5cc   :  { %v3666_v40 = vpop.xlane.xlu0 %3665  ;;  %4517 = vmatprep.subr.mxu1 %v10506_v15 }
 0x5cd   :  { %6695 = vrcp.f32 %v3666_v40  ;;  %4518 = vmatpush1.msra.mxu1 %v8598_v19 }
 0x5ce   :  { %4519 = vmatprep.subr.mxu1 %v10506_v15 }
 0x5cf   :  { %4520 = vmatpush1.msra.mxu1 %v8607_v3 }
 0x5d0   :  { %4521 = vmatprep.subr.mxu1 %v10506_v15 }
 0x5d1   :  { %v6694_v31 = vpop.eup %6693  ;;  %4522 = vmatpush1.msra.mxu1 %v8614_v51 }
 0x5d2   :  { %v3672_v12 = vmul.f32 %v6694_v31, %v6686_v9  ;;  %4523 = vmatprep.subr.mxu1 %v10506_v15  ;;  %v10535_v31 = vld [vmem:[#allocation8_spill] sm:$0xff] }
 0x5d3   :  { %4524 = vmatpush1.msra.mxu1 %v8621_v16 }
 0x5d4   :  { %6583 = vmatmul.mubr.msk.f32.gmra.mxu1 %vm1901_vm0, %v3672_v12  ;;  %4525 = vmatprep.subr.mxu1 %v10506_v15 }
 0x5d5   :  { %3769 = vmatprep.mubr.f32.mxu1 %v10506_v15  ;;  %4526 = vmatpush1.msra.mxu1 %v8628_v8 }
 0x5d6   :  { %4527 = vmatprep.subr.mxu1 %v10506_v15 }
 0x5d7   :  { %4528 = vmatpush1.msra.mxu1 %v8636_v45 }
 0x5d8   :  { %4529 = vmatprep.subr.mxu1 %v10506_v15 }
 0x5d9   :  { %4530 = vmatpush1.msra.mxu1 %v8644_v33 }
 0x5da   :  { %v6696_v4 = vpop.eup %6695  ;;  %4555 = vmatprep.subr.mxu1 %v10506_v15 }
 0x5db   :  { %v3674_v46 = vmul.f32 %v6696_v4, %v8524_v58  ;;  %4556 = vmatpush2.msra.mxu1 %v8651_v18 }
 0x5dc   :  { %4557 = vmatprep.subr.mxu1 %v10506_v15 }
 0x5dd   :  { %6584 = vmatmul.mubr.msk.f32.gmra.mxu1 %vm1901_vm0, %v3674_v46  ;;  %v10536_v46 = vld [vmem:[#allocation10_spill] sm:$0xff] }
 0x5de   :  { %4558 = vmatpush2.msra.mxu1 %v8658_v28 }
 0x5df   :  { %4559 = vmatprep.subr.mxu1 %v10506_v15 }
 0x5e0   :  { %4560 = vmatpush2.msra.mxu1 %v8665_v59 }
 0x5e1   :  { %4561 = vmatprep.subr.mxu1 %v10506_v15 }
 0x5e2   :  { %4562 = vmatpush2.msra.mxu1 %v8672_v47 }
 0x5e3   :  { %6593 = vmatprep.subr.msk.mxu1 %vm1910_vm3, %v6756_v26 }
 0x67a   :  { %v3753_v32 = vpop.f32.mrf.mxu1 }
 0x67c   :  { %v3755_v14 = vpop.f32.mrf.mxu1 }
 0x67d   :  { %v3784_v60 = vcombine.low %v3753_v32, %v3755_v14  ;;  %v3785_v50 = vcombine.high %v3753_v32, %v3755_v14  ;;  %v10537_v32 = vld [vmem:[#allocation11_spill] sm:$0xff] }
 0x67f   :  { %v3792_v2 = vrot.slane %v3784_v60, %v10528_v6  ;;  %v3799_v37 = vrot.slane %v3785_v50, %v10528_v6 }
 0x681   :  { %v3800_v44 = vcombine.high %v3792_v2, %v3792_v2  ;;  %v3808_v41 = vrot.slane %v3792_v2, %v10528_v6  ;;  %v3801_v36 = vcombine.high %v3799_v37, %v3799_v37  ;;  %v3815_v17 = vrot.slane %v3799_v37, %v10528_v6 }
 0x683   :  { %v3822_v54 = vrot.slane %v3800_v44, %v10528_v6  ;;  %v3830_v20 = vcombine.high %v3808_v41, %v3808_v41  ;;  %v3987_v21 = vrot.slane %v3808_v41, %v10529_v29  ;;  %v3991_v10 = vrot.slane %v3808_v41, %v10530_v53 }
 0x684   :  { %v3829_v52 = vrot.slane %v3801_v36, %v10528_v6  ;;  %v4019_v4 = vrot.slane %v3815_v17, %v10529_v29  ;;  %v3831_v2 = vcombine.high %v3815_v17, %v3815_v17  ;;  %v4023_v44 = vrot.slane %v3815_v17, %v10530_v53 }
 0x685   :  { %v3832_v35 = vcombine.high %v3822_v54, %v3822_v54  ;;  %v3995_v48 = vrot.slane %v3822_v54, %v10529_v29  ;;  %v3999_v56 = vrot.slane %v3822_v54, %v10530_v53  ;;  %v4003_v57 = vrot.slane %v3830_v20, %v10529_v29 }
 0x686   :  { %v4007_v62 = vrot.slane %v3830_v20, %v10530_v53  ;;  %v4304_v58 = vmul.f32 %v3987_v21, %v10531_v34  ;;  %v4305_v13 = vmul.f32 %v3991_v10, %v10533_v38  ;;  %v3833_v37 = vcombine.high %v3829_v52, %v3829_v52  ;;  %v10538_v20 = vld [vmem:[#allocation13_spill] sm:$0xff]  ;;  %v10551_v38 = vld [vmem:[#allocation24_spill] sm:$0xff] }
 0x687   :  { %v4011_v9 = vrot.slane %v3832_v35, %v10529_v29  ;;  %v4306_v1 = vmul.f32 %v3995_v48, %v10532_v27  ;;  %v4015_v11 = vrot.slane %v3832_v35, %v10530_v53  ;;  %v4307_v40 = vmul.f32 %v3999_v56, %v10534_v24  ;;  %v10539_v56 = vld [vmem:[#allocation12_spill] sm:$0xff]  ;;  %v10550_v24 = vld [vmem:[#allocation25_spill] sm:$0xff] }
 0x688   :  { %v3759_v22 = vpop.f32.mrf.mxu1  ;;  %v4308_v12 = vmul.f32 %v4003_v57, %v10535_v31  ;;  %v4309_v26 = vmul.f32 %v4007_v62, %v10536_v46  ;;  %v4368_v60 = vsel %vm124_vm1, %v4304_v58, 0.0  ;;  %v4431_v35 = vsel %vm2661_vm4, %v4305_v13, 0.0 }
 0x689   :  { %v4310_v14 = vmul.f32 %v4011_v9, %v10537_v32  ;;  %v4369_v50 = vsel %vm124_vm1, %v4306_v1, 0.0  ;;  %v4311_v21 = vmul.f32 %v4015_v11, %v10538_v20  ;;  %v4432_v48 = vsel %vm2661_vm4, %v4307_v40, 0.0  ;;  %v10540_v11 = vld [vmem:[#allocation14_spill] sm:$0xff] }
 0x68a   :  { %v4370_v41 = vadd.f32 %v4369_v50, %v4368_v60  ;;  %v3761_v54 = vpop.f32.mrf.mxu1  ;;  %v4371_v36 = vsel %vm124_vm1, %v4308_v12, 0.0  ;;  %v4027_v10 = vrot.slane %v3829_v52, %v10529_v29  ;;  %v4312_v57 = vmul.f32 %v4019_v4, %v10539_v56 }
 0x68b   :  { %v4433_v9 = vadd.f32 %v4432_v48, %v4431_v35  ;;  %v4031_v58 = vrot.slane %v3829_v52, %v10530_v53  ;;  %v4373_v17 = vsel %vm124_vm1, %v4310_v14, 0.0  ;;  %v4434_v1 = vsel %vm2661_vm4, %v4309_v26, 0.0  ;;  %v10541_v52 = vld [vmem:[#allocation15_spill] sm:$0xff] }
 0x68c   :  { %v4372_v62 = vadd.f32 %v4371_v36, %v4370_v41  ;;  %v3834_v60 = vcombine.low %v3759_v22, %v3761_v54  ;;  %v4313_v50 = vmul.f32 %v4023_v44, %v10540_v11  ;;  %v3835_v13 = vcombine.high %v3759_v22, %v3761_v54 }
 0x68d   :  { %v4435_v7 = vadd.f32 %v4434_v1, %v4433_v9  ;;  %v4035_v40 = vrot.slane %v3831_v2, %v10529_v29  ;;  %v4039_v0 = vrot.slane %v3831_v2, %v10530_v53  ;;  %v4436_v4 = vsel %vm2661_vm4, %v4311_v21, 0.0  ;;  %v10542_v9 = vld [vmem:[#allocation17_spill] sm:$0xff] }
 0x68e   :  { %v4374_v12 = vadd.f32 %v4373_v17, %v4372_v62  ;;  %v3842_v41 = vrot.slane %v3834_v60, %v10528_v6  ;;  %v4314_v35 = vmul.f32 %v4027_v10, %v10541_v52  ;;  %v4375_v14 = vsel %vm124_vm1, %v4312_v57, 0.0 }
 0x68f   :  { %v4437_v26 = vadd.f32 %v4436_v4, %v4435_v7  ;;  %v3849_v48 = vrot.slane %v3835_v13, %v10528_v6  ;;  %v4043_v44 = vrot.slane %v3833_v37, %v10529_v29  ;;  %v4047_v22 = vrot.slane %v3833_v37, %v10530_v53  ;;  %v10544_v4 = vld [vmem:[#allocation18_spill] sm:$0xff]  ;;  %v10545_v37 = vld [vmem:[#allocation19_spill] sm:$0xff] }
 0x690   :  { %v4376_v54 = vadd.f32 %v4375_v14, %v4374_v12  ;;  %v3850_v62 = vcombine.high %v3842_v41, %v3842_v41  ;;  %v4315_v2 = vmul.f32 %v4031_v58, %v10542_v9  ;;  %v4438_v21 = vsel %vm2661_vm4, %v4313_v50, 0.0  ;;  %v10546_v14 = vld [vmem:[#allocation21_spill] sm:$0xff] }
 0x691   :  { %v3858_v17 = vrot.slane %v3842_v41, %v10528_v6  ;;  %v4439_v1 = vadd.f32 %v4438_v21, %v4437_v26  ;;  %v3851_v60 = vcombine.high %v3849_v48, %v3849_v48  ;;  %v4316_v57 = vmul.f32 %v4035_v40, %v10543_v39  ;;  %v10553_v39 = vld [vmem:[#allocation27_spill] sm:$0xff] }
 0x692   :  { %v4377_v7 = vsel %vm124_vm1, %v4314_v35, 0.0  ;;  %v3872_v13 = vrot.slane %v3850_v62, %v10528_v6  ;;  %v4317_v63 = vmul.f32 %v4039_v0, %v10544_v4  ;;  %v4318_v12 = vmul.f32 %v4043_v44, %v10545_v37 }
 0x693   :  { %v4319_v11 = vmul.f32 %v4047_v22, %v10546_v14  ;;  %v4378_v58 = vadd.f32 %v4377_v7, %v4376_v54  ;;  %v4440_v50 = vsel %vm2661_vm4, %v4315_v2, 0.0  ;;  %v3880_v9 = vcombine.high %v3858_v17, %v3858_v17 }
 0x694   :  { %v3765_v36 = vpop.f32.mrf.mxu1  ;;  %v4051_v41 = vrot.slane %v3858_v17, %v10529_v29  ;;  %v4441_v21 = vadd.f32 %v4440_v50, %v4439_v1  ;;  %v3865_v40 = vrot.slane %v3849_v48, %v10528_v6  ;;  %v3879_v35 = vrot.slane %v3851_v60, %v10528_v6  ;;  %v10547_v60 = vld [vmem:[#allocation20_spill] sm:$0xff] }
 0x695   :  { %v4379_v62 = vsel %vm124_vm1, %v4316_v57, 0.0  ;;  %v3882_v0 = vcombine.high %v3872_v13, %v3872_v13  ;;  %v4055_v44 = vrot.slane %v3858_v17, %v10530_v53  ;;  %v4059_v22 = vrot.slane %v3872_v13, %v10529_v29 }
 0x696   :  { %v3767_v10 = vpop.f32.mrf.mxu1  ;;  %v4380_v54 = vadd.f32 %v4379_v62, %v4378_v58  ;;  %v4442_v2 = vsel %vm2661_vm4, %v4317_v63, 0.0  ;;  %v4381_v7 = vsel %vm124_vm1, %v4318_v12, 0.0  ;;  %v4444_v14 = vsel %vm2661_vm4, %v4319_v11, 0.0  ;;  %v10548_v58 = vld [vmem:[#allocation22_spill] sm:$0xff]  ;;  %v10549_v62 = vld [vmem:[#allocation23_spill] sm:$0xff] }
 0x697   :  { %v3884_v26 = vcombine.low %v3765_v36, %v3767_v10  ;;  %v3885_v20 = vcombine.high %v3765_v36, %v3767_v10  ;;  %v4063_v1 = vrot.slane %v3872_v13, %v10530_v53  ;;  %v4067_v48 = vrot.slane %v3880_v9, %v10529_v29 }
 0x698   :  { %v4320_v36 = vmul.f32 %v4051_v41, %v10547_v60  ;;  %v4443_v57 = vadd.f32 %v4442_v2, %v4441_v21  ;;  %v3881_v50 = vcombine.high %v3865_v40, %v3865_v40  ;;  %v3883_v17 = vcombine.high %v3879_v35, %v3879_v35 }
 0x699   :  { %v3892_v10 = vrot.slane %v3884_v26, %v10528_v6  ;;  %v8747_v4 = vrot.slane %v3885_v20, %v10528_v6  ;;  %v4071_v63 = vrot.slane %v3880_v9, %v10530_v53  ;;  %v4075_v12 = vrot.slane %v3882_v0, %v10529_v29 }
 0x69a   :  { %v4321_v11 = vmul.f32 %v4055_v44, %v10548_v58  ;;  %v4322_v13 = vmul.f32 %v4059_v22, %v10549_v62  ;;  %v4079_v46 = vrot.slane %v3882_v0, %v10530_v53  ;;  %v4083_v41 = vrot.slane %v3865_v40, %v10529_v29  ;;  %v10552_v0 = vld [vmem:[#allocation26_spill] sm:$0xff] }
 0x69b   :  { %v4087_v26 = vrot.slane %v3865_v40, %v10530_v53  ;;  %v4382_v21 = vadd.f32 %v4381_v7, %v4380_v54  ;;  %v4091_v2 = vrot.slane %v3879_v35, %v10529_v29  ;;  %v4323_v20 = vmul.f32 %v4063_v1, %v10550_v24  ;;  %v10554_v1 = vld [vmem:[#allocation29_spill] sm:$0xff] }
 0x69c   :  { %v4324_v60 = vmul.f32 %v4067_v48, %v10551_v38  ;;  %v4383_v9 = vsel %vm124_vm1, %v4320_v36, 0.0  ;;  %v4095_v37 = vrot.slane %v3879_v35, %v10530_v53  ;;  %v4099_v44 = vrot.slane %v3881_v50, %v10529_v29  ;;  %v10555_v38 = vld [vmem:[#allocation28_spill] sm:$0xff] }
 0x69d   :  { %v4384_v22 = vadd.f32 %v4383_v9, %v4382_v21  ;;  %v4445_v58 = vadd.f32 %v4444_v14, %v4443_v57  ;;  %v4325_v62 = vmul.f32 %v4071_v63, %v10552_v0  ;;  %v4326_v52 = vmul.f32 %v4075_v12, %v10553_v39  ;;  %v10556_v12 = vld [vmem:[#allocation31_spill] sm:$0xff] }
 0x69e   :  { %v4385_v40 = vsel %vm124_vm1, %v4322_v13, 0.0  ;;  %v4446_v54 = vsel %vm2661_vm4, %v4321_v11, 0.0  ;;  %v4103_v7 = vrot.slane %v3881_v50, %v10530_v53  ;;  %v4327_v48 = vmul.f32 %v4079_v46, %v10554_v1  ;;  %v10557_v11 = vld [vmem:[#allocation30_spill] sm:$0xff] }
 0x69f   :  { %v4386_v24 = vadd.f32 %v4385_v40, %v4384_v22  ;;  %v4447_v36 = vadd.f32 %v4446_v54, %v4445_v58  ;;  %v4328_v35 = vmul.f32 %v4083_v41, %v10555_v38  ;;  %v4387_v56 = vsel %vm124_vm1, %v4324_v60, 0.0  ;;  %v10558_v60 = vld [vmem:[#allocation33_spill] sm:$0xff]  ;;  %v10559_v54 = vld [vmem:[#allocation32_spill] sm:$0xff] }
 0x6a0   :  { %v4448_v14 = vsel %vm2661_vm4, %v4323_v20, 0.0  ;;  %v3900_v57 = vcombine.high %v3892_v10, %v3892_v10  ;;  %v4107_v63 = vrot.slane %v3883_v17, %v10529_v29  ;;  %v4330_v21 = vmul.f32 %v4091_v2, %v10556_v12  ;;  %v10571_v12 = vld [vmem:[#allocation45_spill] sm:$0xff] }
 0x6a1   :  { %v4388_v13 = vadd.f32 %v4387_v56, %v4386_v24  ;;  %v4449_v9 = vadd.f32 %v4448_v14, %v4447_v36  ;;  %v4329_v0 = vmul.f32 %v4087_v26, %v10557_v11  ;;  %v4389_v50 = vsel %vm124_vm1, %v4326_v52, 0.0  ;;  %v10560_v26 = vld [vmem:[#allocation34_spill] sm:$0xff] }
 0x6a2   :  { %v4450_v46 = vsel %vm2661_vm4, %v4325_v62, 0.0  ;;  %v3908_v58 = vrot.slane %v3892_v10, %v10528_v6  ;;  %v4111_v41 = vrot.slane %v3883_v17, %v10530_v53  ;;  %v4331_v22 = vmul.f32 %v4095_v37, %v10558_v60 }
 0x6a3   :  { %v4390_v20 = vadd.f32 %v4389_v50, %v4388_v13  ;;  %v4451_v40 = vadd.f32 %v4450_v46, %v4449_v9  ;;  %v4332_v1 = vmul.f32 %v4099_v44, %v10559_v54  ;;  %v4391_v2 = vsel %vm124_vm1, %v4328_v35, 0.0  ;;  %v10561_v13 = vld [vmem:[#allocation35_spill] sm:$0xff]  ;;  %v10562_v9 = vld [vmem:[#allocation37_spill] sm:$0xff]  ;;  %v10570_v54 = vld [vmem:[#allocation44_spill] sm:$0xff] }
 0x6a4   :  { %v4452_v24 = vsel %vm2661_vm4, %v4327_v48, 0.0  ;;  %v3922_v56 = vrot.slane %v3900_v57, %v10528_v6  ;;  %v4333_v52 = vmul.f32 %v4103_v7, %v10560_v26  ;;  %v4393_v62 = vsel %vm124_vm1, %v4330_v21, 0.0 }
 0x6a5   :  { %v4392_v36 = vadd.f32 %v4391_v2, %v4390_v20  ;;  %v4453_v10 = vadd.f32 %v4452_v24, %v4451_v40  ;;  %v4454_v17 = vsel %vm2661_vm4, %v4329_v0, 0.0  ;;  %v3901_v37 = vcombine.high %v8747_v4, %v8747_v4 }
 0x6a6   :  { %v3930_v14 = vcombine.high %v3908_v58, %v3908_v58  ;;  %v4115_v44 = vrot.slane %v3908_v58, %v10529_v29  ;;  %v4334_v35 = vmul.f32 %v4107_v63, %v10561_v13  ;;  %v4335_v48 = vmul.f32 %v4111_v41, %v10562_v9  ;;  %v10565_v9 = vld [vmem:[#allocation38_spill] sm:$0xff]  ;;  %v10568_v13 = vld [vmem:[#allocation43_spill] sm:$0xff] }
 0x6a7   :  { %v4394_v50 = vadd.f32 %v4393_v62, %v4392_v36  ;;  %v4455_v57 = vadd.f32 %v4454_v17, %v4453_v10  ;;  %v4395_v7 = vsel %vm124_vm1, %v4332_v1, 0.0  ;;  %v4456_v46 = vsel %vm2661_vm4, %v4331_v22, 0.0  ;;  %v10563_v36 = vld [vmem:[#allocation36_spill] sm:$0xff]  ;;  %v3771_v17 = vpop.f32.mrf.mxu1 }
 0x6a8   :  { %v3932_v21 = vcombine.high %v3922_v56, %v3922_v56  ;;  %v4123_v20 = vrot.slane %v3922_v56, %v10529_v29  ;;  %v3915_v2 = vrot.slane %v8747_v4, %v10528_v6  ;;  %v4119_v24 = vrot.slane %v3908_v58, %v10530_v53 }
 0x6a9   :  { %v4396_v0 = vadd.f32 %v4395_v7, %v4394_v50  ;;  %v4457_v40 = vadd.f32 %v4456_v46, %v4455_v57  ;;  %v3929_v63 = vrot.slane %v3901_v37, %v10528_v6  ;;  %v4131_v41 = vrot.slane %v3930_v14, %v10529_v29  ;;  %v10564_v7 = vld [vmem:[#allocation39_spill] sm:$0xff] }
 0x6aa   :  { %v4336_v62 = vmul.f32 %v4115_v44, %v10563_v36  ;;  %v4458_v1 = vsel %vm2661_vm4, %v4333_v52, 0.0  ;;  %v4127_v22 = vrot.slane %v3922_v56, %v10530_v53  ;;  %v4397_v10 = vsel %vm124_vm1, %v4334_v35, 0.0  ;;  %v10566_v56 = vld [vmem:[#allocation40_spill] sm:$0xff]  ;;  %v3773_v36 = vpop.f32.mrf.mxu1 }
 0x6ab   :  { %v4459_v50 = vadd.f32 %v4458_v1, %v4457_v40  ;;  %v4139_v57 = vrot.slane %v3932_v21, %v10529_v29  ;;  %v4338_v4 = vmul.f32 %v4123_v20, %v10564_v7  ;;  %v4460_v58 = vsel %vm2661_vm4, %v4335_v48, 0.0  ;;  %v10567_v20 = vld [vmem:[#allocation41_spill] sm:$0xff] }
 0x6ac   :  { %v3931_v46 = vcombine.high %v3915_v2, %v3915_v2  ;;  %v4135_v37 = vrot.slane %v3930_v14, %v10530_v53  ;;  %v4337_v26 = vmul.f32 %v4119_v24, %v10565_v9  ;;  %v4398_v44 = vadd.f32 %v4397_v10, %v4396_v0 }
 0x6ad   :  { %v3933_v60 = vcombine.high %v3929_v63, %v3929_v63  ;;  %v4147_v52 = vrot.slane %v3915_v2, %v10529_v29  ;;  %v4340_v11 = vmul.f32 %v4131_v41, %v10566_v56  ;;  %v4399_v35 = vsel %vm124_vm1, %v4336_v62, 0.0  ;;  %v10569_v41 = vld [vmem:[#allocation42_spill] sm:$0xff] }
 0x6ae   :  { %v4143_v40 = vrot.slane %v3932_v21, %v10530_v53  ;;  %v4151_v1 = vrot.slane %v3915_v2, %v10530_v53  ;;  %v4339_v7 = vmul.f32 %v4127_v22, %v10567_v20  ;;  %v4400_v48 = vadd.f32 %v4399_v35, %v4398_v44 }
 0x6af   :  { %v4155_v14 = vrot.slane %v3929_v63, %v10529_v29  ;;  %v4342_v24 = vmul.f32 %v4139_v57, %v10568_v13  ;;  %v4401_v0 = vsel %vm124_vm1, %v4338_v4, 0.0  ;;  %v4461_v10 = vadd.f32 %v4460_v58, %v4459_v50 }
 0x6b0   :  { %v4159_v9 = vrot.slane %v3929_v63, %v10530_v53  ;;  %v4341_v56 = vmul.f32 %v4135_v37, %v10569_v41  ;;  %v4402_v62 = vadd.f32 %v4401_v0, %v4400_v48  ;;  %v4462_v21 = vsel %vm2661_vm4, %v4337_v26, 0.0  ;;  %v10572_v26 = vld [vmem:[#allocation46_spill] sm:$0xff] }
 0x6b1   :  { %v4344_v2 = vmul.f32 %v4147_v52, %v10570_v54  ;;  %v4403_v22 = vsel %vm124_vm1, %v4340_v11, 0.0  ;;  %v4463_v44 = vadd.f32 %v4462_v21, %v4461_v10  ;;  %v3934_v35 = vcombine.low %v3771_v17, %v3773_v36  ;;  %v10573_v52 = vld [vmem:[#allocation47_spill] sm:$0xff] }
 0x6b2   :  { %v4163_v20 = vrot.slane %v3931_v46, %v10529_v29  ;;  %v4343_v57 = vmul.f32 %v4143_v40, %v10571_v12  ;;  %v4404_v13 = vadd.f32 %v4403_v22, %v4402_v62  ;;  %v4464_v50 = vsel %vm2661_vm4, %v4339_v7, 0.0  ;;  %v10574_v22 = vld [vmem:[#allocation49_spill] sm:$0xff] }
 0x6b3   :  { %v4405_v63 = vsel %vm124_vm1, %v4342_v24, 0.0  ;;  %v4465_v4 = vadd.f32 %v4464_v50, %v4463_v44  ;;  %v3935_v58 = vcombine.high %v3771_v17, %v3773_v36  ;;  %v3942_v37 = vrot.slane %v3934_v35, %v10528_v6 }
 0x6b4   :  { %v4345_v48 = vmul.f32 %v4151_v1, %v10572_v26  ;;  %v4346_v0 = vmul.f32 %v4155_v14, %v10573_v52  ;;  %v4406_v11 = vadd.f32 %v4405_v63, %v4404_v13  ;;  %v4466_v10 = vsel %vm2661_vm4, %v4341_v56, 0.0  ;;  %v10575_v14 = vld [vmem:[#allocation48_spill] sm:$0xff] }
 0x6b5   :  { %v4407_v21 = vsel %vm124_vm1, %v4344_v2, 0.0  ;;  %v4467_v41 = vadd.f32 %v4466_v10, %v4465_v4  ;;  %v3950_v40 = vcombine.high %v3942_v37, %v3942_v37  ;;  %v4167_v62 = vrot.slane %v3931_v46, %v10530_v53 }
 0x6b6   :  { %v4408_v7 = vadd.f32 %v4407_v21, %v4406_v11  ;;  %v4468_v24 = vsel %vm2661_vm4, %v4343_v57, 0.0  ;;  %v3958_v36 = vrot.slane %v3942_v37, %v10528_v6  ;;  %v4171_v17 = vrot.slane %v3933_v60, %v10529_v29  ;;  %v10576_v11 = vld [vmem:[#allocation50_spill] sm:$0xff] }
 0x6b7   :  { %v4347_v1 = vmul.f32 %v4159_v9, %v10574_v22  ;;  %v4469_v44 = vadd.f32 %v4468_v24, %v4467_v41  ;;  %v3949_v13 = vrot.slane %v3935_v58, %v10528_v6  ;;  %v4348_v56 = vmul.f32 %v4163_v20, %v10575_v14  ;;  %v10577_v41 = vld [vmem:[#allocation51_spill] sm:$0xff]  ;;  %v10578_v24 = vld [vmem:[#allocation53_spill] sm:$0xff] }
 0x6b8   :  { %v4409_v2 = vsel %vm124_vm1, %v4346_v0, 0.0  ;;  %v4470_v35 = vsel %vm2661_vm4, %v4345_v48, 0.0  ;;  %v3972_v46 = vrot.slane %v3950_v40, %v10528_v6  ;;  %v4175_v50 = vrot.slane %v3933_v60, %v10530_v53  ;;  %v10580_v22 = vld [vmem:[#allocation55_spill] sm:$0xff] }
 0x6b9   :  { %v4410_v57 = vadd.f32 %v4409_v2, %v4408_v7  ;;  %v4471_v63 = vadd.f32 %v4470_v35, %v4469_v44  ;;  %v3980_v4 = vcombine.high %v3958_v36, %v3958_v36  ;;  %v4179_v37 = vrot.slane %v3958_v36, %v10529_v29  ;;  %v10579_v35 = vld [vmem:[#allocation52_spill] sm:$0xff] }
 0x6ba   :  { %v4349_v9 = vmul.f32 %v4167_v62, %v10576_v11  ;;  %v4350_v10 = vmul.f32 %v4171_v17, %v10577_v41  ;;  %v4472_v58 = vsel %vm2661_vm4, %v4347_v1, 0.0  ;;  %v3951_v20 = vcombine.high %v3949_v13, %v3949_v13 }
 0x6bb   :  { %v4411_v0 = vsel %vm124_vm1, %v4348_v56, 0.0  ;;  %v4473_v21 = vadd.f32 %v4472_v58, %v4471_v63  ;;  %v3982_v48 = vcombine.high %v3972_v46, %v3972_v46  ;;  %v4187_v40 = vrot.slane %v3972_v46, %v10529_v29 }
 0x6bc   :  { %v4351_v60 = vmul.f32 %v4175_v50, %v10578_v24  ;;  %v4412_v7 = vadd.f32 %v4411_v0, %v4410_v57  ;;  %v4183_v44 = vrot.slane %v3958_v36, %v10530_v53  ;;  %v3965_v2 = vrot.slane %v3949_v13, %v10528_v6  ;;  %v10581_v13 = vld [vmem:[#allocation54_spill] sm:$0xff] }
 0x6bd   :  { %v4195_v62 = vrot.slane %v3980_v4, %v10529_v29  ;;  %v4352_v17 = vmul.f32 %v4179_v37, %v10579_v35  ;;  %v4474_v1 = vsel %vm2661_vm4, %v4349_v9, 0.0  ;;  %v3979_v11 = vrot.slane %v3951_v20, %v10528_v6  ;;  %v10582_v20 = vld [vmem:[#allocation56_spill] sm:$0xff] }
 0x6be   :  { %v4191_v56 = vrot.slane %v3972_v46, %v10530_v53  ;;  %v4475_v63 = vadd.f32 %v4474_v1, %v4473_v21  ;;  %v4203_v58 = vrot.slane %v3982_v48, %v10529_v29  ;;  %v4354_v50 = vmul.f32 %v4187_v40, %v10580_v22  ;;  %v10583_v40 = vld [vmem:[#allocation57_spill] sm:$0xff]  ;;  %v10584_v22 = vld [vmem:[#allocation62_spill] sm:$0xff] }
 0x6bf   :  { %v4413_v57 = vsel %vm124_vm1, %v4350_v10, 0.0  ;;  %v4199_v36 = vrot.slane %v3980_v4, %v10530_v53  ;;  %v4353_v0 = vmul.f32 %v4183_v44, %v10581_v13  ;;  %v4476_v37 = vsel %vm2661_vm4, %v4351_v60, 0.0  ;;  %v10585_v13 = vld [vmem:[#allocation58_spill] sm:$0xff] }
 0x6c0   :  { %v4414_v24 = vadd.f32 %v4413_v57, %v4412_v7  ;;  %v3981_v26 = vcombine.high %v3965_v2, %v3965_v2  ;;  %v4211_v9 = vrot.slane %v3965_v2, %v10529_v29  ;;  %v4356_v6 = vmul.f32 %v4195_v62, %v10582_v20 }
 0x6c1   :  { %v4415_v46 = vsel %vm124_vm1, %v4352_v17, 0.0  ;;  %v3983_v21 = vcombine.high %v3979_v11, %v3979_v11  ;;  %v4207_v1 = vrot.slane %v3982_v48, %v10530_v53  ;;  %v4355_v12 = vmul.f32 %v4191_v56, %v10583_v40  ;;  %v10586_v48 = vld [vmem:[#allocation64_spill] sm:$0xff] }
 0x6c2   :  { %v4416_v10 = vadd.f32 %v4415_v46, %v4414_v24  ;;  %v4219_v4 = vrot.slane %v3979_v11, %v10529_v29  ;;  %v4358_v44 = vmul.f32 %v4203_v58, %v10584_v22  ;;  %v4417_v7 = vsel %vm124_vm1, %v4354_v50, 0.0  ;;  %v10587_v58 = vld [vmem:[#allocation65_spill] sm:$0xff] }
 0x6c3   :  { %v4477_v60 = vadd.f32 %v4476_v37, %v4475_v63  ;;  %v4215_v57 = vrot.slane %v3965_v2, %v10530_v53  ;;  %v4357_v35 = vmul.f32 %v4199_v36, %v10585_v13  ;;  %v4478_v17 = vsel %vm2661_vm4, %v4353_v0, 0.0  ;;  %v10588_v36 = vld [vmem:[#allocation70_spill] sm:$0xff] }
 0x6c4   :  { %v4418_v62 = vadd.f32 %v4417_v7, %v4416_v10  ;;  %v4227_v20 = vrot.slane %v3981_v26, %v10529_v29  ;;  %v4360_v41 = vmul.f32 %v4211_v9, %v10586_v48  ;;  %v4419_v24 = vsel %vm124_vm1, %v4356_v6, 0.0  ;;  %v10589_v9 = vld [vmem:[#allocation67_spill] sm:$0xff] }
 0x6c5   :  { %v4479_v56 = vadd.f32 %v4478_v17, %v4477_v60  ;;  %v4223_v46 = vrot.slane %v3979_v11, %v10530_v53  ;;  %v4359_v40 = vmul.f32 %v4207_v1, %v10587_v58  ;;  %v4480_v63 = vsel %vm2661_vm4, %v4355_v12, 0.0  ;;  %v10590_v11 = vld [vmem:[#allocation72_spill] sm:$0xff] }
 0x6c6   :  { %v4420_v50 = vadd.f32 %v4419_v24, %v4418_v62  ;;  %v4235_v2 = vrot.slane %v3983_v21, %v10529_v29  ;;  %v4362_v37 = vmul.f32 %v4219_v4, %v10588_v36  ;;  %v4421_v0 = vsel %vm124_vm1, %v4358_v44, 0.0  ;;  %v10591_v24 = vld [vmem:[#allocation73_spill] sm:$0xff] }
 0x6c7   :  { %v4481_v10 = vadd.f32 %v4480_v63, %v4479_v56  ;;  %v4231_v7 = vrot.slane %v3981_v26, %v10530_v53  ;;  %v4361_v13 = vmul.f32 %v4215_v57, %v10589_v9  ;;  %v4482_v60 = vsel %vm2661_vm4, %v4357_v35, 0.0  ;;  %v10592_v56 = vld [vmem:[#allocation78_spill] sm:$0xff] }
 0x6c8   :  { %v4422_v6 = vadd.f32 %v4421_v0, %v4420_v50  ;;  %v4364_v17 = vmul.f32 %v4227_v20, %v10590_v11  ;;  %v4423_v1 = vsel %vm124_vm1, %v4360_v41, 0.0  ;;  %v4239_v12 = vrot.slane %v3983_v21, %v10530_v53  ;;  %v10593_v50 = vld [vmem:[#allocation75_spill] sm:$0xff] }
 0x6c9   :  { %v4483_v62 = vadd.f32 %v4482_v60, %v4481_v10  ;;  %v4363_v29 = vmul.f32 %v4223_v46, %v10591_v24  ;;  %v4484_v44 = vsel %vm2661_vm4, %v4359_v40, 0.0  ;;  %v4366_v63 = vmul.f32 %v4235_v2, %v10592_v56  ;;  %v10594_v60 = vld [vmem:[#allocation80_spill] sm:$0xff] }
 0x6ca   :  { %v4424_v4 = vadd.f32 %v4423_v1, %v4422_v6  ;;  %v4425_v26 = vsel %vm124_vm1, %v4362_v37, 0.0  ;;  %v4365_v0 = vmul.f32 %v4231_v7, %v10593_v50  ;;  %v4486_v20 = vsel %vm2661_vm4, %v4361_v13, 0.0 }
 0x6cb   :  { %v4485_v57 = vadd.f32 %v4484_v44, %v4483_v62  ;;  %v4427_v41 = vsel %vm124_vm1, %v4364_v17, 0.0  ;;  %v4367_v21 = vmul.f32 %v4239_v12, %v10594_v60  ;;  %v4488_v46 = vsel %vm2661_vm4, %v4363_v29, 0.0  ;;  %v6757_v29 = vld [vmem:[%s10040_s2 + $0x10] sm:$0x3]  ;;  %v6758_v12 = vld [vmem:[%s10040_s2 + $0x8] sm:$0xff]  ;;  %v6759_v44 = vld [vmem:[%s10040_s2] sm:$0xff] }
 0x6cc   :  { %v4426_v35 = vadd.f32 %v4425_v26, %v4424_v4  ;;  %v4429_v40 = vsel %vm124_vm1, %v4366_v63, 0.0  ;;  %v4490_v2 = vsel %vm2661_vm4, %v4365_v0, 0.0  ;;  %v10597_v0 = vld [vmem:[#allocation16_spill] sm:$0xff] }
 0x6cd   :  { %v4487_v10 = vadd.f32 %v4486_v20, %v4485_v57  ;;  %v4492_v7 = vsel %vm2661_vm4, %v4367_v21, 0.0  ;;  %v10598_v20 = vld [vmem:[#allocation19_spill] sm:$0xff] }
 0x6ce   :  { %v4428_v6 = vadd.f32 %v4427_v41, %v4426_v35 }
 0x6cf   :  { %v4489_v1 = vadd.f32 %v4488_v46, %v4487_v10  ;;  %v10599_v10 = vld [vmem:[#allocation20_spill] sm:$0xff]  ;;  %v10600_v46 = vld [vmem:[#allocation23_spill] sm:$0xff] }
 0x6d0   :  { %v8899_v37 = vadd.f32 %v4429_v40, %v4428_v6 }
 0x6d1   :  { %v4491_v62 = vadd.f32 %v4490_v2, %v4489_v1  ;;  %v10601_v1 = vld [vmem:[#allocation24_spill] sm:$0xff] }
 0x6d2   :  { %v4494_v13 = vmul.f32 %v8899_v37, %v8899_v37 }
 0x6d3   :  { %v8902_v4 = vadd.f32 %v4492_v7, %v4491_v62  ;;  %v10602_v62 = vld [vmem:[#allocation31_spill] sm:$0xff] }
 0x6d5   :  { %v4495_v17 = vmul.f32 %v8902_v4, %v8902_v4 }
 0x6d7   :  { %6585 = vmatprep.mubr.msk.f32.mxu1 %vm2727_vm5, %v4495_v17  ;;  %v10604_v17 = vld [vmem:[#allocation35_spill] sm:$0xff] }
 0x6d8   :  { %4564 = vmatmul.mubr.f32.vlgmr.msra.gmra.mxu1 %v4494_v13 }
 0x6d9   :  { %6594 = vmatpush1.msk.msra.mxu1 %vm1910_vm3, %v6757_v29  ;;  %5512 = vmatprep.mubr.f32.mxu1 %v10506_v15 }
 0x6da   :  { %5478 = vmatprep.subr.mxu1 %v6758_v12  ;;  %v10605_v12 = vld [vmem:[#allocation36_spill] sm:$0xff] }
 0x6db   :  { %5479 = vmatpush1.msra.mxu1 %v6759_v44 }
 0x6dc   :  { %6260 = vmatprep.subr.mxu1 %v10506_v15 }
 0x798   :  { %v4565_v63 = vpop.f32.mrf.mxu1 }
 0x799   :  { %6588 = vmatmul.mubr.msk.f32.vlgmr.msra.gmra.mxu0 %vm1901_vm0, %v4565_v63  ;;  %v10606_v63 = vld [vmem:[#allocation39_spill] sm:$0xff] }
 0x79a   :  { %v4567_v26 = vpop.f32.mrf.mxu1  ;;  %5300 = vmatpush1.msra.mxu0 %v8533_v23 }
 0x79b   :  { %5301 = vmatprep.subr.mxu0 %v10506_v15 }
 0x79c   :  { %5302 = vmatpush1.msra.mxu0 %v8540_v42 }
 0x79d   :  { %5303 = vmatprep.subr.mxu0 %v10506_v15 }
 0x79e   :  { %5304 = vmatpush1.msra.mxu0 %v8547_v49 }
 0x79f   :  { %5305 = vmatprep.subr.mxu0 %v10506_v15 }
 0x7a0   :  { %5306 = vmatpush1.msra.mxu0 %v8554_v25 }
 0x7a1   :  { %5307 = vmatprep.subr.mxu0 %v10506_v15 }
 0x7a2   :  { %5308 = vmatpush1.msra.mxu0 %v8561_v43 }
 0x7a3   :  { %5309 = vmatprep.subr.mxu0 %v10506_v15 }
 0x7a4   :  { %5310 = vmatpush1.msra.mxu0 %v8568_v30 }
 0x7a5   :  { %5311 = vmatprep.subr.mxu0 %v10506_v15 }
 0x7a6   :  { %5312 = vmatpush1.msra.mxu0 %v8577_v61 }
 0x7a7   :  { %5313 = vmatprep.subr.mxu0 %v10506_v15 }
 0x7a8   :  { %5314 = vmatpush1.msra.mxu0 %v8584_v55 }
 0x7a9   :  { %5315 = vmatprep.subr.mxu0 %v10506_v15 }
 0x7aa   :  { %5316 = vmatpush1.msra.mxu0 %v8591_v5 }
 0x7ab   :  { %5317 = vmatprep.subr.mxu0 %v10506_v15 }
 0x7ac   :  { %5318 = vmatpush1.msra.mxu0 %v8598_v19 }
 0x7ad   :  { %5319 = vmatprep.subr.mxu0 %v10506_v15 }
 0x7ae   :  { %5320 = vmatpush1.msra.mxu0 %v8607_v3 }
 0x7af   :  { %5321 = vmatprep.subr.mxu0 %v10506_v15 }
 0x7b0   :  { %5322 = vmatpush1.msra.mxu0 %v8614_v51 }
 0x7b1   :  { %5323 = vmatprep.subr.mxu0 %v10506_v15 }
 0x7b2   :  { %5324 = vmatpush1.msra.mxu0 %v8621_v16 }
 0x7b3   :  { %5325 = vmatprep.subr.mxu0 %v10506_v15 }
 0x7b4   :  { %5326 = vmatpush1.msra.mxu0 %v8628_v8 }
 0x7b5   :  { %5327 = vmatprep.subr.mxu0 %v10506_v15 }
 0x7b6   :  { %5328 = vmatpush1.msra.mxu0 %v8636_v45 }
 0x7b7   :  { %5329 = vmatprep.subr.mxu0 %v10506_v15 }
 0x7b8   :  { %5330 = vmatpush1.msra.mxu0 %v8644_v33 }
 0x7b9   :  { %5355 = vmatprep.subr.mxu0 %v10506_v15 }
 0x7ba   :  { %5356 = vmatpush2.msra.mxu0 %v8651_v18 }
 0x7bb   :  { %5357 = vmatprep.subr.mxu0 %v10506_v15 }
 0x7bc   :  { %5358 = vmatpush2.msra.mxu0 %v8658_v28  ;;  %v10595_v28 = vld [vmem:[#allocation12_spill] sm:$0xff] }
 0x7bd   :  { %5359 = vmatprep.subr.mxu0 %v10506_v15 }
 0x7be   :  { %5360 = vmatpush2.msra.mxu0 %v8665_v59 }
 0x7bf   :  { %5361 = vmatprep.subr.mxu0 %v10506_v15 }
 0x7c0   :  { %5362 = vmatpush2.msra.mxu0 %v8672_v47  ;;  %v10596_v47 = vld [vmem:[#allocation15_spill] sm:$0xff] }
 0x859   :  { %v4638_v23 = vpop.f32.mrf.mxu0 }
 0x85a   :  { %v4643_v42 = vadd.f32 1.0, %v4638_v23  ;;  %6697 = vrcp.f32 %v4638_v23 }
 0x85b   :  { %v4640_v49 = vpop.f32.mrf.mxu0 }
 0x85c   :  { %6699 = vrcp.f32 %v4643_v42  ;;  %v4644_v25 = vadd.f32 1.0, %v4640_v49 }
 0x85d   :  { %6701 = vrcp.f32 %v4640_v49 }
 0x85e   :  { %6703 = vrcp.f32 %v4644_v25 }
 0x867   :  { %v6698_v43 = vpop.eup %6697 }
 0x868   :  { %v4650_v5 = vmul.f32 %v6698_v43, %v8899_v37 }
 0x869   :  { %v6700_v30 = vpop.eup %6699 }
 0x86a   :  { %v6702_v61 = vpop.eup %6701  ;;  %v4646_v55 = vmul.f32 %v6700_v30, %v4638_v23  ;;  %v10607_v23 = vld [vmem:[#allocation40_spill] sm:$0xff] }
 0x86b   :  { %v6704_v19 = vpop.eup %6703  ;;  %v4652_v51 = vmul.f32 %v6702_v61, %v8902_v4  ;;  %v10603_v4 = vld [vmem:[#allocation32_spill] sm:$0xff] }
 0x86c   :  { %v4653_v3 = vmul.f32 %v4650_v5, %v4646_v55  ;;  %v4648_v33 = vmul.f32 %v6704_v19, %v4640_v49  ;;  %v10608_v49 = vld [vmem:[#allocation43_spill] sm:$0xff]  ;;  %v10610_v19 = vld [vmem:[#allocation52_spill] sm:$0xff] }
 0x86d   :  { %v10609_v55 = vld [vmem:[#allocation51_spill] sm:$0xff] }
 0x86e   :  { %v4655_v16 = vmul.f32 %v4653_v3, %v10531_v34  ;;  %v4657_v8 = vmul.f32 %v4653_v3, %v10532_v27  ;;  %v4659_v45 = vmul.f32 %v4653_v3, %v10535_v31  ;;  %v4661_v18 = vmul.f32 %v4653_v3, %v10537_v32 }
 0x86f   :  { %v4663_v59 = vmul.f32 %v4653_v3, %v10595_v28  ;;  %v4665_v57 = vmul.f32 %v4653_v3, %v10596_v47  ;;  %v4667_v35 = vmul.f32 %v4653_v3, %v10597_v0  ;;  %v8971_v41 = vmul.f32 %v4653_v3, %v10598_v20  ;;  %v10621_v0 = vld [vmem:[#allocation22_spill] sm:$0xff] }
 0x870   :  { %v8974_v21 = vmul.f32 %v4653_v3, %v10599_v10  ;;  %v8977_v6 = vmul.f32 %v4653_v3, %v10600_v46  ;;  %v8980_v40 = vmul.f32 %v4653_v3, %v10601_v1  ;;  %v8983_v2 = vmul.f32 %v4653_v3, %v10553_v39  ;;  %v10620_v10 = vld [vmem:[#allocation21_spill] sm:$0xff] }
 0x871   :  { %v8986_v37 = vmul.f32 %v4653_v3, %v10555_v38  ;;  %v8989_v7 = vmul.f32 %v4653_v3, %v10602_v62  ;;  %v8992_v13 = vmul.f32 %v4653_v3, %v10603_v4  ;;  %v8995_v29 = vmul.f32 %v4653_v3, %v10604_v17 }
 0x872   :  { %v8998_v44 = vmul.f32 %v4653_v3, %v10605_v12  ;;  %v9001_v26 = vmul.f32 %v4653_v3, %v10606_v63  ;;  %v9004_v42 = vmul.f32 %v4653_v3, %v10607_v23  ;;  %v9007_v25 = vmul.f32 %v4653_v3, %v10608_v49  ;;  %v10611_v23 = vld [vmem:[#allocation55_spill] sm:$0xff]  ;;  %v10612_v49 = vld [vmem:[#allocation56_spill] sm:$0xff] }
 0x873   :  { %v9010_v43 = vmul.f32 %v4653_v3, %v10570_v54  ;;  %v9013_v30 = vmul.f32 %v4653_v3, %v10573_v52  ;;  %v9016_v61 = vmul.f32 %v4653_v3, %v10575_v14  ;;  %v9019_v5 = vmul.f32 %v4653_v3, %v10609_v55 }
 0x874   :  { %v9022_v63 = vmul.f32 %v4653_v3, %v10610_v19  ;;  %v9025_v12 = vmul.f32 %v4653_v3, %v10611_v23  ;;  %v9028_v17 = vmul.f32 %v4653_v3, %v10612_v49  ;;  %v9031_v54 = vmul.f32 %v4653_v3, %v10584_v22 }
 0x875   :  { %v9034_v52 = vmul.f32 %v4653_v3, %v10586_v48  ;;  %v9037_v14 = vmul.f32 %v4653_v3, %v10588_v36  ;;  %v9040_v55 = vmul.f32 %v4653_v3, %v10590_v11  ;;  %v9043_v19 = vmul.f32 %v4653_v3, %v10592_v56  ;;  %v10613_v3 = vld [vmem:[#allocation6_spill] sm:$0xff] }
 0x876   :  { %v4654_v23 = vmul.f32 %v4652_v51, %v4648_v33  ;;  %v9046_v4 = vsel %vm124_vm1, %v4655_v16, 0.0  ;;  %v9049_v49 = vsel %vm124_vm1, %v4657_v8, 0.0  ;;  %v9052_v22 = vsel %vm124_vm1, %v4659_v45, 0.0  ;;  %v10614_v33 = vld [vmem:[#allocation9_spill] sm:$0xff]  ;;  %v10615_v56 = vld [vmem:[#allocation10_spill] sm:$0xff] }
 0x877   :  { %v9055_v48 = vsel %vm124_vm1, %v4661_v18, 0.0  ;;  %v9058_v36 = vsel %vm124_vm1, %v4663_v59, 0.0  ;;  %v9061_v11 = vsel %vm124_vm1, %v4665_v57, 0.0  ;;  %v9067_v8 = vsel %vm124_vm1, %v4667_v35, 0.0  ;;  %v10616_v45 = vld [vmem:[#allocation13_spill] sm:$0xff]  ;;  %v10617_v18 = vld [vmem:[#allocation14_spill] sm:$0xff] }
 0x878   :  { %v4656_v51 = vmul.f32 %v4654_v23, %v10613_v3  ;;  %v4658_v16 = vmul.f32 %v4654_v23, %v10614_v33  ;;  %v4660_v62 = vmul.f32 %v4654_v23, %v10615_v56  ;;  %v9070_v38 = vmul.f32 %v4654_v23, %v10616_v45  ;;  %v10618_v59 = vld [vmem:[#allocation17_spill] sm:$0xff]  ;;  %v10619_v57 = vld [vmem:[#allocation18_spill] sm:$0xff] }
 0x879   :  { %v9073_v39 = vmul.f32 %v4654_v23, %v10617_v18  ;;  %v9076_v1 = vmul.f32 %v4654_v23, %v10618_v59  ;;  %v9079_v46 = vmul.f32 %v4654_v23, %v10619_v57  ;;  %v9082_v20 = vmul.f32 %v4654_v23, %v10620_v10  ;;  %v10622_v35 = vld [vmem:[#allocation25_spill] sm:$0xff]  ;;  %v10623_v45 = vld [vmem:[#allocation26_spill] sm:$0xff] }
 0x87a   :  { %v9085_v47 = vmul.f32 %v4654_v23, %v10621_v0  ;;  %v9088_v28 = vmul.f32 %v4654_v23, %v10622_v35  ;;  %v9091_v32 = vmul.f32 %v4654_v23, %v10623_v45  ;;  %v10624_v18 = vld [vmem:[#allocation29_spill] sm:$0xff]  ;;  %v10625_v59 = vld [vmem:[#allocation30_spill] sm:$0xff] }
 0x87b   :  { %v9094_v56 = vmul.f32 %v4654_v23, %v10624_v18  ;;  %v9097_v31 = vmul.f32 %v4654_v23, %v10625_v59  ;;  %v10627_v57 = vld [vmem:[#allocation33_spill] sm:$0xff]  ;;  %v10629_v10 = vld [vmem:[#allocation34_spill] sm:$0xff] }
 0x87c   :  { %v9100_v33 = vmul.f32 %v4654_v23, %v10627_v57  ;;  %v9103_v3 = vmul.f32 %v4654_v23, %v10629_v10  ;;  %v10631_v0 = vld [vmem:[#allocation37_spill] sm:$0xff]  ;;  %v10633_v35 = vld [vmem:[#allocation38_spill] sm:$0xff] }
 0x87d   :  { %10626 = vst [vmem:[#allocation93_spill] sm:$0xff] %v9097_v31  ;;  %v9106_v27 = vmul.f32 %v4654_v23, %v10631_v0  ;;  %v9109_v34 = vmul.f32 %v4654_v23, %v10633_v35  ;;  %v10635_v45 = vld [vmem:[#allocation41_spill] sm:$0xff]  ;;  %v10637_v18 = vld [vmem:[#allocation42_spill] sm:$0xff] }
 0x87e   :  { %10628 = vst [vmem:[#allocation79_spill] sm:$0xff] %v9100_v33  ;;  %10630 = vst [vmem:[#allocation94_spill] sm:$0xff] %v9103_v3  ;;  %v9112_v53 = vmul.f32 %v4654_v23, %v10635_v45  ;;  %v9115_v15 = vmul.f32 %v4654_v23, %v10637_v18  ;;  %v10639_v59 = vld [vmem:[#allocation45_spill] sm:$0xff]  ;;  %v10641_v57 = vld [vmem:[#allocation46_spill] sm:$0xff] }
 0x87f   :  { %10632 = vst [vmem:[#allocation81_spill] sm:$0xff] %v9106_v27  ;;  %10634 = vst [vmem:[#allocation95_spill] sm:$0xff] %v9109_v34  ;;  %v9118_v31 = vmul.f32 %v4654_v23, %v10639_v59  ;;  %v9121_v33 = vmul.f32 %v4654_v23, %v10641_v57  ;;  %v10642_v10 = vld [vmem:[#allocation49_spill] sm:$0xff]  ;;  %v10643_v0 = vld [vmem:[#allocation50_spill] sm:$0xff]  ;;  %v9142_v57 = vmul.f32 %v4654_v23, %v10587_v58  ;;  %v9162_v58 = vsel %vm124_vm1, %v8974_v21, 0.0 }
 0x880   :  { %10636 = vst [vmem:[#allocation82_spill] sm:$0xff] %v9112_v53  ;;  %10638 = vst [vmem:[#allocation96_spill] sm:$0xff] %v9115_v15  ;;  %v9124_v3 = vmul.f32 %v4654_v23, %v10642_v10  ;;  %v9127_v27 = vmul.f32 %v4654_v23, %v10643_v0  ;;  %v10644_v35 = vld [vmem:[#allocation53_spill] sm:$0xff]  ;;  %v10646_v45 = vld [vmem:[#allocation54_spill] sm:$0xff]  ;;  %v9145_v10 = vmul.f32 %v4654_v23, %v10589_v9  ;;  %v9166_v9 = vsel %vm124_vm1, %v8977_v6, 0.0 }
 0x881   :  { %10640 = vst [vmem:[#allocation83_spill] sm:$0xff] %v9118_v31  ;;  %v9130_v34 = vmul.f32 %v4654_v23, %v10644_v35  ;;  %v9133_v53 = vmul.f32 %v4654_v23, %v10646_v45  ;;  %v10648_v18 = vld [vmem:[#allocation57_spill] sm:$0xff]  ;;  %v10650_v59 = vld [vmem:[#allocation58_spill] sm:$0xff]  ;;  %10652 = vst [vmem:[#allocation61_spill] sm:$0xff] %v9142_v57  ;;  %v9148_v0 = vmul.f32 %v4654_v23, %v10591_v24  ;;  %v9170_v24 = vsel %vm124_vm1, %v8980_v40, 0.0 }
 0x882   :  { %v9136_v15 = vmul.f32 %v4654_v23, %v10648_v18  ;;  %v9139_v31 = vmul.f32 %v4654_v23, %v10650_v59  ;;  %10653 = vst [vmem:[#allocation59_spill] sm:$0xff] %v9145_v10  ;;  %v9151_v35 = vmul.f32 %v4654_v23, %v10593_v50  ;;  %v9154_v45 = vmul.f32 %v4654_v23, %v10594_v60 }
 0x883   :  { %10645 = vst [vmem:[#allocation97_spill] sm:$0xff] %v9130_v34  ;;  %10647 = vst [vmem:[#allocation84_spill] sm:$0xff] %v9133_v53  ;;  %v9158_v18 = vsel %vm124_vm1, %v8971_v41, 0.0  ;;  %v9174_v23 = vsel %vm124_vm1, %v8983_v2, 0.0  ;;  %v9178_v41 = vsel %vm124_vm1, %v8986_v37, 0.0  ;;  %v9182_v21 = vsel %vm124_vm1, %v8989_v7, 0.0 }
 0x884   :  { %10649 = vst [vmem:[#allocation85_spill] sm:$0xff] %v9136_v15  ;;  %10651 = vst [vmem:[#allocation60_spill] sm:$0xff] %v9139_v31  ;;  %v9186_v6 = vsel %vm124_vm1, %v8992_v13, 0.0  ;;  %v9190_v40 = vsel %vm124_vm1, %v8995_v29, 0.0  ;;  %v9194_v2 = vsel %vm124_vm1, %v8998_v44, 0.0  ;;  %v9198_v37 = vsel %vm124_vm1, %v9001_v26, 0.0 }
 0x885   :  { %10654 = vst [vmem:[#allocation86_spill] sm:$0xff] %v9148_v0  ;;  %10655 = vst [vmem:[#allocation98_spill] sm:$0xff] %v9151_v35  ;;  %v9202_v7 = vsel %vm124_vm1, %v9004_v42, 0.0  ;;  %v9206_v13 = vsel %vm124_vm1, %v9007_v25, 0.0  ;;  %v9210_v29 = vsel %vm124_vm1, %v9010_v43, 0.0  ;;  %v9214_v44 = vsel %vm124_vm1, %v9013_v30, 0.0 }
 0x886   :  { %10656 = vst [vmem:[#allocation99_spill] sm:$0xff] %v9154_v45  ;;  %10657 = vst [vmem:[#allocation100_spill] sm:$0xff] %v9190_v40  ;;  %v9218_v26 = vsel %vm124_vm1, %v9016_v61, 0.0  ;;  %v9222_v42 = vsel %vm124_vm1, %v9019_v5, 0.0  ;;  %v9226_v25 = vsel %vm124_vm1, %v9022_v63, 0.0  ;;  %v9230_v43 = vsel %vm124_vm1, %v9025_v12, 0.0 }
 0x887   :  { %10658 = vst [vmem:[#allocation66_spill] sm:$0xff] %v9222_v42  ;;  %10659 = vst [vmem:[#allocation101_spill] sm:$0xff] %v9226_v25  ;;  %v9234_v30 = vsel %vm124_vm1, %v9028_v17, 0.0  ;;  %v9238_v61 = vsel %vm124_vm1, %v9031_v54, 0.0  ;;  %v9242_v5 = vsel %vm124_vm1, %v9034_v52, 0.0  ;;  %v9246_v63 = vsel %vm124_vm1, %v9037_v14, 0.0 }
 0x888   :  { %10660 = vst [vmem:[#allocation102_spill] sm:$0xff] %v9230_v43  ;;  %10661 = vst [vmem:[#allocation71_spill] sm:$0xff] %v9234_v30  ;;  %v9250_v12 = vsel %vm124_vm1, %v9040_v55, 0.0  ;;  %v4720_v60 = vrot.slane %v9046_v4, 4  ;;  %v4726_v17 = vsel %vm2661_vm4, %v4656_v51, 0.0  ;;  %v4734_v50 = vrot.slane %v9049_v49, 4 }
 0x889   :  { %10662 = vst [vmem:[#allocation74_spill] sm:$0xff] %v9238_v61  ;;  %10663 = vst [vmem:[#allocation87_spill] sm:$0xff] %v9242_v5  ;;  %v4727_v54 = vrot.slane %v4726_v17, 4  ;;  %v4740_v59 = vsel %vm2661_vm4, %v4658_v16, 0.0  ;;  %v4748_v52 = vrot.slane %v9052_v22, 4  ;;  %v4754_v45 = vsel %vm2661_vm4, %v4660_v62, 0.0 }
 0x88a   :  { %10664 = vst [vmem:[#allocation63_spill] sm:$0xff] %v9246_v63  ;;  %10665 = vst [vmem:[#allocation68_spill] sm:$0xff] %v9250_v12  ;;  %v4721_v14 = vadd.f32 %v4720_v60, %v9046_v4  ;;  %v4735_v35 = vadd.f32 %v4734_v50, %v9049_v49  ;;  %v4741_v0 = vrot.slane %v4740_v59, 4  ;;  %v4755_v55 = vrot.slane %v4754_v45, 4 }
 0x88b   :  { %v4728_v12 = vadd.f32 %v4727_v54, %v4726_v17  ;;  %v4749_v63 = vadd.f32 %v4748_v52, %v9052_v22  ;;  %v4762_v51 = vrot.slane %v9055_v48, 4  ;;  %v4768_v10 = vsel %vm2661_vm4, %v9070_v38, 0.0 }
 0x88c   :  { %v4722_v5 = vrot.slane %v4721_v14, 2  ;;  %v4736_v16 = vrot.slane %v4735_v35, 2  ;;  %v4742_v57 = vadd.f32 %v4741_v0, %v4740_v59  ;;  %v4756_v61 = vadd.f32 %v4755_v55, %v4754_v45 }
 0x88d   :  { %v4729_v31 = vrot.slane %v4728_v12, 2  ;;  %v4750_v62 = vrot.slane %v4749_v63, 2  ;;  %v4763_v60 = vadd.f32 %v4762_v51, %v9055_v48  ;;  %v4769_v4 = vrot.slane %v4768_v10, 4 }
 0x88e   :  { %v4723_v50 = vadd.f32 %v4722_v5, %v4721_v14  ;;  %v4737_v49 = vadd.f32 %v4736_v16, %v4735_v35  ;;  %v4743_v30 = vrot.slane %v4742_v57, 2  ;;  %v4757_v17 = vrot.slane %v4756_v61, 2 }
 0x88f   :  { %v4730_v54 = vadd.f32 %v4729_v31, %v4728_v12  ;;  %v4751_v22 = vadd.f32 %v4750_v62, %v4749_v63  ;;  %v4764_v52 = vrot.slane %v4763_v60, 2  ;;  %v4770_v15 = vadd.f32 %v4769_v4, %v4768_v10 }
 0x890   :  { %v4724_v43 = vrot.slane %v4723_v50, 1  ;;  %v4738_v53 = vrot.slane %v4737_v49, 1  ;;  %v4744_v38 = vadd.f32 %v4743_v30, %v4742_v57  ;;  %v4758_v25 = vadd.f32 %v4757_v17, %v4756_v61 }
 0x891   :  { %v4731_v34 = vrot.slane %v4730_v54, 1  ;;  %v4752_v0 = vrot.slane %v4751_v22, 1  ;;  %v4765_v45 = vadd.f32 %v4764_v52, %v4763_v60  ;;  %v4771_v59 = vrot.slane %v4770_v15, 2 }
 0x892   :  { %v9267_v48 = vsel %vm124_vm1, %v9043_v19, 0.0  ;;  %v9269_v5 = vadd.f32 %v4724_v43, %v4723_v50  ;;  %v4745_v35 = vrot.slane %v4744_v38, 1  ;;  %v4759_v14 = vrot.slane %v4758_v25, 1 }
 0x893   :  { %v9271_v31 = vadd.f32 %v4731_v34, %v4730_v54  ;;  %v9273_v63 = vadd.f32 %v4738_v53, %v4737_v49  ;;  %v4766_v10 = vrot.slane %v4765_v45, 1  ;;  %v4772_v12 = vadd.f32 %v4771_v59, %v4770_v15 }
 0x894   :  { %v9275_v57 = vadd.f32 %v4745_v35, %v4744_v38  ;;  %v9277_v30 = vadd.f32 %v4752_v0, %v4751_v22  ;;  %v4776_v61 = vrot.slane %v9058_v36, 4  ;;  %v4782_v19 = vsel %vm2661_vm4, %v9073_v39, 0.0 }
 0x895   :  { %v9282_v55 = vadd.f32 %v4759_v14, %v4758_v25  ;;  %v4773_v43 = vrot.slane %v4772_v12, 1  ;;  %v4783_v51 = vrot.slane %v4782_v19, 4  ;;  %v4790_v34 = vrot.slane %v9061_v11, 4 }
 0x896   :  { %v4777_v53 = vadd.f32 %v4776_v61, %v9058_v36  ;;  %v4796_v15 = vsel %vm2661_vm4, %v9076_v1, 0.0  ;;  %v4804_v16 = vrot.slane %v9067_v8, 4  ;;  %v4810_v62 = vsel %vm2661_vm4, %v9079_v46, 0.0 }
 0x897   :  { %v9291_v60 = vadd.f32 %v4766_v10, %v4765_v45  ;;  %v4784_v4 = vadd.f32 %v4783_v51, %v4782_v19  ;;  %v4791_v39 = vadd.f32 %v4790_v34, %v9061_v11  ;;  %v4797_v25 = vrot.slane %v4796_v15, 4 }
 0x898   :  { %v4778_v50 = vrot.slane %v4777_v53, 2  ;;  %v9295_v49 = vadd.f32 %v4804_v16, %v9067_v8  ;;  %v4811_v17 = vrot.slane %v4810_v62, 4  ;;  %v4818_v36 = vrot.slane %v9158_v18, 4 }
 0x899   :  { %v4785_v54 = vrot.slane %v4784_v4, 2  ;;  %v4792_v1 = vrot.slane %v4791_v39, 2  ;;  %v4798_v22 = vadd.f32 %v4797_v25, %v4796_v15  ;;  %v4824_v52 = vsel %vm2661_vm4, %v9082_v20, 0.0 }
 0x89a   :  { %v9300_v46 = vadd.f32 %v4773_v43, %v4772_v12  ;;  %v9302_v38 = vadd.f32 %v4778_v50, %v4777_v53  ;;  %v9305_v0 = vadd.f32 %v4811_v17, %v4810_v62  ;;  %v9312_v35 = vadd.f32 %v4818_v36, %v9158_v18 }
 0x89b   :  { %v9307_v45 = vadd.f32 %v4785_v54, %v4784_v4  ;;  %v9309_v8 = vadd.f32 %v4792_v1, %v4791_v39  ;;  %v4799_v59 = vrot.slane %v4798_v22, 2  ;;  %v4825_v10 = vrot.slane %v4824_v52, 4 }
 0x89c   :  { %v4832_v20 = vrot.slane %v9162_v58, 4  ;;  %v4838_v12 = vsel %vm2661_vm4, %v9085_v47, 0.0  ;;  %v4846_v18 = vrot.slane %v9166_v9, 4  ;;  %v4852_v53 = vsel %vm2661_vm4, %v9088_v28, 0.0 }
 0x89d   :  { %v9319_v19 = vadd.f32 %v4799_v59, %v4798_v22  ;;  %v4839_v51 = vrot.slane %v4838_v12, 4  ;;  %v4860_v15 = vrot.slane %v9170_v24, 4  ;;  %v4853_v62 = vrot.slane %v4852_v53, 4 }
 0x89e   :  { %v4833_v34 = vadd.f32 %v4832_v20, %v9162_v58  ;;  %v4866_v47 = vsel %vm2661_vm4, %v9091_v32, 0.0  ;;  %v4874_v4 = vrot.slane %v9174_v23, 4  ;;  %v4847_v25 = vadd.f32 %v4846_v18, %v9166_v9 }
 0x89f   :  { %v4840_v16 = vadd.f32 %v4839_v51, %v4838_v12  ;;  %v4861_v50 = vadd.f32 %v4860_v15, %v9170_v24  ;;  %v4867_v58 = vrot.slane %v4866_v47, 4  ;;  %v4854_v36 = vadd.f32 %v4853_v62, %v4852_v53 }
 0x8a0   :  { %v4834_v39 = vrot.slane %v4833_v34, 2  ;;  %v4875_v54 = vadd.f32 %v4874_v4, %v9174_v23  ;;  %v4880_v28 = vsel %vm2661_vm4, %v9094_v56, 0.0  ;;  %v4848_v22 = vrot.slane %v4847_v25, 2 }
 0x8a1   :  { %v4841_v17 = vrot.slane %v4840_v16, 2  ;;  %v4862_v59 = vrot.slane %v4861_v50, 2  ;;  %v4868_v20 = vadd.f32 %v4867_v58, %v4866_v47  ;;  %v4855_v12 = vrot.slane %v4854_v36, 2 }
 0x8a2   :  { %v4835_v1 = vadd.f32 %v4834_v39, %v4833_v34  ;;  %v4876_v51 = vrot.slane %v4875_v54, 2  ;;  %v4881_v11 = vrot.slane %v4880_v28, 4  ;;  %v4849_v9 = vadd.f32 %v4848_v22, %v4847_v25 }
 0x8a3   :  { %v4842_v32 = vadd.f32 %v4841_v17, %v4840_v16  ;;  %v4863_v18 = vadd.f32 %v4862_v59, %v4861_v50  ;;  %v4869_v24 = vrot.slane %v4868_v20, 2  ;;  %v4856_v61 = vadd.f32 %v4855_v12, %v4854_v36  ;;  %v10671_v59 = vld [vmem:[#allocation79_spill] sm:$0xff] }
 0x8a4   :  { %v4836_v14 = vrot.slane %v4835_v1, 1  ;;  %v9335_v53 = vadd.f32 %v4876_v51, %v4875_v54  ;;  %v4882_v23 = vadd.f32 %v4881_v11, %v4880_v28  ;;  %v9337_v62 = vadd.f32 %v4825_v10, %v4824_v52  ;;  %v10670_v11 = vld [vmem:[#allocation93_spill] sm:$0xff] }
 0x8a5   :  { %v4843_v15 = vrot.slane %v4842_v32, 1  ;;  %v4850_v56 = vrot.slane %v4849_v9, 1  ;;  %v4864_v34 = vrot.slane %v4863_v18, 1  ;;  %v4870_v4 = vadd.f32 %v4869_v24, %v4868_v20 }
 0x8a6   :  { %10666 = vst [vmem:[#allocation69_spill] sm:$0xff] %v9335_v53  ;;  %v9339_v39 = vadd.f32 %v4836_v14, %v4835_v1  ;;  %v4857_v47 = vrot.slane %v4856_v61, 1  ;;  %v4883_v58 = vrot.slane %v4882_v23, 2  ;;  %v4888_v36 = vrot.slane %v9178_v41, 4 }
 0x8a7   :  { %v9341_v16 = vadd.f32 %v4843_v15, %v4842_v32  ;;  %v9343_v17 = vadd.f32 %v4850_v56, %v4849_v9  ;;  %v4871_v25 = vrot.slane %v4870_v4, 1  ;;  %v9347_v54 = vadd.f32 %v4864_v34, %v4863_v18 }
 0x8a8   :  { %10667 = vst [vmem:[#allocation103_spill] sm:$0xff] %v9339_v39  ;;  %v4884_v52 = vadd.f32 %v4883_v58, %v4882_v23  ;;  %v4894_v10 = vsel %vm2661_vm4, %v10670_v11, 0.0  ;;  %v4902_v14 = vrot.slane %v9182_v21, 4  ;;  %v9352_v28 = vadd.f32 %v4857_v47, %v4856_v61  ;;  %v10673_v23 = vld [vmem:[#allocation94_spill] sm:$0xff]  ;;  %v10675_v11 = vld [vmem:[#allocation81_spill] sm:$0xff] }
 0x8a9   :  { %10668 = vst [vmem:[#allocation104_spill] sm:$0xff] %v9343_v17  ;;  %10669 = vst [vmem:[#allocation105_spill] sm:$0xff] %v9347_v54  ;;  %v4889_v1 = vadd.f32 %v4888_v36, %v9178_v41  ;;  %v4895_v22 = vrot.slane %v4894_v10, 4  ;;  %v4908_v20 = vsel %vm2661_vm4, %v10671_v59, 0.0  ;;  %v4916_v9 = vrot.slane %v9186_v6, 4 }
 0x8aa   :  { %v4885_v32 = vrot.slane %v4884_v52, 1  ;;  %v9358_v12 = vadd.f32 %v4902_v14, %v9182_v21  ;;  %v4909_v51 = vrot.slane %v4908_v20, 4  ;;  %v9361_v18 = vadd.f32 %v4871_v25, %v4870_v4 }
 0x8ab   :  { %v4890_v24 = vrot.slane %v4889_v1, 2  ;;  %v4896_v15 = vadd.f32 %v4895_v22, %v4894_v10  ;;  %v4922_v61 = vsel %vm2661_vm4, %v10673_v23, 0.0  ;;  %v9370_v21 = vadd.f32 %v4916_v9, %v9186_v6  ;;  %v10676_v22 = vld [vmem:[#allocation95_spill] sm:$0xff] }
 0x8ac   :  { %10672 = vst [vmem:[#allocation93_spill] sm:$0xff] %v9358_v12  ;;  %v9365_v56 = vadd.f32 %v4885_v32, %v4884_v52  ;;  %v4910_v34 = vadd.f32 %v4909_v51, %v4908_v20  ;;  %v4923_v36 = vrot.slane %v4922_v61, 4  ;;  %v4936_v4 = vsel %vm2661_vm4, %v10675_v11, 0.0  ;;  %v10677_v11 = vld [vmem:[#allocation82_spill] sm:$0xff] }
 0x8ad   :  { %v4897_v58 = vrot.slane %v4896_v15, 2  ;;  %10674 = vst [vmem:[#allocation79_spill] sm:$0xff] %v9370_v21  ;;  %v4937_v10 = vrot.slane %v4936_v4, 4  ;;  %v4944_v14 = vrot.slane %v9194_v2, 4  ;;  %v4950_v52 = vsel %vm2661_vm4, %v10676_v22, 0.0 }
 0x8ae   :  { %v4911_v25 = vrot.slane %v4910_v34, 2  ;;  %v9377_v59 = vadd.f32 %v4890_v24, %v4889_v1  ;;  %v4951_v32 = vrot.slane %v4950_v52, 4  ;;  %v4958_v51 = vrot.slane %v9198_v37, 4 }
 0x8af   :  { %v9379_v20 = vadd.f32 %v4897_v58, %v4896_v15  ;;  %v9384_v9 = vadd.f32 %v4923_v36, %v4922_v61  ;;  %v4945_v23 = vadd.f32 %v4944_v14, %v9194_v2  ;;  %v4964_v47 = vsel %vm2661_vm4, %v10677_v11, 0.0 }
 0x8b0   :  { %v9382_v6 = vadd.f32 %v4911_v25, %v4910_v34  ;;  %v9390_v41 = vadd.f32 %v4937_v10, %v4936_v4  ;;  %v4952_v1 = vadd.f32 %v4951_v32, %v4950_v52  ;;  %v4959_v24 = vadd.f32 %v4958_v51, %v9198_v37  ;;  %v10678_v34 = vld [vmem:[#allocation96_spill] sm:$0xff]  ;;  %v10679_v10 = vld [vmem:[#allocation83_spill] sm:$0xff] }
 0x8b1   :  { %v4946_v15 = vrot.slane %v4945_v23, 2  ;;  %v4965_v58 = vrot.slane %v4964_v47, 4  ;;  %v4972_v22 = vrot.slane %v9202_v7, 4  ;;  %v4978_v61 = vsel %vm2661_vm4, %v10678_v34, 0.0 }
 0x8b2   :  { %v4953_v36 = vrot.slane %v4952_v1, 2  ;;  %v4960_v25 = vrot.slane %v4959_v24, 2  ;;  %v4979_v2 = vrot.slane %v4978_v61, 4  ;;  %v4986_v14 = vrot.slane %v9206_v13, 4 }
 0x8b3   :  { %v4947_v11 = vadd.f32 %v4946_v15, %v4945_v23  ;;  %v4966_v43 = vadd.f32 %v4965_v58, %v4964_v47  ;;  %v4973_v4 = vadd.f32 %v4972_v22, %v9202_v7  ;;  %v4992_v52 = vsel %vm2661_vm4, %v10679_v10, 0.0  ;;  %v10693_v47 = vld [vmem:[#allocation71_spill] sm:$0xff] }
 0x8b4   :  { %v4954_v37 = vadd.f32 %v4953_v36, %v4952_v1  ;;  %v4961_v32 = vadd.f32 %v4960_v25, %v4959_v24  ;;  %v4980_v51 = vadd.f32 %v4979_v2, %v4978_v61  ;;  %v4987_v50 = vadd.f32 %v4986_v14, %v9206_v13 }
 0x8b5   :  { %v4948_v54 = vrot.slane %v4947_v11, 1  ;;  %v4967_v17 = vrot.slane %v4966_v43, 2  ;;  %v4974_v34 = vrot.slane %v4973_v4, 2  ;;  %v4993_v39 = vrot.slane %v4992_v52, 4 }
 0x8b6   :  { %v4955_v40 = vrot.slane %v4954_v37, 1  ;;  %v4962_v53 = vrot.slane %v4961_v32, 1  ;;  %v4981_v21 = vrot.slane %v4980_v51, 2  ;;  %v4988_v12 = vrot.slane %v4987_v50, 2 }
 0x8b7   :  { %v4968_v23 = vadd.f32 %v4967_v17, %v4966_v43  ;;  %v4975_v7 = vadd.f32 %v4974_v34, %v4973_v4  ;;  %v4994_v15 = vadd.f32 %v4993_v39, %v4992_v52  ;;  %v9402_v58 = vadd.f32 %v4948_v54, %v4947_v11 }
 0x8b8   :  { %v9404_v1 = vadd.f32 %v4955_v40, %v4954_v37  ;;  %v4982_v24 = vadd.f32 %v4981_v21, %v4980_v51  ;;  %v9406_v22 = vadd.f32 %v4988_v12, %v4987_v50  ;;  %v5000_v25 = vrot.slane %v9210_v29, 4 }
 0x8b9   :  { %10680 = vst [vmem:[#allocation94_spill] sm:$0xff] %v9402_v58  ;;  %v4969_v13 = vrot.slane %v4968_v23, 1  ;;  %v4976_v61 = vrot.slane %v4975_v7, 1  ;;  %v4995_v36 = vrot.slane %v4994_v15, 2  ;;  %v9409_v2 = vadd.f32 %v4962_v53, %v4961_v32 }
 0x8ba   :  { %10681 = vst [vmem:[#allocation81_spill] sm:$0xff] %v9406_v22  ;;  %v4983_v14 = vrot.slane %v4982_v24, 1  ;;  %v5006_v43 = vsel %vm2661_vm4, %v9121_v33, 0.0  ;;  %v5014_v39 = vrot.slane %v9214_v44, 4  ;;  %v5001_v50 = vadd.f32 %v5000_v25, %v9210_v29 }
 0x8bb   :  { %10682 = vst [vmem:[#allocation95_spill] sm:$0xff] %v9409_v2  ;;  %v9414_v17 = vadd.f32 %v4969_v13, %v4968_v23  ;;  %v4996_v54 = vadd.f32 %v4995_v36, %v4994_v15  ;;  %v9418_v12 = vadd.f32 %v4976_v61, %v4975_v7  ;;  %v5007_v21 = vrot.slane %v5006_v43, 4  ;;  %v10688_v61 = vld [vmem:[#allocation101_spill] sm:$0xff] }
 0x8bc   :  { %v9421_v11 = vadd.f32 %v5014_v39, %v9214_v44  ;;  %v5020_v53 = vsel %vm2661_vm4, %v9124_v3, 0.0  ;;  %v9425_v4 = vadd.f32 %v4983_v14, %v4982_v24  ;;  %v5002_v10 = vrot.slane %v5001_v50, 2  ;;  %v10687_v24 = vld [vmem:[#allocation97_spill] sm:$0xff] }
 0x8bd   :  { %10683 = vst [vmem:[#allocation82_spill] sm:$0xff] %v9418_v12  ;;  %v4997_v33 = vrot.slane %v4996_v54, 1  ;;  %v5021_v52 = vrot.slane %v5020_v53, 4  ;;  %v5008_v37 = vadd.f32 %v5007_v21, %v5006_v43  ;;  %v5028_v51 = vrot.slane %v9218_v26, 4  ;;  %v10689_v43 = vld [vmem:[#allocation84_spill] sm:$0xff]  ;;  %v10692_v3 = vld [vmem:[#allocation85_spill] sm:$0xff] }
 0x8be   :  { %10684 = vst [vmem:[#allocation96_spill] sm:$0xff] %v9421_v11  ;;  %v5034_v29 = vsel %vm2661_vm4, %v9127_v27, 0.0  ;;  %v9433_v44 = vadd.f32 %v5002_v10, %v5001_v50  ;;  %v5048_v13 = vsel %vm2661_vm4, %v10687_v24, 0.0  ;;  %v5056_v36 = vrot.slane %v10688_v61, 4  ;;  %v10690_v27 = vld [vmem:[#allocation102_spill] sm:$0xff] }
 0x8bf   :  { %v9431_v34 = vadd.f32 %v4997_v33, %v4996_v54  ;;  %v5022_v23 = vadd.f32 %v5021_v52, %v5020_v53  ;;  %v5009_v7 = vrot.slane %v5008_v37, 2  ;;  %v5035_v15 = vrot.slane %v5034_v29, 4 }
 0x8c0   :  { %10686 = vst [vmem:[#allocation106_spill] sm:$0xff] %v9433_v44  ;;  %v5049_v14 = vrot.slane %v5048_v13, 4  ;;  %v5062_v39 = vsel %vm2661_vm4, %v10689_v43, 0.0  ;;  %v5070_v54 = vrot.slane %v10690_v27, 4  ;;  %v9445_v50 = vadd.f32 %v5028_v51, %v9218_v26 }
 0x8c1   :  { %10685 = vst [vmem:[#allocation83_spill] sm:$0xff] %v9431_v34  ;;  %v5023_v25 = vrot.slane %v5022_v23, 2  ;;  %v9442_v21 = vadd.f32 %v5009_v7, %v5008_v37  ;;  %v5057_v53 = vadd.f32 %v5056_v36, %v10688_v61  ;;  %v5063_v33 = vrot.slane %v5062_v39, 4  ;;  %v10694_v36 = vld [vmem:[#allocation60_spill] sm:$0xff]  ;;  %v10698_v34 = vld [vmem:[#allocation59_spill] sm:$0xff] }
 0x8c2   :  { %10691 = vst [vmem:[#allocation97_spill] sm:$0xff] %v9445_v50  ;;  %v9450_v52 = vadd.f32 %v5035_v15, %v5034_v29  ;;  %v5071_v24 = vadd.f32 %v5070_v54, %v10690_v27  ;;  %v5076_v32 = vsel %vm2661_vm4, %v10692_v3, 0.0  ;;  %v9456_v40 = vadd.f32 %v5049_v14, %v5048_v13  ;;  %v10695_v27 = vld [vmem:[#allocation74_spill] sm:$0xff]  ;;  %v10696_v13 = vld [vmem:[#allocation61_spill] sm:$0xff] }
 0x8c3   :  { %v9448_v10 = vadd.f32 %v5023_v25, %v5022_v23  ;;  %v5058_v37 = vrot.slane %v5057_v53, 2  ;;  %v5064_v7 = vadd.f32 %v5063_v33, %v5062_v39  ;;  %v5077_v51 = vrot.slane %v5076_v32, 4 }
 0x8c4   :  { %v5072_v26 = vrot.slane %v5071_v24, 2  ;;  %v5084_v61 = vrot.slane %v10693_v47, 4  ;;  %v5090_v23 = vsel %vm2661_vm4, %v10694_v36, 0.0  ;;  %v5098_v54 = vrot.slane %v10695_v27, 4 }
 0x8c5   :  { %v5059_v29 = vadd.f32 %v5058_v37, %v5057_v53  ;;  %v5065_v15 = vrot.slane %v5064_v7, 2  ;;  %v5091_v25 = vrot.slane %v5090_v23, 4  ;;  %v5078_v3 = vadd.f32 %v5077_v51, %v5076_v32 }
 0x8c6   :  { %v5073_v12 = vadd.f32 %v5072_v26, %v5071_v24  ;;  %v5085_v43 = vadd.f32 %v5084_v61, %v10693_v47  ;;  %v5104_v14 = vsel %vm2661_vm4, %v10696_v13, 0.0  ;;  %v5099_v58 = vadd.f32 %v5098_v54, %v10695_v27 }
 0x8c7   :  { %v5060_v39 = vrot.slane %v5059_v29, 1  ;;  %v5066_v33 = vadd.f32 %v5065_v15, %v5064_v7  ;;  %v5092_v2 = vadd.f32 %v5091_v25, %v5090_v23  ;;  %v5079_v50 = vrot.slane %v5078_v3, 2  ;;  %v10697_v15 = vld [vmem:[#allocation87_spill] sm:$0xff] }
 0x8c8   :  { %v5074_v42 = vrot.slane %v5073_v12, 1  ;;  %v5086_v36 = vrot.slane %v5085_v43, 2  ;;  %v5105_v53 = vrot.slane %v5104_v14, 4  ;;  %v5100_v24 = vrot.slane %v5099_v58, 2 }
 0x8c9   :  { %v5067_v11 = vrot.slane %v5066_v33, 1  ;;  %v5093_v44 = vrot.slane %v5092_v2, 2  ;;  %v9467_v32 = vadd.f32 %v5060_v39, %v5059_v29  ;;  %v5080_v47 = vadd.f32 %v5079_v50, %v5078_v3 }
 0x8ca   :  { %v5087_v26 = vadd.f32 %v5086_v36, %v5085_v43  ;;  %v5106_v51 = vadd.f32 %v5105_v53, %v5104_v14  ;;  %v9469_v61 = vadd.f32 %v5074_v42, %v5073_v12  ;;  %v9471_v23 = vadd.f32 %v5100_v24, %v5099_v58  ;;  %v10700_v36 = vld [vmem:[#allocation86_spill] sm:$0xff]  ;;  %v10701_v24 = vld [vmem:[#allocation68_spill] sm:$0xff] }
 0x8cb   :  { %v5094_v7 = vadd.f32 %v5093_v44, %v5092_v2  ;;  %v5112_v25 = vrot.slane %v10697_v15, 4  ;;  %v5081_v27 = vrot.slane %v5080_v47, 1  ;;  %v5118_v37 = vsel %vm2661_vm4, %v10698_v34, 0.0  ;;  %v10699_v2 = vld [vmem:[#allocation63_spill] sm:$0xff] }
 0x8cc   :  { %v5088_v54 = vrot.slane %v5087_v26, 1  ;;  %v5107_v13 = vrot.slane %v5106_v51, 2  ;;  %v9476_v22 = vadd.f32 %v5067_v11, %v5066_v33  ;;  %v5119_v43 = vrot.slane %v5118_v37, 4 }
 0x8cd   :  { %v5095_v29 = vrot.slane %v5094_v7, 1  ;;  %v5113_v50 = vadd.f32 %v5112_v25, %v10697_v15  ;;  %v9479_v3 = vadd.f32 %v5081_v27, %v5080_v47  ;;  %v5126_v12 = vrot.slane %v10699_v2, 4  ;;  %v10702_v27 = vld [vmem:[#allocation98_spill] sm:$0xff] }
 0x8ce   :  { %v5108_v58 = vadd.f32 %v5107_v13, %v5106_v51  ;;  %v9483_v44 = vadd.f32 %v5088_v54, %v5087_v26  ;;  %v5120_v39 = vadd.f32 %v5119_v43, %v5118_v37  ;;  %v5132_v34 = vsel %vm2661_vm4, %v10700_v36, 0.0 }
 0x8cf   :  { %v5114_v14 = vrot.slane %v5113_v50, 2  ;;  %v9488_v33 = vadd.f32 %v5126_v12, %v10699_v2  ;;  %v5133_v53 = vrot.slane %v5132_v34, 4  ;;  %v5140_v47 = vrot.slane %v10701_v24, 4 }
 0x8d0   :  { %v5109_v11 = vrot.slane %v5108_v58, 1  ;;  %v9491_v15 = vadd.f32 %v5095_v29, %v5094_v7  ;;  %v5121_v51 = vrot.slane %v5120_v39, 2  ;;  %v5146_v26 = vsel %vm2661_vm4, %v10702_v27, 0.0  ;;  %v10703_v29 = vld [vmem:[#allocation99_spill] sm:$0xff] }
 0x8d1   :  { %v9493_v25 = vadd.f32 %v5114_v14, %v5113_v50  ;;  %v5134_v13 = vadd.f32 %v5133_v53, %v5132_v34  ;;  %v9504_v12 = vadd.f32 %v5140_v47, %v10701_v24  ;;  %v5147_v7 = vrot.slane %v5146_v26, 4 }
 0x8d2   :  { %v9497_v54 = vadd.f32 %v5109_v11, %v5108_v58  ;;  %v9501_v2 = vadd.f32 %v5121_v51, %v5120_v39  ;;  %v5160_v50 = vsel %vm2661_vm4, %v10703_v29, 0.0  ;;  %v4801_v27 = vrot.slane %v9319_v19, 1 }
 0x8d3   :  { %v5135_v14 = vrot.slane %v5134_v13, 2  ;;  %v5161_v36 = vrot.slane %v5160_v50, 4  ;;  %v10704_v58 = vrot.slane %v9305_v0, 2  ;;  %v10705_v39 = vrot.slane %v9307_v45, 1 }
 0x8d4   :  { %v4827_v24 = vrot.slane %v9337_v62, 2  ;;  %v5238_v47 = vsel %vm3463_vm6, %v9275_v57, %v9271_v31  ;;  %v9522_v29 = vadd.f32 %v5147_v7, %v5146_v26  ;;  %v4794_v57 = vrot.slane %v9309_v8, 1 }
 0x8d5   :  { %v4814_v11 = vadd.f32 %v10704_v58, %v9305_v0  ;;  %v4788_v53 = vadd.f32 %v10705_v39, %v9307_v45  ;;  %v9520_v51 = vadd.f32 %v5135_v14, %v5134_v13  ;;  %v9524_v42 = vadd.f32 %v5161_v36, %v5160_v50 }
 0x8d6   :  { %v4802_v0 = vadd.f32 %v4801_v27, %v9319_v19  ;;  %v4828_v58 = vadd.f32 %v4827_v24, %v9337_v62  ;;  %v5239_v45 = vsel %vm3465_vm7, %v9282_v55, %v5238_v47  ;;  %v10706_v39 = vrot.slane %v9302_v38, 1 }
 0x8d7   :  { %v4815_v43 = vrot.slane %v4814_v11, 1  ;;  %v5240_v31 = vsel %vm3467_vm8, %v9300_v46, %v5239_v45  ;;  %v10707_v26 = vrot.slane %v9295_v49, 2  ;;  %v4820_v7 = vrot.slane %v9312_v35, 2 }
 0x8d8   :  { %v4781_v37 = vadd.f32 %v10706_v39, %v9302_v38  ;;  %v4829_v19 = vrot.slane %v4828_v58, 1  ;;  %v5241_v62 = vsel %vm3469_vm9, %v4788_v53, %v5240_v31  ;;  %v5231_v55 = vsel %vm3463_vm6, %v9273_v63, %v9269_v5 }
 0x8d9   :  { %v4816_v34 = vadd.f32 %v4815_v43, %v4814_v11  ;;  %v4807_v13 = vadd.f32 %v10707_v26, %v9295_v49  ;;  %v5242_v38 = vsel %vm3471_vm10, %v4802_v0, %v5241_v62  ;;  %v4795_v43 = vadd.f32 %v4794_v57, %v9309_v8 }
 0x8da   :  { %v5232_v50 = vsel %vm3465_vm7, %v9277_v30, %v5231_v55  ;;  %v4830_v14 = vadd.f32 %v4829_v19, %v4828_v58  ;;  %v4821_v36 = vadd.f32 %v4820_v7, %v9312_v35  ;;  %v5149_v11 = vrot.slane %v9522_v29, 2  ;;  %v10712_v7 = vld [vmem:[#allocation79_spill] sm:$0xff] }
 0x8db   :  { %v4808_v46 = vrot.slane %v4807_v13, 1  ;;  %v5243_v49 = vsel %vm3473_vm11, %v4816_v34, %v5242_v38  ;;  %v5233_v27 = vsel %vm3467_vm8, %v9291_v60, %v5232_v50  ;;  %v4913_v63 = vrot.slane %v9382_v6, 1  ;;  %v10713_v38 = vld [vmem:[#allocation69_spill] sm:$0xff] }
 0x8dc   :  { %v5234_v5 = vsel %vm3469_vm9, %v4781_v37, %v5233_v27  ;;  %v5244_v8 = vsel %vm3475_vm12, %v4830_v14, %v5243_v49  ;;  %v4822_v24 = vrot.slane %v4821_v36, 1  ;;  %v10708_v34 = vrot.slane %v9384_v9, 2  ;;  %v10715_v49 = vld [vmem:[#allocation100_spill] sm:$0xff] }
 0x8dd   :  { %v4809_v53 = vadd.f32 %v4808_v46, %v4807_v13  ;;  %v5235_v30 = vsel %vm3471_vm10, %v4795_v43, %v5234_v5  ;;  %6589 = vmatprep.mubr.msk.f32.mxu0 %vm2727_vm5, %v5244_v8  ;;  %v10709_v35 = vrot.slane %v9379_v20, 1  ;;  %v4939_v37 = vrot.slane %v9390_v41, 2  ;;  %v10710_v13 = vld [vmem:[#allocation93_spill] sm:$0xff]  ;;  %v10718_v5 = vld [vmem:[#allocation104_spill] sm:$0xff] }
 0x8de   :  { %v4926_v47 = vadd.f32 %v10708_v34, %v9384_v9  ;;  %v5252_v58 = vsel %vm3463_vm6, %v9352_v28, %v9341_v16  ;;  %v4823_v45 = vadd.f32 %v4822_v24, %v4821_v36  ;;  %v4914_v39 = vadd.f32 %v4913_v63, %v9382_v6  ;;  %v10719_v34 = vld [vmem:[#allocation105_spill] sm:$0xff] }
 0x8df   :  { %v5236_v60 = vsel %vm3473_vm11, %v4809_v53, %v5235_v30  ;;  %v4900_v0 = vadd.f32 %v10709_v35, %v9379_v20  ;;  %v5253_v9 = vsel %vm3465_vm7, %v9361_v18, %v5252_v58  ;;  %v4940_v57 = vadd.f32 %v4939_v37, %v9390_v41  ;;  %v10717_v53 = vld [vmem:[#allocation103_spill] sm:$0xff] }
 0x8e0   :  { %v4927_v31 = vrot.slane %v4926_v47, 1  ;;  %v5254_v26 = vsel %vm3467_vm8, %v9365_v56, %v5253_v9  ;;  %v4892_v20 = vrot.slane %v9377_v59, 1  ;;  %v10711_v19 = vrot.slane %v10710_v13, 2 }
 0x8e1   :  { %v5237_v16 = vsel %vm3475_vm12, %v4823_v45, %v5236_v60  ;;  %v5255_v6 = vsel %vm3469_vm9, %v4900_v0, %v5254_v26  ;;  %v4918_v55 = vrot.slane %v10712_v7, 2  ;;  %v4941_v18 = vrot.slane %v4940_v57, 1 }
 0x8e2   :  { %v4905_v62 = vadd.f32 %v10711_v19, %v10710_v13  ;;  %v4928_v28 = vadd.f32 %v4927_v31, %v4926_v47  ;;  %5364 = vmatmul.mubr.f32.vlgmr.msra.gmra.mxu0 %v5237_v16  ;;  %v5256_v41 = vsel %vm3471_vm10, %v4914_v39, %v5255_v6  ;;  %v10714_v56 = vrot.slane %v10713_v38, 1 }
 0x8e3   :  { %v4919_v14 = vadd.f32 %v4918_v55, %v10712_v7  ;;  %v10716_v36 = vrot.slane %v10715_v49, 4  ;;  %v5245_v63 = vsel %vm3463_vm6, %v10718_v5, %v10717_v53  ;;  %v4942_v8 = vadd.f32 %v4941_v18, %v4940_v57  ;;  %v10722_v55 = vld [vmem:[#allocation81_spill] sm:$0xff]  ;;  %v10729_v5 = vld [vmem:[#allocation66_spill] sm:$0xff] }
 0x8e4   :  { %v4879_v43 = vadd.f32 %v10714_v56, %v10713_v38  ;;  %v4906_v46 = vrot.slane %v4905_v62, 1  ;;  %v5257_v50 = vsel %vm3473_vm11, %v4928_v28, %v5256_v41  ;;  %v4893_v24 = vadd.f32 %v4892_v20, %v9377_v59  ;;  %v10724_v38 = vld [vmem:[#allocation83_spill] sm:$0xff]  ;;  %v10725_v56 = vld [vmem:[#allocation106_spill] sm:$0xff] }
 0x8e5   :  { %v4931_v27 = vadd.f32 %v10716_v36, %v10715_v49  ;;  %v5246_v47 = vsel %vm3465_vm7, %v10719_v34, %v5245_v63  ;;  %v4920_v60 = vrot.slane %v4919_v14, 1  ;;  %v5025_v37 = vrot.slane %v9448_v10, 1  ;;  %v10728_v49 = vld [vmem:[#allocation97_spill] sm:$0xff] }
 0x8e6   :  { %v4907_v30 = vadd.f32 %v4906_v46, %v4905_v62  ;;  %v5247_v0 = vsel %vm3467_vm8, %v4879_v43, %v5246_v47  ;;  %v5258_v58 = vsel %vm3475_vm12, %v4942_v8, %v5257_v50  ;;  %v10720_v39 = vrot.slane %v9450_v52, 2  ;;  %v10726_v43 = vld [vmem:[#allocation96_spill] sm:$0xff]  ;;  %v10731_v47 = vld [vmem:[#allocation94_spill] sm:$0xff] }
 0x8e7   :  { %v4932_v35 = vrot.slane %v4931_v27, 2  ;;  %v5248_v45 = vsel %vm3469_vm9, %v4893_v24, %v5247_v0  ;;  %v5051_v59 = vrot.slane %v9456_v40, 2  ;;  %6590 = vmatprep.mubr.msk.f32.mxu0 %vm2727_vm5, %v5258_v58  ;;  %v4921_v9 = vadd.f32 %v4920_v60, %v4919_v14  ;;  %v10732_v60 = vld [vmem:[#allocation95_spill] sm:$0xff] }
 0x8e8   :  { %v5038_v31 = vadd.f32 %v10720_v39, %v9450_v52  ;;  %v5249_v26 = vsel %vm3471_vm10, %v4907_v30, %v5248_v45  ;;  %v10721_v20 = vrot.slane %v9442_v21, 1  ;;  %v5026_v19 = vadd.f32 %v5025_v37, %v9448_v10  ;;  %v10733_v45 = vld [vmem:[#allocation82_spill] sm:$0xff] }
 0x8e9   :  { %v4933_v57 = vadd.f32 %v4932_v35, %v4931_v27  ;;  %v5052_v16 = vadd.f32 %v5051_v59, %v9456_v40  ;;  %v5266_v52 = vsel %vm3463_vm6, %v9414_v17, %v9404_v1  ;;  %v5250_v6 = vsel %vm3473_vm11, %v4921_v9, %v5249_v26 }
 0x8ea   :  { %v5012_v13 = vadd.f32 %v10721_v20, %v9442_v21  ;;  %v5039_v62 = vrot.slane %v5038_v31, 1  ;;  %v5267_v7 = vsel %vm3465_vm7, %v9425_v4, %v5266_v52  ;;  %v10723_v18 = vrot.slane %v10722_v55, 1 }
 0x8eb   :  { %v4934_v28 = vrot.slane %v4933_v57, 1  ;;  %v5053_v21 = vrot.slane %v5052_v16, 1  ;;  %v5268_v10 = vsel %vm3467_vm8, %v10724_v38, %v5267_v7  ;;  %v5004_v40 = vrot.slane %v10725_v56, 1 }
 0x8ec   :  { %v4991_v41 = vadd.f32 %v10723_v18, %v10722_v55  ;;  %v10727_v46 = vrot.slane %v10726_v43, 2  ;;  %v5040_v50 = vadd.f32 %v5039_v62, %v5038_v31  ;;  %v5269_v14 = vsel %vm3469_vm9, %v5012_v13, %v5268_v10 }
 0x8ed   :  { %v4935_v17 = vadd.f32 %v4934_v28, %v4933_v57  ;;  %v5030_v4 = vrot.slane %v10728_v49, 2  ;;  %v5054_v36 = vadd.f32 %v5053_v21, %v5052_v16  ;;  %v5270_v27 = vsel %vm3471_vm10, %v5026_v19, %v5269_v14 }
 0x8ee   :  { %v5017_v1 = vadd.f32 %v10727_v46, %v10726_v43  ;;  %v10730_v63 = vrot.slane %v10729_v5, 4  ;;  %v5271_v30 = vsel %vm3473_vm11, %v5040_v50, %v5270_v27  ;;  %v5259_v35 = vsel %vm3463_vm6, %v10732_v60, %v10731_v47  ;;  %v10738_v60 = vld [vmem:[#allocation88_spill] sm:$0xff] }
 0x8ef   :  { %v5251_v24 = vsel %vm3475_vm12, %v4935_v17, %v5250_v6  ;;  %v5031_v34 = vadd.f32 %v5030_v4, %v10728_v49  ;;  %v5272_v0 = vsel %vm3475_vm12, %v5054_v36, %v5271_v30  ;;  %v5005_v37 = vadd.f32 %v5004_v40, %v10725_v56 }
 0x8f0   :  { %v5018_v53 = vrot.slane %v5017_v1, 1  ;;  %v5043_v8 = vadd.f32 %v10730_v63, %v10729_v5  ;;  %5369 = vmatmul.mubr.f32.gmra.mxu0 %v5251_v24  ;;  %v5260_v39 = vsel %vm3465_vm7, %v10733_v45, %v5259_v35  ;;  %v5137_v57 = vrot.slane %v9520_v51, 1 }
 0x8f1   :  { %6591 = vmatprep.mubr.msk.f32.mxu0 %vm2727_vm5, %v5272_v0  ;;  %v5032_v59 = vrot.slane %v5031_v34, 1  ;;  %v5261_v9 = vsel %vm3467_vm8, %v4991_v41, %v5260_v39  ;;  %v5150_v13 = vadd.f32 %v5149_v11, %v9522_v29  ;;  %v5163_v19 = vrot.slane %v9524_v42, 2  ;;  %v10739_v39 = vld [vmem:[#allocation76_spill] sm:$0xff] }
 0x8f2   :  { %v5044_v58 = vrot.slane %v5043_v8, 2  ;;  %v5019_v31 = vadd.f32 %v5018_v53, %v5017_v1  ;;  %v5262_v20 = vsel %vm3469_vm9, %v5005_v37, %v5261_v9  ;;  %v10734_v52 = vrot.slane %v9501_v2, 1 }
 0x8f3   :  { %v5033_v62 = vadd.f32 %v5032_v59, %v5031_v34  ;;  %v5280_v6 = vsel %vm3463_vm6, %v9479_v3, %v9476_v22  ;;  %v5151_v55 = vrot.slane %v5150_v13, 1  ;;  %v5164_v18 = vadd.f32 %v5163_v19, %v9524_v42 }
 0x8f4   :  { %v5045_v26 = vadd.f32 %v5044_v58, %v5043_v8  ;;  %v5263_v16 = vsel %vm3471_vm10, %v5019_v31, %v5262_v20  ;;  %v5124_v28 = vadd.f32 %v10734_v52, %v9501_v2  ;;  %v5281_v29 = vsel %vm3465_vm7, %v9491_v15, %v5280_v6  ;;  %v10740_v20 = vld [vmem:[#allocation92_spill] sm:$0xff] }
 0x8f5   :  { %v5264_v11 = vsel %vm3473_vm11, %v5033_v62, %v5263_v16  ;;  %v5138_v41 = vadd.f32 %v5137_v57, %v9520_v51  ;;  %v5282_v21 = vsel %vm3467_vm8, %v9497_v54, %v5281_v29  ;;  %v5116_v2 = vrot.slane %v9493_v25, 1 }
 0x8f6   :  { %v5046_v7 = vrot.slane %v5045_v26, 1  ;;  %v5152_v10 = vadd.f32 %v5151_v55, %v5150_v13  ;;  %v5165_v56 = vrot.slane %v5164_v18, 1  ;;  %v5283_v22 = vsel %vm3469_vm9, %v5124_v28, %v5282_v21  ;;  %v10741_v28 = vld [vmem:[#allocation77_spill] sm:$0xff] }
 0x8f7   :  { %v5284_v3 = vsel %vm3471_vm10, %v5138_v41, %v5283_v22  ;;  %v10735_v42 = vrot.slane %v9488_v33, 2  ;;  %v5142_v40 = vrot.slane %v9504_v12, 2  ;;  %v10736_v46 = vrot.slane %v9267_v48, 4 }
 0x8f8   :  { %v5047_v38 = vadd.f32 %v5046_v7, %v5045_v26  ;;  %v5166_v43 = vadd.f32 %v5165_v56, %v5164_v18  ;;  %v5285_v54 = vsel %vm3473_vm11, %v5152_v10, %v5284_v3  ;;  %v10737_v17 = vrot.slane %v9471_v23, 1 }
 0x8f9   :  { %v5129_v15 = vadd.f32 %v10735_v42, %v9488_v33  ;;  %v5155_v1 = vadd.f32 %v10736_v46, %v9267_v48  ;;  %v5143_v49 = vadd.f32 %v5142_v40, %v9504_v12  ;;  %v5273_v33 = vsel %vm3463_vm6, %v9469_v61, %v9467_v32 }
 0x8fa   :  { %v5265_v51 = vsel %vm3475_vm12, %v5047_v38, %v5264_v11  ;;  %v5103_v50 = vadd.f32 %v10737_v17, %v9471_v23  ;;  %v5286_v4 = vsel %vm3475_vm12, %v5166_v43, %v5285_v54  ;;  %v5117_v36 = vadd.f32 %v5116_v2, %v9493_v25 }
 0x8fb   :  { %5374 = vmatmul.mubr.f32.gmra.mxu0 %v5265_v51  ;;  %v5130_v14 = vrot.slane %v5129_v15, 1  ;;  %v5156_v27 = vrot.slane %v5155_v1, 2  ;;  %v5274_v48 = vsel %vm3465_vm7, %v9483_v44, %v5273_v33  ;;  %v5144_v5 = vrot.slane %v5143_v49, 1 }
 0x8fc   :  { %6592 = vmatprep.mubr.msk.f32.mxu0 %vm2727_vm5, %v5286_v4  ;;  %v5275_v23 = vsel %vm3467_vm8, %v5103_v50, %v5274_v48  ;;  %v10742_v33 = vmov 0.0   ;;  %v6760_v4 = vld [vmem:[%s10041_s3 + $0x78] sm:$0xff]  ;;  %v6762_v48 = vld [vmem:[%s10041_s3 + $0x68] sm:$0xff] }
 0x8fd   :  { %v5131_v53 = vadd.f32 %v5130_v14, %v5129_v15  ;;  %v5157_v63 = vadd.f32 %v5156_v27, %v5155_v1  ;;  %v5276_v12 = vsel %vm3469_vm9, %v5117_v36, %v5275_v23  ;;  %v5145_v8 = vadd.f32 %v5144_v5, %v5143_v49  ;;  %v6761_v36 = vld [vmem:[%s10041_s3 + $0x70] sm:$0xff]  ;;  %v6764_v23 = vld [vmem:[%s10041_s3 + $0x58] sm:$0xff] }
 0x8ff   :  { %v5277_v32 = vsel %vm3471_vm10, %v5131_v53, %v5276_v12  ;;  %v5158_v61 = vrot.slane %v5157_v63, 1  ;;  %v6763_v53 = vld [vmem:[%s10041_s3 + $0x60] sm:$0xff]  ;;  %v6765_v12 = vld [vmem:[%s10041_s3 + $0x50] sm:$0xff] }
 0x900   :  { %v5278_v24 = vsel %vm3473_vm11, %v5145_v8, %v5277_v32  ;;  %v6766_v8 = vld [vmem:[%s10041_s3 + $0x48] sm:$0xff] }
 0x901   :  { %v5159_v25 = vadd.f32 %v5158_v61, %v5157_v63  ;;  %v6767_v61 = vld [vmem:[%s10041_s3 + $0x40] sm:$0xff] }
 0x903   :  { %v5279_v30 = vsel %vm3475_vm12, %v5159_v25, %v5278_v24  ;;  %v6768_v24 = vld [vmem:[%s10041_s3 + $0x38] sm:$0xff] }
 0x904   :  { %5379 = vmatmul.mubr.f32.gmra.mxu0 %v5279_v30 }
 0x9a2   :  { %v5365_v44 = vpop.f32.mrf.mxu0 }
 0x9a3   :  { %v5384_v34 = vmul.f32 0.25, %v5365_v44  ;;  %v6769_v44 = vld [vmem:[%s10041_s3 + $0x30] sm:$0xff] }
 0x9a4   :  { %v5367_v47 = vpop.f32.mrf.mxu0 }
 0x9a5   :  { %v5388_v35 = vadd.f32 %v5384_v34, %v10738_v60  ;;  %v6770_v34 = vld [vmem:[%s10041_s3 + $0x28] sm:$0xff]  ;;  %v6771_v47 = vld [vmem:[%s10041_s3 + $0x20] sm:$0xff]  ;;  %v6772_v60 = vld [vmem:[%s10041_s3 + $0x18] sm:$0xff] }
 0x9a7   :  { %v5392_v0 = vsel %vm1901_vm0, %v5388_v35, -inf }
 0x9a8   :  { %5393 = vmax.xlane.f32.xlu1 %v5392_v0  ;;  %v6773_v0 = vld [vmem:[%s10041_s3 + $0x10] sm:$0xff] }
 0x9b0   :  { %v5370_v37 = vpop.f32.mrf.mxu0 }
 0x9b1   :  { %v5385_v58 = vmul.f32 0.25, %v5370_v37 }
 0x9b2   :  { %v5372_v45 = vpop.f32.mrf.mxu0 }
 0x9b3   :  { %v5389_v31 = vadd.f32 %v5385_v58, %v10739_v39  ;;  %v6774_v58 = vld [vmem:[%s10041_s3 + $0x8] sm:$0xff]  ;;  %v6775_v45 = vld [vmem:[%s10041_s3] sm:$0xff]  ;;  %v6776_v39 = vld [vmem:[%s10041_s3 + $0x98] sm:$0xff] }
 0x9b5   :  { %v5395_v59 = vsel %vm1901_vm0, %v5389_v31, -inf }
 0x9b6   :  { %5396 = vmax.xlane.f32.xlu0 %v5395_v59  ;;  %v6778_v59 = vld [vmem:[%s10041_s3 + $0x88] sm:$0xff] }
 0x9bb   :  { %v5375_v9 = vpop.f32.mrf.mxu0 }
 0x9bc   :  { %v5386_v57 = vmul.f32 0.25, %v5375_v9  ;;  %v6779_v9 = vld [vmem:[%s10041_s3 + $0x80] sm:$0xff] }
 0x9bd   :  { %v5377_v26 = vpop.f32.mrf.mxu0 }
 0x9be   :  { %v5390_v13 = vadd.f32 %v5386_v57, %v10740_v20  ;;  %v6780_v57 = vld [vmem:[%s10040_s2 + $0x18] sm:$0x3] }
 0x9c0   :  { %v5398_v19 = vsel %vm1901_vm0, %v5390_v13, -inf }
 0x9c1   :  { %5399 = vmax.xlane.f32.xlu1 %v5398_v19 }
 0x9c4   :  { %v5380_v62 = vpop.f32.mrf.mxu0 }
 0x9c5   :  { %v5387_v16 = vmul.f32 0.25, %v5380_v62  ;;  %v10743_v62 = vld [vmem:[#allocation89_spill] sm:$0xff] }
 0x9c6   :  { %v5382_v52 = vpop.f32.mrf.mxu0 }
 0x9c7   :  { %v5391_v6 = vadd.f32 %v5387_v16, %v10741_v28 }
 0x9c9   :  { %v5401_v7 = vsel %vm1901_vm0, %v5391_v6, -inf }
 0x9ca   :  { %5402 = vmax.xlane.f32.xlu0 %v5401_v7 }
 0xa31   :  { %v5394_v55 = vpop.xlane.xlu1 %5393 }
 0xa32   :  { %v5404_v18 = vsub.f32 %v5388_v35, %v5394_v55 }
 0xa34   :  { %v5408_v29 = vmul.f32 1.442695, %v5404_v18  ;;  %v10744_v18 = vld [vmem:[#allocation90_spill] sm:$0xff] }
 0xa36   :  { %6705 = vpow2.f32 %v5408_v29 }
 0xa3f   :  { %v5397_v11 = vpop.xlane.xlu0 %5396 }
 0xa40   :  { %v5405_v41 = vsub.f32 %v5389_v31, %v5397_v11  ;;  %v6777_v31 = vld [vmem:[%s10041_s3 + $0x90] sm:$0xff] }
 0xa42   :  { %v5410_v21 = vmul.f32 1.442695, %v5405_v41 }
 0xa43   :  { %v6706_v2 = vpop.eup %6705 }
 0xa44   :  { %6707 = vpow2.f32 %v5410_v21  ;;  %v5416_v38 = vsel %vm1901_vm0, %v6706_v2, 0.0 }
 0xa45   :  { %5417 = vadd.xlane.f32.xlu1 %v5416_v38 }
 0xa4a   :  { %v5400_v10 = vpop.xlane.xlu1 %5399 }
 0xa4b   :  { %v5406_v56 = vsub.f32 %v5390_v13, %v5400_v10 }
 0xa4d   :  { %v5412_v22 = vmul.f32 1.442695, %v5406_v56 }
 0xa4f   :  { %6709 = vpow2.f32 %v5412_v22 }
 0xa51   :  { %v6708_v3 = vpop.eup %6707 }
 0xa52   :  { %v5419_v15 = vsel %vm1901_vm0, %v6708_v3, 0.0 }
 0xa53   :  { %v5403_v42 = vpop.xlane.xlu0 %5402  ;;  %5420 = vadd.xlane.f32.xlu0 %v5419_v15  ;;  %v10746_v15 = vld [vmem:[#allocation5_spill] sm:$0xff] }
 0xa54   :  { %v5407_v40 = vsub.f32 %v5391_v6, %v5403_v42 }
 0xa56   :  { %v5414_v51 = vmul.f32 1.442695, %v5407_v40 }
 0xa58   :  { %6711 = vpow2.f32 %v5414_v51 }
 0xa5c   :  { %v6710_v43 = vpop.eup %6709 }
 0xa5d   :  { %v5422_v54 = vsel %vm1901_vm0, %v6710_v43, 0.0 }
 0xa5e   :  { %5423 = vadd.xlane.f32.xlu1 %v5422_v54 }
 0xa65   :  { %v9705_v46 = vpop.eup %6711 }
 0xa66   :  { %v5425_v1 = vsel %vm1901_vm0, %v9705_v46, 0.0 }
 0xa67   :  { %5426 = vadd.xlane.f32.xlu0 %v5425_v1 }
 0xace   :  { %v5418_v17 = vpop.xlane.xlu1 %5417 }
 0xacf   :  { %6713 = vrcp.f32 %v5418_v17  ;;  %v10748_v17 = vld [vmem:[#allocation6_spill] sm:$0xff] }
 0xadc   :  { %v5421_v50 = vpop.xlane.xlu0 %5420  ;;  %v6714_v14 = vpop.eup %6713 }
 0xadd   :  { %6715 = vrcp.f32 %v5421_v50  ;;  %v5429_v49 = vmul.f32 %v6714_v14, %v6706_v2  ;;  %v10745_v2 = vld [vmem:[#allocation91_spill] sm:$0xff]  ;;  %v10749_v14 = vld [vmem:[#allocation9_spill] sm:$0xff] }
 0xadf   :  { %6595 = vmatmul.mubr.msk.f32.vlgmr.msra.gmra.mxu1 %vm1901_vm0, %v5429_v49 }
 0xae0   :  { %5518 = vmatprep.mubr.f32.mxu1 %v10742_v33  ;;  %6261 = vmatpush1.msra.mxu1 %v6760_v4  ;;  %v10750_v4 = vld [vmem:[#allocation8_spill] sm:$0xff] }
 0xae1   :  { %6262 = vmatprep.subr.mxu1 %v10742_v33 }
 0xae2   :  { %6263 = vmatpush1.msra.mxu1 %v6761_v36 }
 0xae3   :  { %6264 = vmatprep.subr.mxu1 %v10742_v33 }
 0xae4   :  { %6265 = vmatpush1.msra.mxu1 %v6762_v48  ;;  %v10751_v48 = vld [vmem:[#allocation10_spill] sm:$0xff] }
 0xae5   :  { %6266 = vmatprep.subr.mxu1 %v10742_v33 }
 0xae6   :  { %6267 = vmatpush1.msra.mxu1 %v6763_v53 }
 0xae7   :  { %v5424_v27 = vpop.xlane.xlu1 %5423  ;;  %6268 = vmatprep.subr.mxu1 %v10742_v33 }
 0xae8   :  { %6717 = vrcp.f32 %v5424_v27  ;;  %6269 = vmatpush1.msra.mxu1 %v6764_v23 }
 0xae9   :  { %6270 = vmatprep.subr.mxu1 %v10742_v33 }
 0xaea   :  { %v6716_v5 = vpop.eup %6715  ;;  %6271 = vmatpush1.msra.mxu1 %v6765_v12 }
 0xaeb   :  { %v5431_v63 = vmul.f32 %v6716_v5, %v6708_v3  ;;  %6272 = vmatprep.subr.mxu1 %v10742_v33  ;;  %v10752_v5 = vld [vmem:[#allocation11_spill] sm:$0xff] }
 0xaec   :  { %6273 = vmatpush1.msra.mxu1 %v6766_v8 }
 0xaed   :  { %6596 = vmatmul.mubr.msk.f32.gmra.mxu1 %vm1901_vm0, %v5431_v63  ;;  %6274 = vmatprep.subr.mxu1 %v10742_v33 }
 0xaee   :  { %5524 = vmatprep.mubr.f32.mxu1 %v10742_v33  ;;  %6275 = vmatpush1.msra.mxu1 %v6767_v61 }
 0xaef   :  { %6276 = vmatprep.subr.mxu1 %v10742_v33 }
 0xaf0   :  { %v5427_v32 = vpop.xlane.xlu0 %5426  ;;  %6277 = vmatpush1.msra.mxu1 %v6768_v24 }
 0xaf1   :  { %6719 = vrcp.f32 %v5427_v32  ;;  %6278 = vmatprep.subr.mxu1 %v10742_v33 }
 0xaf2   :  { %6279 = vmatpush1.msra.mxu1 %v6769_v44 }
 0xaf3   :  { %6280 = vmatprep.subr.mxu1 %v10742_v33 }
 0xaf4   :  { %6281 = vmatpush1.msra.mxu1 %v6770_v34 }
 0xaf5   :  { %v6718_v25 = vpop.eup %6717  ;;  %6282 = vmatprep.subr.mxu1 %v10742_v33 }
 0xaf6   :  { %v5433_v30 = vmul.f32 %v6718_v25, %v6710_v43  ;;  %6283 = vmatpush1.msra.mxu1 %v6771_v47  ;;  %v10747_v43 = vld [vmem:[#allocation7_spill] sm:$0xff] }
 0xaf7   :  { %6284 = vmatprep.subr.mxu1 %v10742_v33 }
 0xaf8   :  { %6597 = vmatmul.mubr.msk.f32.gmra.mxu1 %vm1901_vm0, %v5433_v30  ;;  %v10753_v30 = vld [vmem:[#allocation13_spill] sm:$0xff] }
 0xaf9   :  { %5530 = vmatprep.mubr.f32.mxu1 %v10742_v33  ;;  %6285 = vmatpush1.msra.mxu1 %v6772_v60 }
 0xafa   :  { %6286 = vmatprep.subr.mxu1 %v10742_v33 }
 0xafb   :  { %6287 = vmatpush1.msra.mxu1 %v6773_v0  ;;  %v10754_v0 = vld [vmem:[#allocation12_spill] sm:$0xff] }
 0xafc   :  { %6288 = vmatprep.subr.mxu1 %v10742_v33 }
 0xafd   :  { %6289 = vmatpush1.msra.mxu1 %v6774_v58 }
 0xafe   :  { %v6720_v35 = vpop.eup %6719  ;;  %6290 = vmatprep.subr.mxu1 %v10742_v33 }
 0xaff   :  { %v5435_v37 = vmul.f32 %v6720_v35, %v9705_v46  ;;  %6291 = vmatpush1.msra.mxu1 %v6775_v45 }
 0xb00   :  { %6316 = vmatprep.subr.mxu1 %v10742_v33 }
 0xb01   :  { %6598 = vmatmul.mubr.msk.f32.gmra.mxu1 %vm1901_vm0, %v5435_v37 }
 0xb02   :  { %6317 = vmatpush2.msra.mxu1 %v6776_v39 }
 0xb03   :  { %6318 = vmatprep.subr.mxu1 %v10742_v33 }
 0xb04   :  { %6319 = vmatpush2.msra.mxu1 %v6777_v31 }
 0xb05   :  { %6320 = vmatprep.subr.mxu1 %v10742_v33 }
 0xb06   :  { %6321 = vmatpush2.msra.mxu1 %v6778_v59 }
 0xb07   :  { %6322 = vmatprep.subr.mxu1 %v10742_v33 }
 0xb08   :  { %6323 = vmatpush2.msra.mxu1 %v6779_v9 }
 0xb09   :  { %6600 = vmatprep.subr.msk.mxu1 %vm1910_vm3, %v6780_v57  ;;  %v10755_v57 = vld [vmem:[#allocation14_spill] sm:$0xff] }
 0xb9f   :  { %v5514_v26 = vpop.f32.mrf.mxu1 }
 0xba1   :  { %v5516_v20 = vpop.f32.mrf.mxu1 }
 0xba2   :  { %v5545_v13 = vcombine.low %v5514_v26, %v5516_v20  ;;  %v5546_v19 = vcombine.high %v5514_v26, %v5516_v20 }
 0xba4   :  { %v5553_v16 = vrot.slane %v5545_v13, %v10743_v62  ;;  %v5560_v52 = vrot.slane %v5546_v19, %v10743_v62 }
 0xba6   :  { %v5561_v28 = vcombine.high %v5553_v16, %v5553_v16  ;;  %v5569_v6 = vrot.slane %v5553_v16, %v10743_v62  ;;  %v5562_v11 = vcombine.high %v5560_v52, %v5560_v52  ;;  %v5576_v22 = vrot.slane %v5560_v52, %v10743_v62 }
 0xba8   :  { %v5583_v7 = vrot.slane %v5561_v28, %v10743_v62  ;;  %v5591_v55 = vcombine.high %v5569_v6, %v5569_v6  ;;  %v5748_v29 = vrot.slane %v5569_v6, %v10744_v18  ;;  %v5752_v38 = vrot.slane %v5569_v6, %v10745_v2 }
 0xba9   :  { %v5590_v51 = vrot.slane %v5562_v11, %v10743_v62  ;;  %v5780_v27 = vrot.slane %v5576_v22, %v10744_v18  ;;  %v5592_v8 = vcombine.high %v5576_v22, %v5576_v22  ;;  %v5784_v61 = vrot.slane %v5576_v22, %v10745_v2 }
 0xbaa   :  { %v5593_v41 = vcombine.high %v5583_v7, %v5583_v7  ;;  %v5756_v21 = vrot.slane %v5583_v7, %v10744_v18  ;;  %v5760_v10 = vrot.slane %v5583_v7, %v10745_v2  ;;  %v5764_v56 = vrot.slane %v5591_v55, %v10744_v18 }
 0xbab   :  { %v5768_v3 = vrot.slane %v5591_v55, %v10745_v2  ;;  %v6065_v40 = vmul.f32 %v5748_v29, %v10746_v15  ;;  %v6066_v50 = vmul.f32 %v5752_v38, %v10748_v17  ;;  %v5594_v32 = vcombine.high %v5590_v51, %v5590_v51  ;;  %v10756_v55 = vld [vmem:[#allocation15_spill] sm:$0xff] }
 0xbac   :  { %v5772_v42 = vrot.slane %v5593_v41, %v10744_v18  ;;  %v6067_v54 = vmul.f32 %v5756_v21, %v10747_v43  ;;  %v5776_v1 = vrot.slane %v5593_v41, %v10745_v2  ;;  %v6068_v49 = vmul.f32 %v5760_v10, %v10749_v14  ;;  %v10759_v14 = vld [vmem:[#allocation18_spill] sm:$0xff] }
 0xbad   :  { %v5520_v46 = vpop.f32.mrf.mxu1  ;;  %v6069_v36 = vmul.f32 %v5764_v56, %v10750_v4  ;;  %v6070_v53 = vmul.f32 %v5768_v3, %v10751_v48  ;;  %v6129_v63 = vsel %vm124_vm1, %v6065_v40, 0.0  ;;  %v6192_v47 = vsel %vm2661_vm4, %v6066_v50, 0.0  ;;  %v10757_v3 = vld [vmem:[#allocation17_spill] sm:$0xff]  ;;  %v10760_v4 = vld [vmem:[#allocation19_spill] sm:$0xff] }
 0xbae   :  { %v6071_v23 = vmul.f32 %v5772_v42, %v10752_v5  ;;  %v6130_v12 = vsel %vm124_vm1, %v6067_v54, 0.0  ;;  %v6072_v44 = vmul.f32 %v5776_v1, %v10753_v30  ;;  %v6193_v60 = vsel %vm2661_vm4, %v6068_v49, 0.0 }
 0xbaf   :  { %v6131_v24 = vadd.f32 %v6130_v12, %v6129_v63  ;;  %v5522_v25 = vpop.f32.mrf.mxu1  ;;  %v6132_v34 = vsel %vm124_vm1, %v6069_v36, 0.0  ;;  %v5788_v35 = vrot.slane %v5590_v51, %v10744_v18  ;;  %v6073_v37 = vmul.f32 %v5780_v27, %v10754_v0  ;;  %v10761_v27 = vld [vmem:[#allocation21_spill] sm:$0xff] }
 0xbb0   :  { %v6194_v45 = vadd.f32 %v6193_v60, %v6192_v47  ;;  %v5792_v39 = vrot.slane %v5590_v51, %v10745_v2  ;;  %v6134_v31 = vsel %vm124_vm1, %v6071_v23, 0.0  ;;  %v6195_v59 = vsel %vm2661_vm4, %v6070_v53, 0.0 }
 0xbb1   :  { %v6133_v58 = vadd.f32 %v6132_v34, %v6131_v24  ;;  %v5595_v9 = vcombine.low %v5520_v46, %v5522_v25  ;;  %v6074_v26 = vmul.f32 %v5784_v61, %v10755_v57  ;;  %v5596_v19 = vcombine.high %v5520_v46, %v5522_v25  ;;  %v10758_v46 = vld [vmem:[#allocation16_spill] sm:$0xff] }
 0xbb2   :  { %v6196_v13 = vadd.f32 %v6195_v59, %v6194_v45  ;;  %v5796_v16 = vrot.slane %v5592_v8, %v10744_v18  ;;  %v5800_v52 = vrot.slane %v5592_v8, %v10745_v2  ;;  %v6197_v28 = vsel %vm2661_vm4, %v6072_v44, 0.0  ;;  %v10762_v45 = vld [vmem:[#allocation20_spill] sm:$0xff] }
 0xbb3   :  { %v6135_v20 = vadd.f32 %v6134_v31, %v6133_v58  ;;  %v5603_v6 = vrot.slane %v5595_v9, %v10743_v62  ;;  %v6075_v29 = vmul.f32 %v5788_v35, %v10756_v55  ;;  %v6136_v11 = vsel %vm124_vm1, %v6073_v37, 0.0 }
 0xbb4   :  { %v6198_v41 = vadd.f32 %v6197_v28, %v6196_v13  ;;  %v5610_v21 = vrot.slane %v5596_v19, %v10743_v62  ;;  %v5804_v38 = vrot.slane %v5594_v32, %v10744_v18  ;;  %v5808_v10 = vrot.slane %v5594_v32, %v10745_v2  ;;  %v10763_v19 = vld [vmem:[#allocation22_spill] sm:$0xff] }
 0xbb5   :  { %v6137_v56 = vadd.f32 %v6136_v11, %v6135_v20  ;;  %v5611_v22 = vcombine.high %v5603_v6, %v5603_v6  ;;  %v6076_v42 = vmul.f32 %v5792_v39, %v10757_v3  ;;  %v6199_v15 = vsel %vm2661_vm4, %v6074_v26, 0.0 }
 0xbb6   :  { %v5619_v40 = vrot.slane %v5603_v6, %v10743_v62  ;;  %v6200_v51 = vadd.f32 %v6199_v15, %v6198_v41  ;;  %v5612_v43 = vcombine.high %v5610_v21, %v5610_v21  ;;  %v6077_v1 = vmul.f32 %v5796_v16, %v10758_v46  ;;  %v10765_v41 = vld [vmem:[#allocation25_spill] sm:$0xff] }
 0xbb7   :  { %v6138_v17 = vsel %vm124_vm1, %v6075_v29, 0.0  ;;  %v5633_v50 = vrot.slane %v5611_v22, %v10743_v62  ;;  %v6078_v49 = vmul.f32 %v5800_v52, %v10759_v14  ;;  %v6079_v36 = vmul.f32 %v5804_v38, %v10760_v4  ;;  %v10764_v52 = vld [vmem:[#allocation23_spill] sm:$0xff]  ;;  %v10766_v38 = vld [vmem:[#allocation24_spill] sm:$0xff] }
 0xbb8   :  { %v5526_v7 = vpop.f32.mrf.mxu1  ;;  %v6080_v48 = vmul.f32 %v5808_v10, %v10761_v27  ;;  %v6139_v53 = vadd.f32 %v6138_v17, %v6137_v56  ;;  %v6201_v5 = vsel %vm2661_vm4, %v6076_v42, 0.0  ;;  %v5641_v23 = vcombine.high %v5619_v40, %v5619_v40 }
 0xbb9   :  { %v5812_v63 = vrot.slane %v5619_v40, %v10744_v18  ;;  %v6202_v8 = vadd.f32 %v6201_v5, %v6200_v51  ;;  %v5626_v32 = vrot.slane %v5610_v21, %v10743_v62  ;;  %v5640_v61 = vrot.slane %v5612_v43, %v10743_v62  ;;  %v10768_v43 = vld [vmem:[#allocation27_spill] sm:$0xff] }
 0xbba   :  { %v5528_v54 = vpop.f32.mrf.mxu1  ;;  %v6140_v25 = vsel %vm124_vm1, %v6077_v1, 0.0  ;;  %v5643_v30 = vcombine.high %v5633_v50, %v5633_v50  ;;  %v5816_v44 = vrot.slane %v5619_v40, %v10745_v2  ;;  %v5820_v34 = vrot.slane %v5633_v50, %v10744_v18  ;;  %v10767_v40 = vld [vmem:[#allocation26_spill] sm:$0xff] }
 0xbbb   :  { %v5645_v12 = vcombine.low %v5526_v7, %v5528_v54  ;;  %v5646_v24 = vcombine.high %v5526_v7, %v5528_v54  ;;  %v6141_v47 = vadd.f32 %v6140_v25, %v6139_v53  ;;  %v6203_v60 = vsel %vm2661_vm4, %v6078_v49, 0.0 }
 0xbbc   :  { %v6142_v35 = vsel %vm124_vm1, %v6079_v36, 0.0  ;;  %v6205_v0 = vsel %vm2661_vm4, %v6080_v48, 0.0  ;;  %v5824_v37 = vrot.slane %v5633_v50, %v10745_v2  ;;  %v5828_v58 = vrot.slane %v5641_v23, %v10744_v18  ;;  %v10769_v50 = vld [vmem:[#allocation29_spill] sm:$0xff]  ;;  %v10770_v36 = vld [vmem:[#allocation28_spill] sm:$0xff] }
 0xbbd   :  { %v6081_v39 = vmul.f32 %v5812_v63, %v10762_v45  ;;  %v5653_v31 = vrot.slane %v5645_v12, %v10743_v62  ;;  %v6204_v59 = vadd.f32 %v6203_v60, %v6202_v8  ;;  %v5642_v9 = vcombine.high %v5626_v32, %v5626_v32  ;;  %v10771_v63 = vld [vmem:[#allocation31_spill] sm:$0xff] }
 0xbbe   :  { %v5644_v57 = vcombine.high %v5640_v61, %v5640_v61  ;;  %v9868_v26 = vrot.slane %v5646_v24, %v10743_v62  ;;  %v5832_v20 = vrot.slane %v5641_v23, %v10745_v2  ;;  %v5836_v13 = vrot.slane %v5643_v30, %v10744_v18 }
 0xbbf   :  { %v6082_v16 = vmul.f32 %v5816_v44, %v10763_v19  ;;  %v6083_v28 = vmul.f32 %v5820_v34, %v10764_v52  ;;  %v5840_v6 = vrot.slane %v5643_v30, %v10745_v2  ;;  %v5844_v7 = vrot.slane %v5626_v32, %v10744_v18 }
 0xbc0   :  { %v5848_v55 = vrot.slane %v5626_v32, %v10745_v2  ;;  %v6143_v29 = vadd.f32 %v6142_v35, %v6141_v47  ;;  %v5852_v11 = vrot.slane %v5640_v61, %v10744_v18  ;;  %v6084_v21 = vmul.f32 %v5824_v37, %v10765_v41  ;;  %v10773_v47 = vld [vmem:[#allocation33_spill] sm:$0xff]  ;;  %v10774_v37 = vld [vmem:[#allocation32_spill] sm:$0xff] }
 0xbc1   :  { %v6085_v10 = vmul.f32 %v5828_v58, %v10766_v38  ;;  %v6144_v56 = vsel %vm124_vm1, %v6081_v39, 0.0  ;;  %v5856_v22 = vrot.slane %v5640_v61, %v10745_v2  ;;  %v5860_v3 = vrot.slane %v5642_v9, %v10744_v18  ;;  %v10772_v61 = vld [vmem:[#allocation30_spill] sm:$0xff] }
 0xbc2   :  { %v6145_v42 = vadd.f32 %v6144_v56, %v6143_v29  ;;  %v6206_v15 = vadd.f32 %v6205_v0, %v6204_v59  ;;  %v6086_v51 = vmul.f32 %v5832_v20, %v10767_v40  ;;  %v6087_v54 = vmul.f32 %v5836_v13, %v10768_v43  ;;  %v10778_v43 = vld [vmem:[#allocation36_spill] sm:$0xff] }
 0xbc3   :  { %v6146_v46 = vsel %vm124_vm1, %v6083_v28, 0.0  ;;  %v6207_v1 = vsel %vm2661_vm4, %v6082_v16, 0.0  ;;  %v5864_v17 = vrot.slane %v5642_v9, %v10745_v2  ;;  %v6088_v14 = vmul.f32 %v5840_v6, %v10769_v50  ;;  %v10775_v9 = vld [vmem:[#allocation34_spill] sm:$0xff]  ;;  %v10776_v6 = vld [vmem:[#allocation35_spill] sm:$0xff]  ;;  %v5532_v50 = vpop.f32.mrf.mxu1 }
 0xbc4   :  { %v6147_v49 = vadd.f32 %v6146_v46, %v6145_v42  ;;  %v6208_v4 = vadd.f32 %v6207_v1, %v6206_v15  ;;  %v6089_v27 = vmul.f32 %v5844_v7, %v10770_v36  ;;  %v6148_v48 = vsel %vm124_vm1, %v6085_v10, 0.0 }
 0xbc5   :  { %v6209_v53 = vsel %vm2661_vm4, %v6084_v21, 0.0  ;;  %v5661_v5 = vcombine.high %v5653_v31, %v5653_v31  ;;  %v5868_v23 = vrot.slane %v5644_v57, %v10744_v18  ;;  %v6091_v12 = vmul.f32 %v5852_v11, %v10771_v63 }
 0xbc6   :  { %v6149_v8 = vadd.f32 %v6148_v48, %v6147_v49  ;;  %v6210_v32 = vadd.f32 %v6209_v53, %v6208_v4  ;;  %v6090_v24 = vmul.f32 %v5848_v55, %v10772_v61  ;;  %v6150_v25 = vsel %vm124_vm1, %v6087_v54, 0.0  ;;  %v10777_v55 = vld [vmem:[#allocation37_spill] sm:$0xff]  ;;  %v10779_v4 = vld [vmem:[#allocation39_spill] sm:$0xff]  ;;  %v10780_v53 = vld [vmem:[#allocation38_spill] sm:$0xff] }
 0xbc7   :  { %v6211_v30 = vsel %vm2661_vm4, %v6086_v51, 0.0  ;;  %v5669_v44 = vrot.slane %v5653_v31, %v10743_v62  ;;  %v5872_v34 = vrot.slane %v5644_v57, %v10745_v2  ;;  %v6092_v60 = vmul.f32 %v5856_v22, %v10773_v47  ;;  %v5534_v47 = vpop.f32.mrf.mxu1 }
 0xbc8   :  { %v6151_v35 = vadd.f32 %v6150_v25, %v6149_v8  ;;  %v6212_v0 = vadd.f32 %v6211_v30, %v6210_v32  ;;  %v6093_v58 = vmul.f32 %v5860_v3, %v10774_v37  ;;  %v6152_v45 = vsel %vm124_vm1, %v6089_v27, 0.0  ;;  %v10781_v8 = vld [vmem:[#allocation40_spill] sm:$0xff]  ;;  %v10782_v30 = vld [vmem:[#allocation41_spill] sm:$0xff] }
 0xbc9   :  { %v6213_v39 = vsel %vm2661_vm4, %v6088_v14, 0.0  ;;  %v5683_v59 = vrot.slane %v5661_v5, %v10743_v62  ;;  %v6094_v20 = vmul.f32 %v5864_v17, %v10775_v9  ;;  %v6154_v19 = vsel %vm124_vm1, %v6091_v12, 0.0 }
 0xbca   :  { %v6153_v13 = vadd.f32 %v6152_v45, %v6151_v35  ;;  %v6214_v31 = vadd.f32 %v6213_v39, %v6212_v0  ;;  %v6215_v57 = vsel %vm2661_vm4, %v6090_v24, 0.0  ;;  %v5662_v16 = vcombine.high %v9868_v26, %v9868_v26  ;;  %v10783_v35 = vld [vmem:[#allocation43_spill] sm:$0xff]  ;;  %v10784_v39 = vld [vmem:[#allocation42_spill] sm:$0xff] }
 0xbcb   :  { %v5691_v52 = vcombine.high %v5669_v44, %v5669_v44  ;;  %v5876_v28 = vrot.slane %v5669_v44, %v10744_v18  ;;  %v6095_v7 = vmul.f32 %v5868_v23, %v10776_v6  ;;  %v6096_v29 = vmul.f32 %v5872_v34, %v10777_v55 }
 0xbcc   :  { %v6155_v11 = vadd.f32 %v6154_v19, %v6153_v13  ;;  %v6216_v41 = vadd.f32 %v6215_v57, %v6214_v31  ;;  %v6156_v21 = vsel %vm124_vm1, %v6093_v58, 0.0  ;;  %v6217_v38 = vsel %vm2661_vm4, %v6092_v60, 0.0  ;;  %v10785_v13 = vld [vmem:[#allocation44_spill] sm:$0xff] }
 0xbcd   :  { %v5693_v10 = vcombine.high %v5683_v59, %v5683_v59  ;;  %v5884_v56 = vrot.slane %v5683_v59, %v10744_v18  ;;  %v5676_v42 = vrot.slane %v9868_v26, %v10743_v62  ;;  %v5880_v15 = vrot.slane %v5669_v44, %v10745_v2 }
 0xbce   :  { %v6157_v22 = vadd.f32 %v6156_v21, %v6155_v11  ;;  %v6218_v3 = vadd.f32 %v6217_v38, %v6216_v41  ;;  %v5690_v40 = vrot.slane %v5662_v16, %v10743_v62  ;;  %v5892_v51 = vrot.slane %v5691_v52, %v10744_v18  ;;  %v10787_v38 = vld [vmem:[#allocation46_spill] sm:$0xff] }
 0xbcf   :  { %v6097_v54 = vmul.f32 %v5876_v28, %v10778_v43  ;;  %v6219_v46 = vsel %vm2661_vm4, %v6094_v20, 0.0  ;;  %v5888_v1 = vrot.slane %v5683_v59, %v10745_v2  ;;  %v6158_v17 = vsel %vm124_vm1, %v6095_v7, 0.0  ;;  %v10786_v28 = vld [vmem:[#allocation45_spill] sm:$0xff] }
 0xbd0   :  { %v6220_v14 = vadd.f32 %v6219_v46, %v6218_v3  ;;  %v5900_v49 = vrot.slane %v5693_v10, %v10744_v18  ;;  %v6099_v26 = vmul.f32 %v5884_v56, %v10779_v4  ;;  %v6221_v36 = vsel %vm2661_vm4, %v6096_v29, 0.0  ;;  %v10788_v56 = vld [vmem:[#allocation47_spill] sm:$0xff] }
 0xbd1   :  { %v5692_v27 = vcombine.high %v5676_v42, %v5676_v42  ;;  %v5896_v48 = vrot.slane %v5691_v52, %v10745_v2  ;;  %v6098_v5 = vmul.f32 %v5880_v15, %v10780_v53  ;;  %v6159_v23 = vadd.f32 %v6158_v17, %v6157_v22 }
 0xbd2   :  { %v5694_v63 = vcombine.high %v5690_v40, %v5690_v40  ;;  %v5908_v12 = vrot.slane %v5676_v42, %v10744_v18  ;;  %v6101_v32 = vmul.f32 %v5892_v51, %v10781_v8  ;;  %v6160_v61 = vsel %vm124_vm1, %v6097_v54, 0.0 }
 0xbd3   :  { %v5904_v24 = vrot.slane %v5693_v10, %v10745_v2  ;;  %v5912_v25 = vrot.slane %v5676_v42, %v10745_v2  ;;  %v6100_v44 = vmul.f32 %v5888_v1, %v10782_v30  ;;  %v6161_v34 = vadd.f32 %v6160_v61, %v6159_v23  ;;  %v10791_v61 = vld [vmem:[#allocation50_spill] sm:$0xff] }
 0xbd4   :  { %v5916_v60 = vrot.slane %v5690_v40, %v10744_v18  ;;  %v6103_v0 = vmul.f32 %v5900_v49, %v10783_v35  ;;  %v6162_v37 = vsel %vm124_vm1, %v6099_v26, 0.0  ;;  %v6222_v58 = vadd.f32 %v6221_v36, %v6220_v14  ;;  %v10790_v26 = vld [vmem:[#allocation48_spill] sm:$0xff] }
 0xbd5   :  { %v5920_v45 = vrot.slane %v5690_v40, %v10745_v2  ;;  %v6102_v59 = vmul.f32 %v5896_v48, %v10784_v39  ;;  %v6163_v9 = vadd.f32 %v6162_v37, %v6161_v34  ;;  %v6223_v20 = vsel %vm2661_vm4, %v6098_v5, 0.0  ;;  %v10793_v37 = vld [vmem:[#allocation53_spill] sm:$0xff] }
 0xbd6   :  { %v6105_v19 = vmul.f32 %v5908_v12, %v10785_v13  ;;  %v6164_v31 = vsel %vm124_vm1, %v6101_v32, 0.0  ;;  %v6224_v57 = vadd.f32 %v6223_v20, %v6222_v58  ;;  %v5695_v16 = vcombine.low %v5532_v50, %v5534_v47 }
 0xbd7   :  { %v5924_v52 = vrot.slane %v5692_v27, %v10744_v18  ;;  %v6104_v6 = vmul.f32 %v5904_v24, %v10786_v28  ;;  %v6165_v7 = vadd.f32 %v6164_v31, %v6163_v9  ;;  %v6225_v55 = vsel %vm2661_vm4, %v6100_v44, 0.0  ;;  %v10794_v9 = vld [vmem:[#allocation52_spill] sm:$0xff] }
 0xbd8   :  { %v6166_v29 = vsel %vm124_vm1, %v6103_v0, 0.0  ;;  %v6226_v11 = vadd.f32 %v6225_v55, %v6224_v57  ;;  %v5696_v41 = vcombine.high %v5532_v50, %v5534_v47  ;;  %v5703_v21 = vrot.slane %v5695_v16, %v10743_v62  ;;  %v10789_v50 = vld [vmem:[#allocation49_spill] sm:$0xff]  ;;  %v10796_v55 = vld [vmem:[#allocation54_spill] sm:$0xff] }
 0xbd9   :  { %v6106_v10 = vmul.f32 %v5912_v25, %v10787_v38  ;;  %v6107_v22 = vmul.f32 %v5916_v60, %v10788_v56  ;;  %v6167_v3 = vadd.f32 %v6166_v29, %v6165_v7  ;;  %v6227_v42 = vsel %vm2661_vm4, %v6102_v59, 0.0  ;;  %v10792_v25 = vld [vmem:[#allocation51_spill] sm:$0xff] }
 0xbda   :  { %v6168_v15 = vsel %vm124_vm1, %v6105_v19, 0.0  ;;  %v6228_v40 = vadd.f32 %v6227_v42, %v6226_v11  ;;  %v5711_v51 = vcombine.high %v5703_v21, %v5703_v21  ;;  %v5928_v43 = vrot.slane %v5692_v27, %v10745_v2  ;;  %v10798_v42 = vld [vmem:[#allocation57_spill] sm:$0xff] }
 0xbdb   :  { %v6169_v54 = vadd.f32 %v6168_v15, %v6167_v3  ;;  %v6229_v46 = vsel %vm2661_vm4, %v6104_v6, 0.0  ;;  %v5719_v1 = vrot.slane %v5703_v21, %v10743_v62  ;;  %v5932_v17 = vrot.slane %v5694_v63, %v10744_v18 }
 0xbdc   :  { %v6108_v14 = vmul.f32 %v5920_v45, %v10789_v50  ;;  %v6230_v49 = vadd.f32 %v6229_v46, %v6228_v40  ;;  %v5710_v4 = vrot.slane %v5696_v41, %v10743_v62  ;;  %v6109_v36 = vmul.f32 %v5924_v52, %v10790_v26  ;;  %v10795_v52 = vld [vmem:[#allocation55_spill] sm:$0xff]  ;;  %v10800_v50 = vld [vmem:[#allocation58_spill] sm:$0xff] }
 0xbdd   :  { %v6170_v48 = vsel %vm124_vm1, %v6107_v22, 0.0  ;;  %v6231_v53 = vsel %vm2661_vm4, %v6106_v10, 0.0  ;;  %v5733_v27 = vrot.slane %v5711_v51, %v10743_v62  ;;  %v5936_v5 = vrot.slane %v5694_v63, %v10745_v2 }
 0xbde   :  { %v6171_v23 = vadd.f32 %v6170_v48, %v6169_v54  ;;  %v6232_v12 = vadd.f32 %v6231_v53, %v6230_v49  ;;  %v5741_v8 = vcombine.high %v5719_v1, %v5719_v1  ;;  %v5940_v32 = vrot.slane %v5719_v1, %v10744_v18 }
 0xbdf   :  { %v6110_v24 = vmul.f32 %v5928_v43, %v10791_v61  ;;  %v6111_v30 = vmul.f32 %v5932_v17, %v10792_v25  ;;  %v6233_v44 = vsel %vm2661_vm4, %v6108_v14, 0.0  ;;  %v5712_v34 = vcombine.high %v5710_v4, %v5710_v4  ;;  %v10799_v43 = vld [vmem:[#allocation62_spill] sm:$0xff] }
 0xbe0   :  { %v6172_v47 = vsel %vm124_vm1, %v6109_v36, 0.0  ;;  %v6234_v60 = vadd.f32 %v6233_v44, %v6232_v12  ;;  %v5743_v35 = vcombine.high %v5733_v27, %v5733_v27  ;;  %v5948_v0 = vrot.slane %v5733_v27, %v10744_v18  ;;  %v10801_v36 = vld [vmem:[#allocation64_spill] sm:$0xff] }
 0xbe1   :  { %v6112_v63 = vmul.f32 %v5936_v5, %v10793_v37  ;;  %v6173_v58 = vadd.f32 %v6172_v47, %v6171_v23  ;;  %v5944_v45 = vrot.slane %v5719_v1, %v10745_v2  ;;  %v5726_v39 = vrot.slane %v5710_v4, %v10743_v62  ;;  %v10802_v23 = vld [vmem:[#allocation65_spill] sm:$0xff]  ;;  %v10804_v47 = vld [vmem:[#allocation67_spill] sm:$0xff]  ;;  %v10805_v37 = vld [vmem:[#allocation72_spill] sm:$0xff] }
 0xbe2   :  { %v5956_v59 = vrot.slane %v5741_v8, %v10744_v18  ;;  %v6113_v20 = vmul.f32 %v5940_v32, %v10794_v9  ;;  %v6235_v13 = vsel %vm2661_vm4, %v6110_v24, 0.0  ;;  %v5740_v19 = vrot.slane %v5712_v34, %v10743_v62  ;;  %v10797_v62 = vld [vmem:[#allocation56_spill] sm:$0xff]  ;;  %v10803_v24 = vld [vmem:[#allocation70_spill] sm:$0xff] }
 0xbe3   :  { %v5952_v31 = vrot.slane %v5733_v27, %v10745_v2  ;;  %v6236_v57 = vadd.f32 %v6235_v13, %v6234_v60  ;;  %v5964_v16 = vrot.slane %v5743_v35, %v10744_v18  ;;  %v6115_v28 = vmul.f32 %v5948_v0, %v10795_v52  ;;  %v10807_v13 = vld [vmem:[#allocation78_spill] sm:$0xff] }
 0xbe4   :  { %v6174_v6 = vsel %vm124_vm1, %v6111_v30, 0.0  ;;  %v5960_v7 = vrot.slane %v5741_v8, %v10745_v2  ;;  %v6114_v29 = vmul.f32 %v5944_v45, %v10796_v55  ;;  %v6237_v41 = vsel %vm2661_vm4, %v6112_v63, 0.0 }
 0xbe5   :  { %v6175_v11 = vadd.f32 %v6174_v6, %v6173_v58  ;;  %v5742_v21 = vcombine.high %v5726_v39, %v5726_v39  ;;  %v5972_v38 = vrot.slane %v5726_v39, %v10744_v18  ;;  %v6117_v10 = vmul.f32 %v5956_v59, %v10797_v62 }
 0xbe6   :  { %v6176_v56 = vsel %vm124_vm1, %v6113_v20, 0.0  ;;  %v5744_v22 = vcombine.high %v5740_v19, %v5740_v19  ;;  %v5968_v3 = vrot.slane %v5743_v35, %v10745_v2  ;;  %v6116_v15 = vmul.f32 %v5952_v31, %v10798_v42 }
 0xbe7   :  { %v6177_v40 = vadd.f32 %v6176_v56, %v6175_v11  ;;  %v5980_v51 = vrot.slane %v5740_v19, %v10744_v18  ;;  %v6119_v54 = vmul.f32 %v5964_v16, %v10799_v43  ;;  %v6178_v46 = vsel %vm124_vm1, %v6115_v28, 0.0  ;;  %v10808_v16 = vld [vmem:[#allocation75_spill] sm:$0xff]  ;;  %v6783_v43 = vld [vmem:[%s10040_s2] sm:$0xff] }
 0xbe8   :  { %v6238_v1 = vadd.f32 %v6237_v41, %v6236_v57  ;;  %v5976_v17 = vrot.slane %v5726_v39, %v10745_v2  ;;  %v6118_v14 = vmul.f32 %v5960_v7, %v10800_v50  ;;  %v6239_v4 = vsel %vm2661_vm4, %v6114_v29, 0.0  ;;  %v10809_v29 = vld [vmem:[#allocation80_spill] sm:$0xff] }
 0xbe9   :  { %v6179_v49 = vadd.f32 %v6178_v46, %v6177_v40  ;;  %v5988_v26 = vrot.slane %v5742_v21, %v10744_v18  ;;  %v6121_v48 = vmul.f32 %v5972_v38, %v10801_v36  ;;  %v6180_v53 = vsel %vm124_vm1, %v6117_v10, 0.0  ;;  %v6781_v40 = vld [vmem:[%s10040_s2 + $0x10] sm:$0x3] }
 0xbea   :  { %v6240_v27 = vadd.f32 %v6239_v4, %v6238_v1  ;;  %v5984_v5 = vrot.slane %v5740_v19, %v10745_v2  ;;  %v6120_v12 = vmul.f32 %v5968_v3, %v10802_v23  ;;  %v6241_v32 = vsel %vm2661_vm4, %v6116_v15, 0.0 }
 0xbeb   :  { %v6181_v8 = vadd.f32 %v6180_v53, %v6179_v49  ;;  %v5996_v61 = vrot.slane %v5744_v22, %v10744_v18  ;;  %v6123_v25 = vmul.f32 %v5980_v51, %v10803_v24  ;;  %v6182_v30 = vsel %vm124_vm1, %v6119_v54, 0.0  ;;  %v10806_v18 = vld [vmem:[#allocation73_spill] sm:$0xff] }
 0xbec   :  { %v6242_v44 = vadd.f32 %v6241_v32, %v6240_v27  ;;  %v5992_v34 = vrot.slane %v5742_v21, %v10745_v2  ;;  %v6122_v60 = vmul.f32 %v5976_v17, %v10804_v47  ;;  %v6243_v0 = vsel %vm2661_vm4, %v6118_v14, 0.0  ;;  %v6782_v51 = vld [vmem:[%s10040_s2 + $0x8] sm:$0xff]  ;;  %s6809_s2 = smov [#allocation2]  }
 0xbed   :  { %v6183_v35 = vadd.f32 %v6182_v30, %v6181_v8  ;;  %v6125_v63 = vmul.f32 %v5988_v26, %v10805_v37  ;;  %v6184_v58 = vsel %vm124_vm1, %v6121_v48, 0.0  ;;  %v6000_v39 = vrot.slane %v5744_v22, %v10745_v2  ;;  %s6429_s28 = sshll.u32 %s6809_s2, 4  ;;  %s6430_s28 = int_to_ptr.vmem [resolvable:$true] %s6429_s28 }
 0xbee   :  { %v6244_v45 = vadd.f32 %v6243_v0, %v6242_v44  ;;  %v6124_v59 = vmul.f32 %v5984_v5, %v10806_v18  ;;  %v6245_v20 = vsel %vm2661_vm4, %v6120_v12, 0.0  ;;  %v6127_v19 = vmul.f32 %v5996_v61, %v10807_v13  ;;  %s6784_s29 = scalar_lea.vmem %s6430_s28, 128  ;;  %p6789_p1 = scmp.lt.s32.totalorder %s6430_s28, %s6430_s28 }
 0xbef   :  { %v6185_v9 = vadd.f32 %v6184_v58, %v6183_v35  ;;  %v6186_v31 = vsel %vm124_vm1, %v6123_v25, 0.0  ;;  %v6126_v52 = vmul.f32 %v5992_v34, %v10808_v16  ;;  %v6247_v6 = vsel %vm2661_vm4, %v6122_v60, 0.0  ;;  %p6785_p0 = scmp.ne.s32.totalorder %s6430_s28, %s6784_s29  ;;  %p6790_p2 = scmp.lt.s32.totalorder %s6784_s29, %s6784_s29 }
 0xbf0   :  { %v6246_v57 = vadd.f32 %v6245_v20, %v6244_v45  ;;  %v6188_v7 = vsel %vm124_vm1, %v6125_v63, 0.0  ;;  %v6128_v2 = vmul.f32 %v6000_v39, %v10809_v29  ;;  %v6249_v11 = vsel %vm2661_vm4, %v6124_v59, 0.0 }
 0xbf1   :  { %v6187_v28 = vadd.f32 %v6186_v31, %v6185_v9  ;;  %v6190_v38 = vsel %vm124_vm1, %v6127_v19, 0.0  ;;  %v6251_v62 = vsel %vm2661_vm4, %v6126_v52, 0.0  ;;  %p6791_p3 = por %p6790_p2, %p6789_p1 }
 0xbf2   :  { %v6248_v55 = vadd.f32 %v6247_v6, %v6246_v57  ;;  %v6253_v22 = vsel %vm2661_vm4, %v6128_v2, 0.0 }
 0xbf3   :  { %v6189_v41 = vadd.f32 %v6188_v7, %v6187_v28  ;;  %p6792_p4 = pnand %p6791_p3, %p6785_p0 }
 0xbf4   :  { %v6250_v21 = vadd.f32 %v6249_v11, %v6248_v55 }
 0xbf5   :  { %v6191_v10 = vadd.f32 %v6190_v38, %v6189_v41 }
 0xbf6   :  { %v6252_v56 = vadd.f32 %v6251_v62, %v6250_v21 }
 0xbf7   :  { %v6255_v42 = vmul.f32 %v6191_v10, %v6191_v10 }
 0xbf8   :  { %v6254_v3 = vadd.f32 %v6253_v22, %v6252_v56 }
 0xbfa   :  { %v6256_v15 = vmul.f32 %v6254_v3, %v6254_v3 }
 0xbfc   :  { %6599 = vmatprep.mubr.msk.f32.mxu1 %vm2727_vm5, %v6256_v15 }
 0xbfd   :  { %6325 = vmatmul.mubr.f32.vlgmr.msra.gmra.mxu1 %v6255_v42 }
 0xbfe   :  { %6601 = vmatpush1.msk.msra.mxu1 %vm1910_vm3, %v6781_v40  ;;  %6397 = vmatprep.mubr.f32.mxu1 %v10742_v33 }
 0xbff   :  { %6363 = vmatprep.subr.mxu1 %v6782_v51 }
 0xc00   :  { %6364 = vmatpush1.msra.mxu1 %v6783_v43 }
 0xcbd   :  { %v6326_v54 = vpop.f32.mrf.mxu1 }
 0xcbe   :  { %6602 = vmatmul.mubr.msk.f32.vlgmr.msra.gmra.mxu1 %vm1901_vm0, %v6326_v54 }
 0xcbf   :  { %v6328_v46 = vpop.f32.mrf.mxu1 }
 0xd7e   :  { %v6399_v1 = vpop.f32.mrf.mxu1 }
 0xd7f   :  { %v6404_v17 = vadd.f32 1.0, %v6399_v1  ;;  %6721 = vrcp.f32 %v6399_v1 }
 0xd80   :  { %v6401_v50 = vpop.f32.mrf.mxu1 }
 0xd81   :  { %6723 = vrcp.f32 %v6404_v17  ;;  %v6405_v33 = vadd.f32 1.0, %v6401_v50 }
 0xd82   :  { %6725 = vrcp.f32 %v6401_v50 }
 0xd83   :  { %6727 = vrcp.f32 %v6405_v33 }
 0xd8c   :  { %v6722_v14 = vpop.eup %6721 }
 0xd8d   :  { %v6411_v48 = vmul.f32 %v6722_v14, %v6191_v10 }
 0xd8e   :  { %v6724_v49 = vpop.eup %6723 }
 0xd8f   :  { %v6726_v4 = vpop.eup %6725  ;;  %v6407_v26 = vmul.f32 %v6724_v49, %v6399_v1 }
 0xd90   :  { %v6728_v36 = vpop.eup %6727  ;;  %v6413_v27 = vmul.f32 %v6726_v4, %v6254_v3 }
 0xd91   :  { %v6409_v53 = vmul.f32 %v6728_v36, %v6401_v50  ;;  %v6414_v5 = vmul.f32 %v6411_v48, %v6407_v26 }
 0xd93   :  { %v6415_v23 = vmul.f32 %v6413_v27, %v6409_v53 }
 0xd95   :  { %v6418_v12 = vcombine.low %v6414_v5, %v6415_v23 }
 0xd97   :  { %6422 = vst.msk [vmem:[#allocation2] sm:$0xff] %vm6421_vm14, %v6418_v12 }
 0xd98   :  { %6795 = shalt.err (!%p6792_p4)
}
 0xd99   :  { %6432 = dma.vmem_to_hbm [thread:$0]  %s6430_s28, 128, %s10042_s4, [#allocation3]  }
 0xd9a   :  { %6804 = dma.done.wait [#allocation3], 128  }
 0xd9b   :  { %6805 = vsyncadd [#allocation3], 4294967168 }
 0xd9c   :  { %6436 = vsyncpa [#allocation3], 1 }

</bundles_post_ra>
